<compile_context>
chip_gen: v6e
topology: v6e:2x2x1
jax: 0.10.0
libtpu: 0.0.40
codegen_flags: <defaults>
</compile_context>

<pallas_src>
import functools
import math

import jax
import jax.numpy as jnp
from jax.experimental import pallas as pl
from jax.experimental.pallas import tpu as pltpu

# ----------------------- model configuration (small, lane-dense) ------------
PATCH = 16            # patch size as in vit_l_16
EMBED = 128           # hidden dim (vit_l_16 uses 1024); multiple of 128 lanes
HEADS = 2
HEAD_DIM = EMBED // HEADS     # 64 -> two heads pack one 128-lane vreg
MLP_DIM = 4 * EMBED           # 512, mirrors the 4x MLP ratio of ViT
NUM_LAYERS = 4
HOOKS = (1, 3)        # analogous to hooks=[4, 11, 17, 23] of the real backbone
NUM_CLASSES = 8
LN_EPS = 1e-6         # torchvision ViT uses LayerNorm(eps=1e-6)
DTYPE = jnp.bfloat16  # bf16 activations/weights feed the MXU; math in fp32

# Default tile sizes for the generic tiled matmul (patch embedding).  Sized so
# double-buffered blocks stay far under the scoped-VMEM default on every
# generation (incl. v7x's 64 MiB part).
TM, TN, TK = 256, 256, 1024


def _ceil_to(x, m):
    return ((x + m - 1) // m) * m


# ------------------------------ Pallas kernels ------------------------------
def _mm_kernel(x_ref, w_ref, b_ref, o_ref, acc_ref, *, n_k):
    """K-tiled matmul + bias.  acc_ref is fp32 VMEM scratch."""
    @pl.when(pl.program_id(2) == 0)
    def _():
        acc_ref[...] = jnp.zeros_like(acc_ref)

    acc_ref[...] += jnp.dot(x_ref[...], w_ref[...],
                            preferred_element_type=jnp.float32)

    @pl.when(pl.program_id(2) == n_k - 1)
    def _():
        y = acc_ref[...] + b_ref[...].astype(jnp.float32)
        o_ref[...] = y.astype(o_ref.dtype)


def matmul_bias(x, w, b, *, tm=TM, tn=TN, tk=TK):
    """x: (M, K) @ w: (K, N) + b: (1, N) with a tiled, pipelined grid."""
    M, K = x.shape
    N = w.shape[1]
    bm = M if M <= tm else tm
    bn = N if N <= tn else tn
    bk = K if K <= tk else tk
    Mp, Np, Kp = _ceil_to(M, bm), _ceil_to(N, bn), _ceil_to(K, bk)
    if (Mp, Kp) != (M, K):
        x = jnp.pad(x, ((0, Mp - M), (0, Kp - K)))
    if (Kp, Np) != (K, N):
        w = jnp.pad(w, ((0, Kp - K), (0, Np - N)))
    if Np != N:
        b = jnp.pad(b, ((0, 0), (0, Np - N)))
    n_k = Kp // bk

    out = pl.pallas_call(
        functools.partial(_mm_kernel, n_k=n_k),
        grid=(Mp // bm, Np // bn, n_k),
        in_specs=[
            pl.BlockSpec((bm, bk), lambda i, j, k: (i, k)),
            pl.BlockSpec((bk, bn), lambda i, j, k: (k, j)),
            pl.BlockSpec((1, bn), lambda i, j, k: (0, j)),
        ],
        out_specs=pl.BlockSpec((bm, bn), lambda i, j, k: (i, j)),
        out_shape=jax.ShapeDtypeStruct((Mp, Np), x.dtype),
        scratch_shapes=[pltpu.VMEM((bm, bn), jnp.float32)],
        compiler_params=pltpu.CompilerParams(
            dimension_semantics=("parallel", "parallel", "arbitrary")),
    )(x, w, b)
    if (Mp, Np) != (M, N):
        out = out[:M, :N]
    return out


def _encoder_layer_kernel(x_ref, ln1g_ref, ln1b_ref, qkvw_ref, qkvb_ref,
                          outw_ref, outb_ref, ln2g_ref, ln2b_ref,
                          fc1w_ref, fc1b_ref, fc2w_ref, fc2b_ref,
                          o_ref, *, heads, head_dim, eps, scale):
    """One full pre-LN transformer encoder layer for one batch element.

    x_ref: (1, S, D).  QKV weight columns are [Q heads | K heads | V heads]
    (standard in_proj layout) so heads are static lane slices; the head merge
    is folded into the out-projection by multiplying per-head row slices of
    W_out and accumulating in fp32 (no concatenate)."""
    D = heads * head_dim
    x = x_ref[0].astype(jnp.float32)                       # (S, D), fp32

    def layer_norm(v, g_ref, b_ref):
        mu = jnp.mean(v, axis=-1, keepdims=True)
        var = jnp.mean(jnp.square(v - mu), axis=-1, keepdims=True)
        vn = (v - mu) * jax.lax.rsqrt(var + eps)
        return vn * g_ref[...].astype(jnp.float32) + b_ref[...].astype(jnp.float32)

    # ---- pre-LN multi-head self-attention ----
    xn = layer_norm(x, ln1g_ref, ln1b_ref)
    qkv = jnp.dot(xn.astype(qkvw_ref.dtype), qkvw_ref[...],
                  preferred_element_type=jnp.float32)
    qkv = (qkv + qkvb_ref[...].astype(jnp.float32)).astype(o_ref.dtype)  # (S, 3D) bf16

    attn = outb_ref[...].astype(jnp.float32)               # (1, D) bias, broadcasts
    for h in range(heads):                                  # static unroll; heads small
        lo = h * head_dim
        q = qkv[:, lo:lo + head_dim]
        k = qkv[:, D + lo:D + lo + head_dim]
        v = qkv[:, 2 * D + lo:2 * D + lo + head_dim]
        # bf16 operands into the MXU, fp32 scores out.
        s = jax.lax.dot_general(q, k, (((1,), (1,)), ((), ())),
                                preferred_element_type=jnp.float32) * scale
        s = s - jnp.max(s, axis=-1, keepdims=True)
        p = jnp.exp(s)                                      # EUP, fp32
        p = p * pl.reciprocal(jnp.sum(p, axis=-1, keepdims=True), approx=True)
        o_h = jnp.dot(p.astype(v.dtype), v, preferred_element_type=jnp.float32)
        # Head-merge folded into the out-projection (rows lo:lo+head_dim of W_out).
        attn = attn + jnp.dot(o_h.astype(outw_ref.dtype),
                              outw_ref[lo:lo + head_dim, :],
                              preferred_element_type=jnp.float32)
    x1 = x + attn                                           # residual (dropout p=0.0)

    # ---- pre-LN MLP ----
    xn2 = layer_norm(x1, ln2g_ref, ln2b_ref)
    h1 = jnp.dot(xn2.astype(fc1w_ref.dtype), fc1w_ref[...],
                 preferred_element_type=jnp.float32)
    # TODO(synk): torch nn.GELU() default is exact erf-GELU; tanh approximation
    # used here (guaranteed Mosaic lowering, ~1e-3 diff).
    h1 = jax.nn.gelu(h1 + fc1b_ref[...].astype(jnp.float32), approximate=True)
    y = jnp.dot(h1.astype(fc2w_ref.dtype), fc2w_ref[...],
                preferred_element_type=jnp.float32)
    y = y + fc2b_ref[...].astype(jnp.float32)
    o_ref[0] = (x1 + y).astype(o_ref.dtype)                 # residual, lane-dense store


def encoder_layer(x, lp, *, heads=HEADS, head_dim=HEAD_DIM, eps=LN_EPS):
    """Fused encoder layer.  x: (B, S, D) -> (B, S, D).  Grid over batch only;
    per-layer weights use constant index_maps (single DMA, VMEM-resident)."""
    B, S, D = x.shape
    scale = 1.0 / math.sqrt(head_dim)
    wrow = lambda b: (0, 0)   # constant block index for all weights / biases
    return pl.pallas_call(
        functools.partial(_encoder_layer_kernel, heads=heads,
                          head_dim=head_dim, eps=eps, scale=scale),
        grid=(B,),
        in_specs=[
            pl.BlockSpec((1, S, D), lambda b: (b, 0, 0)),        # x
            pl.BlockSpec((1, D), wrow), pl.BlockSpec((1, D), wrow),       # ln1 g,b
            pl.BlockSpec((D, 3 * D), wrow), pl.BlockSpec((1, 3 * D), wrow),  # qkv w,b
            pl.BlockSpec((D, D), wrow), pl.BlockSpec((1, D), wrow),       # out w,b
            pl.BlockSpec((1, D), wrow), pl.BlockSpec((1, D), wrow),       # ln2 g,b
            pl.BlockSpec((D, MLP_DIM), wrow), pl.BlockSpec((1, MLP_DIM), wrow),  # fc1
            pl.BlockSpec((MLP_DIM, D), wrow), pl.BlockSpec((1, D), wrow),        # fc2
        ],
        out_specs=pl.BlockSpec((1, S, D), lambda b: (b, 0, 0)),
        out_shape=jax.ShapeDtypeStruct((B, S, D), x.dtype),
        compiler_params=pltpu.CompilerParams(
            dimension_semantics=("parallel",)),
    )(x, lp["ln1_g"], lp["ln1_b"], lp["qkv_w"], lp["qkv_b"],
      lp["out_w"], lp["out_b"], lp["ln2_g"], lp["ln2_b"],
      lp["fc1_w"], lp["fc1_b"], lp["fc2_w"], lp["fc2_b"])


def _ln_head_kernel(x_ref, g_ref, bln_ref, w_ref, b_ref, o_ref, *, eps):
    """Final LayerNorm + classification head, class-token rows only."""
    x = x_ref[...].astype(jnp.float32)
    mu = jnp.mean(x, axis=-1, keepdims=True)
    var = jnp.mean(jnp.square(x - mu), axis=-1, keepdims=True)
    xn = (x - mu) * jax.lax.rsqrt(var + eps)
    xn = xn * g_ref[...].astype(jnp.float32) + bln_ref[...].astype(jnp.float32)
    y = jnp.dot(xn.astype(w_ref.dtype), w_ref[...],
                preferred_element_type=jnp.float32)
    o_ref[...] = (y + b_ref[...].astype(jnp.float32)).astype(o_ref.dtype)


def ln_head(cls_tok, g, bln, w, b, *, eps=LN_EPS):
    B = cls_tok.shape[0]
    return pl.pallas_call(
        functools.partial(_ln_head_kernel, eps=eps),
        out_shape=jax.ShapeDtypeStruct((B, w.shape[1]), jnp.float32),
    )(cls_tok, g, bln, w, b)


# ------------------------------ parameters ----------------------------------
def init_params(key, c_in, img_size):
    n_patches = (img_size // PATCH) ** 2
    seq_len = 1 + n_patches

    def nrm(k, shape, scale=0.02):
        return (scale * jax.random.normal(k, shape, dtype=jnp.float32)).astype(DTYPE)

    keys = iter(jax.random.split(key, 3 + 4 * NUM_LAYERS))
    params = {
        # conv_proj weights stored pre-flattened: (C*ps*ps, D); bias (1, D).
        "conv_w": nrm(next(keys), (c_in * PATCH * PATCH, EMBED)),
        "conv_b": jnp.zeros((1, EMBED), DTYPE),
        "class_token": jnp.zeros((1, 1, EMBED), DTYPE),
        # TODO(synk): torchvision's interpolate_embeddings (bicubic pos-embed
        # resize) is unnecessary here: the pos-embedding is created at target length.
        "pos_embedding": nrm(next(keys), (1, seq_len, EMBED)),
        "ln_g": jnp.ones((1, EMBED), DTYPE),
        "ln_b": jnp.zeros((1, EMBED), DTYPE),
        "head_w": nrm(next(keys), (EMBED, NUM_CLASSES)),
        "head_b": jnp.zeros((1, NUM_CLASSES), DTYPE),
        "layers": [],
    }
    for _ in range(NUM_LAYERS):
        # qkv_w columns laid out [Q heads | K heads | V heads] (standard
        # in_proj layout) so the attention code slices heads with no transposes
        # and the head-merged output feeds out_w row slices directly.
        params["layers"].append({
            "ln1_g": jnp.ones((1, EMBED), DTYPE),
            "ln1_b": jnp.zeros((1, EMBED), DTYPE),
            "qkv_w": nrm(next(keys), (EMBED, 3 * EMBED)),
            "qkv_b": jnp.zeros((1, 3 * EMBED), DTYPE),
            "out_w": nrm(next(keys), (EMBED, EMBED)),
            "out_b": jnp.zeros((1, EMBED), DTYPE),
            "ln2_g": jnp.ones((1, EMBED), DTYPE),
            "ln2_b": jnp.zeros((1, EMBED), DTYPE),
            "fc1_w": nrm(next(keys), (EMBED, MLP_DIM)),
            "fc1_b": jnp.zeros((1, MLP_DIM), DTYPE),
            "fc2_w": nrm(next(keys), (MLP_DIM, EMBED)),
            "fc2_b": jnp.zeros((1, EMBED), DTYPE),
        })
    return params


# ------------------------------ forward pass ---------------------------------
def vit_forward(params, X):
    """X: NCHW (B, C, H, W).  Returns (logits (B, NUM_CLASSES),
    features {f'encoder_layer_{h}': (B, 1+#patches, D)}) — mirrors the PyTorch
    module's `self.model(X)` output plus its forward-hook side effects."""
    B, C, H, W = X.shape
    assert W % PATCH == 0, "Image shape is not divisible by patch_size"
    assert H == W, "H and W does not match"

    # ---- patch embedding: Conv2d(k=16, s=16) -> patchify + tiled matmul ----
    # TODO(synk): at real image sizes the 6-D patchify transpose could be
    # folded into the embed kernel's BlockSpec index_map; kept as XLA glue.
    hp, wp = H // PATCH, W // PATCH
    P = hp * wp
    x = X.astype(DTYPE).reshape(B, C, hp, PATCH, wp, PATCH)
    x = jnp.transpose(x, (0, 2, 4, 1, 3, 5)).reshape(B * P, C * PATCH * PATCH)
    x = matmul_bias(x, params["conv_w"], params["conv_b"])        # (B*P, D)
    x = x.reshape(B, P, EMBED)

    # ---- class token + (already correctly sized) position embedding ----
    cls = jnp.broadcast_to(params["class_token"], (B, 1, EMBED))
    x = jnp.concatenate([cls, x], axis=1) + params["pos_embedding"]   # (B,S,D)

    features = {}
    for li, lp in enumerate(params["layers"]):
        # One fused pallas_call per encoder layer (LN1->MHSA->+res->LN2->MLP->+res).
        x = encoder_layer(x, lp)
        if li in HOOKS:   # emulates register_forward_hook on encoder_layer_{li}
            features[f"encoder_layer_{li}"] = x

    # ---- final LayerNorm + classification head on the class token only ----
    logits = ln_head(x[:, 0], params["ln_g"], params["ln_b"],
                     params["head_w"], params["head_b"])
    return logits, features


# ---------------------------------- main -------------------------------------
if __name__ == "__main__":
    key = jax.random.PRNGKey(0)
    pkey, xkey = jax.random.split(key)

    B, C_IN, IMG = 2, 3, 32                       # 32x32 -> 4 patches, S=5
    X = jax.random.normal(xkey, (B, C_IN, IMG, IMG), dtype=jnp.float32)

    params = init_params(pkey, c_in=C_IN, img_size=IMG)
    fwd = jax.jit(vit_forward)
    logits, feats = fwd(params, X)

    jax.block_until_ready(logits)
    for v in feats.values():
        jax.block_until_ready(v)

    n_patches = (IMG // PATCH) ** 2
    assert logits.shape == (B, NUM_CLASSES)
    for h in HOOKS:
        assert feats[f"encoder_layer_{h}"].shape == (B, 1 + n_patches, EMBED)
    assert all(bool(jnp.isfinite(v.astype(jnp.float32)).all())
               for v in feats.values())
    assert bool(jnp.isfinite(logits).all())

    print("KERNEL_OK")
</pallas_src>

<mosaic_0001>
module attributes {stable_mosaic.version = 11 : i64} {
  func.func @_mm_kernel(%arg0: i32, %arg1: i32, %arg2: i32, %arg3: memref<8x768xbf16, #tpu.memory_space<vmem>>, %arg4: memref<768x128xbf16, #tpu.memory_space<vmem>>, %arg5: memref<1x128xbf16, #tpu.memory_space<vmem>>, %arg6: memref<8x128xbf16, #tpu.memory_space<vmem>>, %arg7: memref<8x128xf32, #tpu.memory_space<vmem>>) attributes {dimension_semantics = [#tpu.dimension_semantics<parallel>, #tpu.dimension_semantics<parallel>, #tpu.dimension_semantics<arbitrary>], iteration_bounds = array<i64: 1, 1, 1>, scalar_prefetch = 0 : i64, scratch_operands = 1 : i64, tpu.core_type = #tpu.core_type<tc>, window_params = [{transform_indices = @transform_0, window_bounds = array<i64: 8, 768>}, {transform_indices = @transform_1, window_bounds = array<i64: 768, 128>}, {transform_indices = @transform_2, window_bounds = array<i64: 1, 128>}, {transform_indices = @transform_3, window_bounds = array<i64: 8, 128>}]} {
    %c0_i32 = arith.constant 0 : i32
    %0 = arith.cmpi eq, %arg2, %c0_i32 : i32
    %1 = arith.extui %0 : i1 to i32
    %c0_i32_0 = arith.constant 0 : i32
    %2 = arith.cmpi ne, %1, %c0_i32_0 : i32
    scf.if %2 {
      %cst_10 = arith.constant 0.000000e+00 : f32
      %12 = vector.broadcast %cst_10 : f32 to vector<8x128xf32>
      %c0_11 = arith.constant 0 : index
      %c0_12 = arith.constant 0 : index
      %13 = vector.load %arg7[%c0_11, %c0_12] : memref<8x128xf32, #tpu.memory_space<vmem>>, vector<8x128xf32>
      tpu.vector_store %arg7[%c0_11, %c0_12], %12 {strides = array<i32>} : memref<8x128xf32, #tpu.memory_space<vmem>>, vector<8x128xf32>,
    } else {
    }
    %c0 = arith.constant 0 : index
    %c0_1 = arith.constant 0 : index
    %3 = vector.load %arg7[%c0, %c0_1] : memref<8x128xf32, #tpu.memory_space<vmem>>, vector<8x128xf32>
    %c0_2 = arith.constant 0 : index
    %c0_3 = arith.constant 0 : index
    %4 = vector.load %arg3[%c0_2, %c0_3] : memref<8x768xbf16, #tpu.memory_space<vmem>>, vector<8x768xbf16>
    %c0_4 = arith.constant 0 : index
    %c0_5 = arith.constant 0 : index
    %5 = vector.load %arg4[%c0_4, %c0_5] : memref<768x128xbf16, #tpu.memory_space<vmem>>, vector<768x128xbf16>
    %cst = arith.constant dense<0.000000e+00> : vector<8x128xf32>
    %6 = tpu.matmul %4, %5, %cst {dimension_numbers = #tpu.dot_dimension_numbers<[1], [0], [0], [1], [0, 0, 1, 1], [], []>} : vector<8x768xbf16>, vector<768x128xbf16>, vector<8x128xf32> -> vector<8x128xf32>
    %7 = arith.addf %3, %6 : vector<8x128xf32>
    %c0_6 = arith.constant 0 : index
    %c0_7 = arith.constant 0 : index
    %8 = vector.load %arg7[%c0_6, %c0_7] : memref<8x128xf32, #tpu.memory_space<vmem>>, vector<8x128xf32>
    tpu.vector_store %arg7[%c0_6, %c0_7], %7 {strides = array<i32>} : memref<8x128xf32, #tpu.memory_space<vmem>>, vector<8x128xf32>,
    %c0_i32_8 = arith.constant 0 : i32
    %9 = arith.cmpi eq, %arg2, %c0_i32_8 : i32
    %10 = arith.extui %9 : i1 to i32
    %c0_i32_9 = arith.constant 0 : i32
    %11 = arith.cmpi ne, %10, %c0_i32_9 : i32
    scf.if %11 {
      %c0_10 = arith.constant 0 : index
      %c0_11 = arith.constant 0 : index
      %12 = vector.load %arg7[%c0_10, %c0_11] : memref<8x128xf32, #tpu.memory_space<vmem>>, vector<8x128xf32>
      %c0_12 = arith.constant 0 : index
      %c0_13 = arith.constant 0 : index
      %13 = vector.load %arg5[%c0_12, %c0_13] : memref<1x128xbf16, #tpu.memory_space<vmem>>, vector<1x128xbf16>
      %14 = arith.extf %13 : vector<1x128xbf16> to vector<1x128xf32>
      %15 = vector.broadcast %14 : vector<1x128xf32> to vector<8x128xf32>
      %16 = arith.addf %12, %15 : vector<8x128xf32>
      %17 = arith.truncf %16 : vector<8x128xf32> to vector<8x128xbf16>
      %c0_14 = arith.constant 0 : index
      %c0_15 = arith.constant 0 : index
      %18 = vector.load %arg6[%c0_14, %c0_15] : memref<8x128xbf16, #tpu.memory_space<vmem>>, vector<8x128xbf16>
      tpu.vector_store %arg6[%c0_14, %c0_15], %17 {strides = array<i32>} : memref<8x128xbf16, #tpu.memory_space<vmem>>, vector<8x128xbf16>,
    } else {
    }
    return
  }
  func.func @transform_0(%arg0: i32, %arg1: i32, %arg2: i32) -> (i32, i32) {
    %c0_i32 = arith.constant 0 : i32
    return %arg0, %arg2 : i32, i32
  }
  func.func @transform_1(%arg0: i32, %arg1: i32, %arg2: i32) -> (i32, i32) {
    %c0_i32 = arith.constant 0 : i32
    return %arg2, %arg1 : i32, i32
  }
  func.func @transform_2(%arg0: i32, %arg1: i32, %arg2: i32) -> (i32, i32) {
    %c0_i32 = arith.constant 0 : i32
    %c0_i32_0 = arith.constant 0 : i32
    return %c0_i32, %arg1 : i32, i32
  }
  func.func @transform_3(%arg0: i32, %arg1: i32, %arg2: i32) -> (i32, i32) {
    %c0_i32 = arith.constant 0 : i32
    return %arg0, %arg1 : i32, i32
  }
}

module attributes {stable_mosaic.version = 11 : i64} {
  func.func @_encoder_layer_kernel(%arg0: i32, %arg1: memref<1x5x128xbf16, #tpu.memory_space<vmem>>, %arg2: memref<1x128xbf16, #tpu.memory_space<vmem>>, %arg3: memref<1x128xbf16, #tpu.memory_space<vmem>>, %arg4: memref<128x384xbf16, #tpu.memory_space<vmem>>, %arg5: memref<1x384xbf16, #tpu.memory_space<vmem>>, %arg6: memref<128x128xbf16, #tpu.memory_space<vmem>>, %arg7: memref<1x128xbf16, #tpu.memory_space<vmem>>, %arg8: memref<1x128xbf16, #tpu.memory_space<vmem>>, %arg9: memref<1x128xbf16, #tpu.memory_space<vmem>>, %arg10: memref<128x512xbf16, #tpu.memory_space<vmem>>, %arg11: memref<1x512xbf16, #tpu.memory_space<vmem>>, %arg12: memref<512x128xbf16, #tpu.memory_space<vmem>>, %arg13: memref<1x128xbf16, #tpu.memory_space<vmem>>, %arg14: memref<1x5x128xbf16, #tpu.memory_space<vmem>>) attributes {dimension_semantics = [#tpu.dimension_semantics<parallel>], iteration_bounds = array<i64: 2>, scalar_prefetch = 0 : i64, scratch_operands = 0 : i64, tpu.core_type = #tpu.core_type<tc>, window_params = [{transform_indices = @transform_0, window_bounds = array<i64: 1, 5, 128>}, {pipeline_mode = #tpu.pipeline_mode<synchronous>, transform_indices = @transform_1, window_bounds = array<i64: 1, 128>}, {pipeline_mode = #tpu.pipeline_mode<synchronous>, transform_indices = @transform_2, window_bounds = array<i64: 1, 128>}, {pipeline_mode = #tpu.pipeline_mode<synchronous>, transform_indices = @transform_3, window_bounds = array<i64: 128, 384>}, {pipeline_mode = #tpu.pipeline_mode<synchronous>, transform_indices = @transform_4, window_bounds = array<i64: 1, 384>}, {pipeline_mode = #tpu.pipeline_mode<synchronous>, transform_indices = @transform_5, window_bounds = array<i64: 128, 128>}, {pipeline_mode = #tpu.pipeline_mode<synchronous>, transform_indices = @transform_6, window_bounds = array<i64: 1, 128>}, {pipeline_mode = #tpu.pipeline_mode<synchronous>, transform_indices = @transform_7, window_bounds = array<i64: 1, 128>}, {pipeline_mode = #tpu.pipeline_mode<synchronous>, transform_indices = @transform_8, window_bounds = array<i64: 1, 128>}, {pipeline_mode = #tpu.pipeline_mode<synchronous>, transform_indices = @transform_9, window_bounds = array<i64: 128, 512>}, {pipeline_mode = #tpu.pipeline_mode<synchronous>, transform_indices = @transform_10, window_bounds = array<i64: 1, 512>}, {pipeline_mode = #tpu.pipeline_mode<synchronous>, transform_indices = @transform_11, window_bounds = array<i64: 512, 128>}, {pipeline_mode = #tpu.pipeline_mode<synchronous>, transform_indices = @transform_12, window_bounds = array<i64: 1, 128>}, {transform_indices = @transform_13, window_bounds = array<i64: 1, 5, 128>}]} {
    %c0 = arith.constant 0 : index
    %c0_0 = arith.constant 0 : index
    %c0_1 = arith.constant 0 : index
    %0 = vector.load %arg1[%c0, %c0_0, %c0_1] : memref<1x5x128xbf16, #tpu.memory_space<vmem>>, vector<1x5x128xbf16>
    %1 = vector.shape_cast %0 : vector<1x5x128xbf16> to vector<5x128xbf16>
    %2 = arith.extf %1 : vector<5x128xbf16> to vector<5x128xf32>
    %cst = arith.constant dense<0.000000e+00> : vector<5xf32>
    %3 = vector.multi_reduction <add>, %2, %cst [1] : vector<5x128xf32> to vector<5xf32>
    %4 = vector.shape_cast %3 : vector<5xf32> to vector<5x1xf32>
    %cst_2 = arith.constant 1.280000e+02 : f32
    %5 = vector.broadcast %cst_2 : f32 to vector<5x1xf32>
    %6 = arith.divf %4, %5 : vector<5x1xf32>
    %7 = vector.broadcast %6 : vector<5x1xf32> to vector<5x128xf32>
    %8 = arith.subf %2, %7 : vector<5x128xf32>
    %9 = arith.mulf %8, %8 : vector<5x128xf32>
    %cst_3 = arith.constant dense<0.000000e+00> : vector<5xf32>
    %10 = vector.multi_reduction <add>, %9, %cst_3 [1] : vector<5x128xf32> to vector<5xf32>
    %11 = vector.shape_cast %10 : vector<5xf32> to vector<5x1xf32>
    %cst_4 = arith.constant 1.280000e+02 : f32
    %12 = vector.broadcast %cst_4 : f32 to vector<5x1xf32>
    %13 = arith.divf %11, %12 : vector<5x1xf32>
    %14 = vector.broadcast %6 : vector<5x1xf32> to vector<5x128xf32>
    %15 = arith.subf %2, %14 : vector<5x128xf32>
    %cst_5 = arith.constant 9.99999997E-7 : f32
    %16 = vector.broadcast %cst_5 : f32 to vector<5x1xf32>
    %17 = arith.addf %13, %16 : vector<5x1xf32>
    %18 = math.rsqrt %17 : vector<5x1xf32>
    %19 = vector.broadcast %18 : vector<5x1xf32> to vector<5x128xf32>
    %20 = arith.mulf %15, %19 : vector<5x128xf32>
    %c0_6 = arith.constant 0 : index
    %c0_7 = arith.constant 0 : index
    %21 = vector.load %arg2[%c0_6, %c0_7] : memref<1x128xbf16, #tpu.memory_space<vmem>>, vector<1x128xbf16>
    %22 = arith.extf %21 : vector<1x128xbf16> to vector<1x128xf32>
    %23 = vector.broadcast %22 : vector<1x128xf32> to vector<5x128xf32>
    %24 = arith.mulf %20, %23 : vector<5x128xf32>
    %c0_8 = arith.constant 0 : index
    %c0_9 = arith.constant 0 : index
    %25 = vector.load %arg3[%c0_8, %c0_9] : memref<1x128xbf16, #tpu.memory_space<vmem>>, vector<1x128xbf16>
    %26 = arith.extf %25 : vector<1x128xbf16> to vector<1x128xf32>
    %27 = vector.broadcast %26 : vector<1x128xf32> to vector<5x128xf32>
    %28 = arith.addf %24, %27 : vector<5x128xf32>
    %29 = arith.truncf %28 : vector<5x128xf32> to vector<5x128xbf16>
    %c0_10 = arith.constant 0 : index
    %c0_11 = arith.constant 0 : index
    %30 = vector.load %arg4[%c0_10, %c0_11] : memref<128x384xbf16, #tpu.memory_space<vmem>>, vector<128x384xbf16>
    %cst_12 = arith.constant dense<0.000000e+00> : vector<5x384xf32>
    %31 = tpu.matmul %29, %30, %cst_12 {dimension_numbers = #tpu.dot_dimension_numbers<[1], [0], [0], [1], [0, 0, 1, 1], [], []>} : vector<5x128xbf16>, vector<128x384xbf16>, vector<5x384xf32> -> vector<5x384xf32>
    %c0_13 = arith.constant 0 : index
    %c0_14 = arith.constant 0 : index
    %32 = vector.load %arg5[%c0_13, %c0_14] : memref<1x384xbf16, #tpu.memory_space<vmem>>, vector<1x384xbf16>
    %33 = arith.extf %32 : vector<1x384xbf16> to vector<1x384xf32>
    %34 = vector.broadcast %33 : vector<1x384xf32> to vector<5x384xf32>
    %35 = arith.addf %31, %34 : vector<5x384xf32>
    %36 = arith.truncf %35 : vector<5x384xf32> to vector<5x384xbf16>
    %c0_15 = arith.constant 0 : index
    %c0_16 = arith.constant 0 : index
    %37 = vector.load %arg7[%c0_15, %c0_16] : memref<1x128xbf16, #tpu.memory_space<vmem>>, vector<1x128xbf16>
    %38 = arith.extf %37 : vector<1x128xbf16> to vector<1x128xf32>
    %39 = vector.extract_strided_slice %36 {offsets = [0, 0], sizes = [5, 64], strides = [1, 1]} : vector<5x384xbf16> to vector<5x64xbf16>
    %40 = vector.extract_strided_slice %36 {offsets = [0, 128], sizes = [5, 64], strides = [1, 1]} : vector<5x384xbf16> to vector<5x64xbf16>
    %41 = vector.extract_strided_slice %36 {offsets = [0, 256], sizes = [5, 64], strides = [1, 1]} : vector<5x384xbf16> to vector<5x64xbf16>
    %cst_17 = arith.constant dense<0.000000e+00> : vector<5x5xf32>
    %42 = tpu.matmul %39, %40, %cst_17 {dimension_numbers = #tpu.dot_dimension_numbers<[1], [1], [0], [0], [0, 0, 1, 0], [], []>} : vector<5x64xbf16>, vector<5x64xbf16>, vector<5x5xf32> -> vector<5x5xf32>
    %cst_18 = arith.constant 1.250000e-01 : f32
    %43 = vector.broadcast %cst_18 : f32 to vector<5x5xf32>
    %44 = arith.mulf %42, %43 : vector<5x5xf32>
    %cst_19 = arith.constant dense<0xFF800000> : vector<5xf32>
    %45 = vector.multi_reduction <maximumf>, %44, %cst_19 [1] : vector<5x5xf32> to vector<5xf32>
    %46 = vector.shape_cast %45 : vector<5xf32> to vector<5x1xf32>
    %47 = vector.broadcast %46 : vector<5x1xf32> to vector<5x5xf32>
    %48 = arith.subf %44, %47 : vector<5x5xf32>
    %49 = math.exp %48 : vector<5x5xf32>
    %cst_20 = arith.constant dense<0.000000e+00> : vector<5xf32>
    %50 = vector.multi_reduction <add>, %49, %cst_20 [1] : vector<5x5xf32> to vector<5xf32>
    %51 = vector.shape_cast %50 : vector<5xf32> to vector<5x1xf32>
    %52 = tpu.reciprocal %51 {approx = true} : vector<5x1xf32> -> vector<5x1xf32>
    %53 = vector.broadcast %52 : vector<5x1xf32> to vector<5x5xf32>
    %54 = arith.mulf %49, %53 : vector<5x5xf32>
    %55 = arith.truncf %54 : vector<5x5xf32> to vector<5x5xbf16>
    %cst_21 = arith.constant dense<0.000000e+00> : vector<5x64xf32>
    %56 = tpu.matmul %55, %41, %cst_21 {dimension_numbers = #tpu.dot_dimension_numbers<[1], [0], [0], [1], [0, 0, 1, 1], [], []>} : vector<5x5xbf16>, vector<5x64xbf16>, vector<5x64xf32> -> vector<5x64xf32>
    %57 = arith.truncf %56 : vector<5x64xf32> to vector<5x64xbf16>
    %c0_22 = arith.constant 0 : index
    %c0_23 = arith.constant 0 : index
    %58 = vector.load %arg6[%c0_22, %c0_23] : memref<128x128xbf16, #tpu.memory_space<vmem>>, vector<64x128xbf16>
    %cst_24 = arith.constant dense<0.000000e+00> : vector<5x128xf32>
    %59 = tpu.matmul %57, %58, %cst_24 {dimension_numbers = #tpu.dot_dimension_numbers<[1], [0], [0], [1], [0, 0, 1, 1], [], []>} : vector<5x64xbf16>, vector<64x128xbf16>, vector<5x128xf32> -> vector<5x128xf32>
    %60 = vector.broadcast %38 : vector<1x128xf32> to vector<5x128xf32>
    %61 = arith.addf %60, %59 : vector<5x128xf32>
    %62 = vector.extract_strided_slice %36 {offsets = [0, 64], sizes = [5, 64], strides = [1, 1]} : vector<5x384xbf16> to vector<5x64xbf16>
    %63 = vector.extract_strided_slice %36 {offsets = [0, 192], sizes = [5, 64], strides = [1, 1]} : vector<5x384xbf16> to vector<5x64xbf16>
    %64 = vector.extract_strided_slice %36 {offsets = [0, 320], sizes = [5, 64], strides = [1, 1]} : vector<5x384xbf16> to vector<5x64xbf16>
    %cst_25 = arith.constant dense<0.000000e+00> : vector<5x5xf32>
    %65 = tpu.matmul %62, %63, %cst_25 {dimension_numbers = #tpu.dot_dimension_numbers<[1], [1], [0], [0], [0, 0, 1, 0], [], []>} : vector<5x64xbf16>, vector<5x64xbf16>, vector<5x5xf32> -> vector<5x5xf32>
    %cst_26 = arith.constant 1.250000e-01 : f32
    %66 = vector.broadcast %cst_26 : f32 to vector<5x5xf32>
    %67 = arith.mulf %65, %66 : vector<5x5xf32>
    %cst_27 = arith.constant dense<0xFF800000> : vector<5xf32>
    %68 = vector.multi_reduction <maximumf>, %67, %cst_27 [1] : vector<5x5xf32> to vector<5xf32>
    %69 = vector.shape_cast %68 : vector<5xf32> to vector<5x1xf32>
    %70 = vector.broadcast %69 : vector<5x1xf32> to vector<5x5xf32>
    %71 = arith.subf %67, %70 : vector<5x5xf32>
    %72 = math.exp %71 : vector<5x5xf32>
    %cst_28 = arith.constant dense<0.000000e+00> : vector<5xf32>
    %73 = vector.multi_reduction <add>, %72, %cst_28 [1] : vector<5x5xf32> to vector<5xf32>
    %74 = vector.shape_cast %73 : vector<5xf32> to vector<5x1xf32>
    %75 = tpu.reciprocal %74 {approx = true} : vector<5x1xf32> -> vector<5x1xf32>
    %76 = vector.broadcast %75 : vector<5x1xf32> to vector<5x5xf32>
    %77 = arith.mulf %72, %76 : vector<5x5xf32>
    %78 = arith.truncf %77 : vector<5x5xf32> to vector<5x5xbf16>
    %cst_29 = arith.constant dense<0.000000e+00> : vector<5x64xf32>
    %79 = tpu.matmul %78, %64, %cst_29 {dimension_numbers = #tpu.dot_dimension_numbers<[1], [0], [0], [1], [0, 0, 1, 1], [], []>} : vector<5x5xbf16>, vector<5x64xbf16>, vector<5x64xf32> -> vector<5x64xf32>
    %80 = arith.truncf %79 : vector<5x64xf32> to vector<5x64xbf16>
    %c64 = arith.constant 64 : index
    %c0_30 = arith.constant 0 : index
    %81 = vector.load %arg6[%c64, %c0_30] : memref<128x128xbf16, #tpu.memory_space<vmem>>, vector<64x128xbf16>
    %cst_31 = arith.constant dense<0.000000e+00> : vector<5x128xf32>
    %82 = tpu.matmul %80, %81, %cst_31 {dimension_numbers = #tpu.dot_dimension_numbers<[1], [0], [0], [1], [0, 0, 1, 1], [], []>} : vector<5x64xbf16>, vector<64x128xbf16>, vector<5x128xf32> -> vector<5x128xf32>
    %83 = arith.addf %61, %82 : vector<5x128xf32>
    %84 = arith.addf %2, %83 : vector<5x128xf32>
    %cst_32 = arith.constant dense<0.000000e+00> : vector<5xf32>
    %85 = vector.multi_reduction <add>, %84, %cst_32 [1] : vector<5x128xf32> to vector<5xf32>
    %86 = vector.shape_cast %85 : vector<5xf32> to vector<5x1xf32>
    %cst_33 = arith.constant 1.280000e+02 : f32
    %87 = vector.broadcast %cst_33 : f32 to vector<5x1xf32>
    %88 = arith.divf %86, %87 : vector<5x1xf32>
    %89 = vector.broadcast %88 : vector<5x1xf32> to vector<5x128xf32>
    %90 = arith.subf %84, %89 : vector<5x128xf32>
    %91 = arith.mulf %90, %90 : vector<5x128xf32>
    %cst_34 = arith.constant dense<0.000000e+00> : vector<5xf32>
    %92 = vector.multi_reduction <add>, %91, %cst_34 [1] : vector<5x128xf32> to vector<5xf32>
    %93 = vector.shape_cast %92 : vector<5xf32> to vector<5x1xf32>
    %cst_35 = arith.constant 1.280000e+02 : f32
    %94 = vector.broadcast %cst_35 : f32 to vector<5x1xf32>
    %95 = arith.divf %93, %94 : vector<5x1xf32>
    %96 = vector.broadcast %88 : vector<5x1xf32> to vector<5x128xf32>
    %97 = arith.subf %84, %96 : vector<5x128xf32>
    %cst_36 = arith.constant 9.99999997E-7 : f32
    %98 = vector.broadcast %cst_36 : f32 to vector<5x1xf32>
    %99 = arith.addf %95, %98 : vector<5x1xf32>
    %100 = math.rsqrt %99 : vector<5x1xf32>
    %101 = vector.broadcast %100 : vector<5x1xf32> to vector<5x128xf32>
    %102 = arith.mulf %97, %101 : vector<5x128xf32>
    %c0_37 = arith.constant 0 : index
    %c0_38 = arith.constant 0 : index
    %103 = vector.load %arg8[%c0_37, %c0_38] : memref<1x128xbf16, #tpu.memory_space<vmem>>, vector<1x128xbf16>
    %104 = arith.extf %103 : vector<1x128xbf16> to vector<1x128xf32>
    %105 = vector.broadcast %104 : vector<1x128xf32> to vector<5x128xf32>
    %106 = arith.mulf %102, %105 : vector<5x128xf32>
    %c0_39 = arith.constant 0 : index
    %c0_40 = arith.constant 0 : index
    %107 = vector.load %arg9[%c0_39, %c0_40] : memref<1x128xbf16, #tpu.memory_space<vmem>>, vector<1x128xbf16>
    %108 = arith.extf %107 : vector<1x128xbf16> to vector<1x128xf32>
    %109 = vector.broadcast %108 : vector<1x128xf32> to vector<5x128xf32>
    %110 = arith.addf %106, %109 : vector<5x128xf32>
    %111 = arith.truncf %110 : vector<5x128xf32> to vector<5x128xbf16>
    %c0_41 = arith.constant 0 : index
    %c0_42 = arith.constant 0 : index
    %112 = vector.load %arg10[%c0_41, %c0_42] : memref<128x512xbf16, #tpu.memory_space<vmem>>, vector<128x512xbf16>
    %cst_43 = arith.constant dense<0.000000e+00> : vector<5x512xf32>
    %113 = tpu.matmul %111, %112, %cst_43 {dimension_numbers = #tpu.dot_dimension_numbers<[1], [0], [0], [1], [0, 0, 1, 1], [], []>} : vector<5x128xbf16>, vector<128x512xbf16>, vector<5x512xf32> -> vector<5x512xf32>
    %c0_44 = arith.constant 0 : index
    %c0_45 = arith.constant 0 : index
    %114 = vector.load %arg11[%c0_44, %c0_45] : memref<1x512xbf16, #tpu.memory_space<vmem>>, vector<1x512xbf16>
    %115 = arith.extf %114 : vector<1x512xbf16> to vector<1x512xf32>
    %116 = vector.broadcast %115 : vector<1x512xf32> to vector<5x512xf32>
    %117 = arith.addf %113, %116 : vector<5x512xf32>
    %118 = arith.mulf %117, %117 : vector<5x512xf32>
    %119 = arith.mulf %117, %118 : vector<5x512xf32>
    %cst_46 = arith.constant 4.471500e-02 : f32
    %120 = vector.broadcast %cst_46 : f32 to vector<5x512xf32>
    %121 = arith.mulf %120, %119 : vector<5x512xf32>
    %122 = arith.addf %117, %121 : vector<5x512xf32>
    %cst_47 = arith.constant 0.797884583 : f32
    %123 = vector.broadcast %cst_47 : f32 to vector<5x512xf32>
    %124 = arith.mulf %123, %122 : vector<5x512xf32>
    %125 = math.tanh %124 : vector<5x512xf32>
    %cst_48 = arith.constant 1.000000e+00 : f32
    %126 = vector.broadcast %cst_48 : f32 to vector<5x512xf32>
    %127 = arith.addf %126, %125 : vector<5x512xf32>
    %cst_49 = arith.constant 5.000000e-01 : f32
    %128 = vector.broadcast %cst_49 : f32 to vector<5x512xf32>
    %129 = arith.mulf %128, %127 : vector<5x512xf32>
    %130 = arith.mulf %117, %129 : vector<5x512xf32>
    %131 = arith.truncf %130 : vector<5x512xf32> to vector<5x512xbf16>
    %c0_50 = arith.constant 0 : index
    %c0_51 = arith.constant 0 : index
    %132 = vector.load %arg12[%c0_50, %c0_51] : memref<512x128xbf16, #tpu.memory_space<vmem>>, vector<512x128xbf16>
    %cst_52 = arith.constant dense<0.000000e+00> : vector<5x128xf32>
    %133 = tpu.matmul %131, %132, %cst_52 {dimension_numbers = #tpu.dot_dimension_numbers<[1], [0], [0], [1], [0, 0, 1, 1], [], []>} : vector<5x512xbf16>, vector<512x128xbf16>, vector<5x128xf32> -> vector<5x128xf32>
    %c0_53 = arith.constant 0 : index
    %c0_54 = arith.constant 0 : index
    %134 = vector.load %arg13[%c0_53, %c0_54] : memref<1x128xbf16, #tpu.memory_space<vmem>>, vector<1x128xbf16>
    %135 = arith.extf %134 : vector<1x128xbf16> to vector<1x128xf32>
    %136 = vector.broadcast %135 : vector<1x128xf32> to vector<5x128xf32>
    %137 = arith.addf %133, %136 : vector<5x128xf32>
    %138 = arith.addf %84, %137 : vector<5x128xf32>
    %139 = arith.truncf %138 : vector<5x128xf32> to vector<5x128xbf16>
    %c0_55 = arith.constant 0 : index
    %c0_56 = arith.constant 0 : index
    %c0_57 = arith.constant 0 : index
    %140 = vector.load %arg14[%c0_55, %c0_56, %c0_57] : memref<1x5x128xbf16, #tpu.memory_space<vmem>>, vector<1x5x128xbf16>
    %141 = vector.shape_cast %140 : vector<1x5x128xbf16> to vector<5x128xbf16>
    %142 = vector.shape_cast %139 : vector<5x128xbf16> to vector<1x5x128xbf16>
    tpu.vector_store %arg14[%c0_55, %c0_56, %c0_57], %142 {strides = array<i32>} : memref<1x5x128xbf16, #tpu.memory_space<vmem>>, vector<1x5x128xbf16>,
    return
  }
  func.func @transform_0(%arg0: i32) -> (i32, i32, i32) {
    %c0_i32 = arith.constant 0 : i32
    %c0_i32_0 = arith.constant 0 : i32
    %c0_i32_1 = arith.constant 0 : i32
    return %arg0, %c0_i32, %c0_i32_0 : i32, i32, i32
  }
  func.func @transform_1(%arg0: i32) -> (i32, i32) {
    %c0_i32 = arith.constant 0 : i32
    %c0_i32_0 = arith.constant 0 : i32
    %c0_i32_1 = arith.constant 0 : i32
    return %c0_i32, %c0_i32_0 : i32, i32
  }
  func.func @transform_2(%arg0: i32) -> (i32, i32) {
    %c0_i32 = arith.constant 0 : i32
    %c0_i32_0 = arith.constant 0 : i32
    %c0_i32_1 = arith.constant 0 : i32
    return %c0_i32, %c0_i32_0 : i32, i32
  }
  func.func @transform_3(%arg0: i32) -> (i32, i32) {
    %c0_i32 = arith.constant 0 : i32
    %c0_i32_0 = arith.constant 0 : i32
    %c0_i32_1 = arith.constant 0 : i32
    return %c0_i32, %c0_i32_0 : i32, i32
  }
  func.func @transform_4(%arg0: i32) -> (i32, i32) {
    %c0_i32 = arith.constant 0 : i32
    %c0_i32_0 = arith.constant 0 : i32
    %c0_i32_1 = arith.constant 0 : i32
    return %c0_i32, %c0_i32_0 : i32, i32
  }
  func.func @transform_5(%arg0: i32) -> (i32, i32) {
    %c0_i32 = arith.constant 0 : i32
    %c0_i32_0 = arith.constant 0 : i32
    %c0_i32_1 = arith.constant 0 : i32
    return %c0_i32, %c0_i32_0 : i32, i32
  }
  func.func @transform_6(%arg0: i32) -> (i32, i32) {
    %c0_i32 = arith.constant 0 : i32
    %c0_i32_0 = arith.constant 0 : i32
    %c0_i32_1 = arith.constant 0 : i32
    return %c0_i32, %c0_i32_0 : i32, i32
  }
  func.func @transform_7(%arg0: i32) -> (i32, i32) {
    %c0_i32 = arith.constant 0 : i32
    %c0_i32_0 = arith.constant 0 : i32
    %c0_i32_1 = arith.constant 0 : i32
    return %c0_i32, %c0_i32_0 : i32, i32
  }
  func.func @transform_8(%arg0: i32) -> (i32, i32) {
    %c0_i32 = arith.constant 0 : i32
    %c0_i32_0 = arith.constant 0 : i32
    %c0_i32_1 = arith.constant 0 : i32
    return %c0_i32, %c0_i32_0 : i32, i32
  }
  func.func @transform_9(%arg0: i32) -> (i32, i32) {
    %c0_i32 = arith.constant 0 : i32
    %c0_i32_0 = arith.constant 0 : i32
    %c0_i32_1 = arith.constant 0 : i32
    return %c0_i32, %c0_i32_0 : i32, i32
  }
  func.func @transform_10(%arg0: i32) -> (i32, i32) {
    %c0_i32 = arith.constant 0 : i32
    %c0_i32_0 = arith.constant 0 : i32
    %c0_i32_1 = arith.constant 0 : i32
    return %c0_i32, %c0_i32_0 : i32, i32
  }
  func.func @transform_11(%arg0: i32) -> (i32, i32) {
    %c0_i32 = arith.constant 0 : i32
    %c0_i32_0 = arith.constant 0 : i32
    %c0_i32_1 = arith.constant 0 : i32
    return %c0_i32, %c0_i32_0 : i32, i32
  }
  func.func @transform_12(%arg0: i32) -> (i32, i32) {
    %c0_i32 = arith.constant 0 : i32
    %c0_i32_0 = arith.constant 0 : i32
    %c0_i32_1 = arith.constant 0 : i32
    return %c0_i32, %c0_i32_0 : i32, i32
  }
  func.func @transform_13(%arg0: i32) -> (i32, i32, i32) {
    %c0_i32 = arith.constant 0 : i32
    %c0_i32_0 = arith.constant 0 : i32
    %c0_i32_1 = arith.constant 0 : i32
    return %arg0, %c0_i32, %c0_i32_0 : i32, i32, i32
  }
}

module attributes {stable_mosaic.version = 11 : i64} {
  func.func @_encoder_layer_kernel(%arg0: i32, %arg1: memref<1x5x128xbf16, #tpu.memory_space<vmem>>, %arg2: memref<1x128xbf16, #tpu.memory_space<vmem>>, %arg3: memref<1x128xbf16, #tpu.memory_space<vmem>>, %arg4: memref<128x384xbf16, #tpu.memory_space<vmem>>, %arg5: memref<1x384xbf16, #tpu.memory_space<vmem>>, %arg6: memref<128x128xbf16, #tpu.memory_space<vmem>>, %arg7: memref<1x128xbf16, #tpu.memory_space<vmem>>, %arg8: memref<1x128xbf16, #tpu.memory_space<vmem>>, %arg9: memref<1x128xbf16, #tpu.memory_space<vmem>>, %arg10: memref<128x512xbf16, #tpu.memory_space<vmem>>, %arg11: memref<1x512xbf16, #tpu.memory_space<vmem>>, %arg12: memref<512x128xbf16, #tpu.memory_space<vmem>>, %arg13: memref<1x128xbf16, #tpu.memory_space<vmem>>, %arg14: memref<1x5x128xbf16, #tpu.memory_space<vmem>>) attributes {dimension_semantics = [#tpu.dimension_semantics<parallel>], iteration_bounds = array<i64: 2>, scalar_prefetch = 0 : i64, scratch_operands = 0 : i64, tpu.core_type = #tpu.core_type<tc>, window_params = [{transform_indices = @transform_0, window_bounds = array<i64: 1, 5, 128>}, {pipeline_mode = #tpu.pipeline_mode<synchronous>, transform_indices = @transform_1, window_bounds = array<i64: 1, 128>}, {pipeline_mode = #tpu.pipeline_mode<synchronous>, transform_indices = @transform_2, window_bounds = array<i64: 1, 128>}, {pipeline_mode = #tpu.pipeline_mode<synchronous>, transform_indices = @transform_3, window_bounds = array<i64: 128, 384>}, {pipeline_mode = #tpu.pipeline_mode<synchronous>, transform_indices = @transform_4, window_bounds = array<i64: 1, 384>}, {pipeline_mode = #tpu.pipeline_mode<synchronous>, transform_indices = @transform_5, window_bounds = array<i64: 128, 128>}, {pipeline_mode = #tpu.pipeline_mode<synchronous>, transform_indices = @transform_6, window_bounds = array<i64: 1, 128>}, {pipeline_mode = #tpu.pipeline_mode<synchronous>, transform_indices = @transform_7, window_bounds = array<i64: 1, 128>}, {pipeline_mode = #tpu.pipeline_mode<synchronous>, transform_indices = @transform_8, window_bounds = array<i64: 1, 128>}, {pipeline_mode = #tpu.pipeline_mode<synchronous>, transform_indices = @transform_9, window_bounds = array<i64: 128, 512>}, {pipeline_mode = #tpu.pipeline_mode<synchronous>, transform_indices = @transform_10, window_bounds = array<i64: 1, 512>}, {pipeline_mode = #tpu.pipeline_mode<synchronous>, transform_indices = @transform_11, window_bounds = array<i64: 512, 128>}, {pipeline_mode = #tpu.pipeline_mode<synchronous>, transform_indices = @transform_12, window_bounds = array<i64: 1, 128>}, {transform_indices = @transform_13, window_bounds = array<i64: 1, 5, 128>}]} {
    %c0 = arith.constant 0 : index
    %c0_0 = arith.constant 0 : index
    %c0_1 = arith.constant 0 : index
    %0 = vector.load %arg1[%c0, %c0_0, %c0_1] : memref<1x5x128xbf16, #tpu.memory_space<vmem>>, vector<1x5x128xbf16>
    %1 = vector.shape_cast %0 : vector<1x5x128xbf16> to vector<5x128xbf16>
    %2 = arith.extf %1 : vector<5x128xbf16> to vector<5x128xf32>
    %cst = arith.constant dense<0.000000e+00> : vector<5xf32>
    %3 = vector.multi_reduction <add>, %2, %cst [1] : vector<5x128xf32> to vector<5xf32>
    %4 = vector.shape_cast %3 : vector<5xf32> to vector<5x1xf32>
    %cst_2 = arith.constant 1.280000e+02 : f32
    %5 = vector.broadcast %cst_2 : f32 to vector<5x1xf32>
    %6 = arith.divf %4, %5 : vector<5x1xf32>
    %7 = vector.broadcast %6 : vector<5x1xf32> to vector<5x128xf32>
    %8 = arith.subf %2, %7 : vector<5x128xf32>
    %9 = arith.mulf %8, %8 : vector<5x128xf32>
    %cst_3 = arith.constant dense<0.000000e+00> : vector<5xf32>
    %10 = vector.multi_reduction <add>, %9, %cst_3 [1] : vector<5x128xf32> to vector<5xf32>
    %11 = vector.shape_cast %10 : vector<5xf32> to vector<5x1xf32>
    %cst_4 = arith.constant 1.280000e+02 : f32
    %12 = vector.broadcast %cst_4 : f32 to vector<5x1xf32>
    %13 = arith.divf %11, %12 : vector<5x1xf32>
    %14 = vector.broadcast %6 : vector<5x1xf32> to vector<5x128xf32>
    %15 = arith.subf %2, %14 : vector<5x128xf32>
    %cst_5 = arith.constant 9.99999997E-7 : f32
    %16 = vector.broadcast %cst_5 : f32 to vector<5x1xf32>
    %17 = arith.addf %13, %16 : vector<5x1xf32>
    %18 = math.rsqrt %17 : vector<5x1xf32>
    %19 = vector.broadcast %18 : vector<5x1xf32> to vector<5x128xf32>
    %20 = arith.mulf %15, %19 : vector<5x128xf32>
    %c0_6 = arith.constant 0 : index
    %c0_7 = arith.constant 0 : index
    %21 = vector.load %arg2[%c0_6, %c0_7] : memref<1x128xbf16, #tpu.memory_space<vmem>>, vector<1x128xbf16>
    %22 = arith.extf %21 : vector<1x128xbf16> to vector<1x128xf32>
    %23 = vector.broadcast %22 : vector<1x128xf32> to vector<5x128xf32>
    %24 = arith.mulf %20, %23 : vector<5x128xf32>
    %c0_8 = arith.constant 0 : index
    %c0_9 = arith.constant 0 : index
    %25 = vector.load %arg3[%c0_8, %c0_9] : memref<1x128xbf16, #tpu.memory_space<vmem>>, vector<1x128xbf16>
    %26 = arith.extf %25 : vector<1x128xbf16> to vector<1x128xf32>
    %27 = vector.broadcast %26 : vector<1x128xf32> to vector<5x128xf32>
    %28 = arith.addf %24, %27 : vector<5x128xf32>
    %29 = arith.truncf %28 : vector<5x128xf32> to vector<5x128xbf16>
    %c0_10 = arith.constant 0 : index
    %c0_11 = arith.constant 0 : index
    %30 = vector.load %arg4[%c0_10, %c0_11] : memref<128x384xbf16, #tpu.memory_space<vmem>>, vector<128x384xbf16>
    %cst_12 = arith.constant dense<0.000000e+00> : vector<5x384xf32>
    %31 = tpu.matmul %29, %30, %cst_12 {dimension_numbers = #tpu.dot_dimension_numbers<[1], [0], [0], [1], [0, 0, 1, 1], [], []>} : vector<5x128xbf16>, vector<128x384xbf16>, vector<5x384xf32> -> vector<5x384xf32>
    %c0_13 = arith.constant 0 : index
    %c0_14 = arith.constant 0 : index
    %32 = vector.load %arg5[%c0_13, %c0_14] : memref<1x384xbf16, #tpu.memory_space<vmem>>, vector<1x384xbf16>
    %33 = arith.extf %32 : vector<1x384xbf16> to vector<1x384xf32>
    %34 = vector.broadcast %33 : vector<1x384xf32> to vector<5x384xf32>
    %35 = arith.addf %31, %34 : vector<5x384xf32>
    %36 = arith.truncf %35 : vector<5x384xf32> to vector<5x384xbf16>
    %c0_15 = arith.constant 0 : index
    %c0_16 = arith.constant 0 : index
    %37 = vector.load %arg7[%c0_15, %c0_16] : memref<1x128xbf16, #tpu.memory_space<vmem>>, vector<1x128xbf16>
    %38 = arith.extf %37 : vector<1x128xbf16> to vector<1x128xf32>
    %39 = vector.extract_strided_slice %36 {offsets = [0, 0], sizes = [5, 64], strides = [1, 1]} : vector<5x384xbf16> to vector<5x64xbf16>
    %40 = vector.extract_strided_slice %36 {offsets = [0, 128], sizes = [5, 64], strides = [1, 1]} : vector<5x384xbf16> to vector<5x64xbf16>
    %41 = vector.extract_strided_slice %36 {offsets = [0, 256], sizes = [5, 64], strides = [1, 1]} : vector<5x384xbf16> to vector<5x64xbf16>
    %cst_17 = arith.constant dense<0.000000e+00> : vector<5x5xf32>
    %42 = tpu.matmul %39, %40, %cst_17 {dimension_numbers = #tpu.dot_dimension_numbers<[1], [1], [0], [0], [0, 0, 1, 0], [], []>} : vector<5x64xbf16>, vector<5x64xbf16>, vector<5x5xf32> -> vector<5x5xf32>
    %cst_18 = arith.constant 1.250000e-01 : f32
    %43 = vector.broadcast %cst_18 : f32 to vector<5x5xf32>
    %44 = arith.mulf %42, %43 : vector<5x5xf32>
    %cst_19 = arith.constant dense<0xFF800000> : vector<5xf32>
    %45 = vector.multi_reduction <maximumf>, %44, %cst_19 [1] : vector<5x5xf32> to vector<5xf32>
    %46 = vector.shape_cast %45 : vector<5xf32> to vector<5x1xf32>
    %47 = vector.broadcast %46 : vector<5x1xf32> to vector<5x5xf32>
    %48 = arith.subf %44, %47 : vector<5x5xf32>
    %49 = math.exp %48 : vector<5x5xf32>
    %cst_20 = arith.constant dense<0.000000e+00> : vector<5xf32>
    %50 = vector.multi_reduction <add>, %49, %cst_20 [1] : vector<5x5xf32> to vector<5xf32>
    %51 = vector.shape_cast %50 : vector<5xf32> to vector<5x1xf32>
    %52 = tpu.reciprocal %51 {approx = true} : vector<5x1xf32> -> vector<5x1xf32>
    %53 = vector.broadcast %52 : vector<5x1xf32> to vector<5x5xf32>
    %54 = arith.mulf %49, %53 : vector<5x5xf32>
    %55 = arith.truncf %54 : vector<5x5xf32> to vector<5x5xbf16>
    %cst_21 = arith.constant dense<0.000000e+00> : vector<5x64xf32>
    %56 = tpu.matmul %55, %41, %cst_21 {dimension_numbers = #tpu.dot_dimension_numbers<[1], [0], [0], [1], [0, 0, 1, 1], [], []>} : vector<5x5xbf16>, vector<5x64xbf16>, vector<5x64xf32> -> vector<5x64xf32>
    %57 = arith.truncf %56 : vector<5x64xf32> to vector<5x64xbf16>
    %c0_22 = arith.constant 0 : index
    %c0_23 = arith.constant 0 : index
    %58 = vector.load %arg6[%c0_22, %c0_23] : memref<128x128xbf16, #tpu.memory_space<vmem>>, vector<64x128xbf16>
    %cst_24 = arith.constant dense<0.000000e+00> : vector<5x128xf32>
    %59 = tpu.matmul %57, %58, %cst_24 {dimension_numbers = #tpu.dot_dimension_numbers<[1], [0], [0], [1], [0, 0, 1, 1], [], []>} : vector<5x64xbf16>, vector<64x128xbf16>, vector<5x128xf32> -> vector<5x128xf32>
    %60 = vector.broadcast %38 : vector<1x128xf32> to vector<5x128xf32>
    %61 = arith.addf %60, %59 : vector<5x128xf32>
    %62 = vector.extract_strided_slice %36 {offsets = [0, 64], sizes = [5, 64], strides = [1, 1]} : vector<5x384xbf16> to vector<5x64xbf16>
    %63 = vector.extract_strided_slice %36 {offsets = [0, 192], sizes = [5, 64], strides = [1, 1]} : vector<5x384xbf16> to vector<5x64xbf16>
    %64 = vector.extract_strided_slice %36 {offsets = [0, 320], sizes = [5, 64], strides = [1, 1]} : vector<5x384xbf16> to vector<5x64xbf16>
    %cst_25 = arith.constant dense<0.000000e+00> : vector<5x5xf32>
    %65 = tpu.matmul %62, %63, %cst_25 {dimension_numbers = #tpu.dot_dimension_numbers<[1], [1], [0], [0], [0, 0, 1, 0], [], []>} : vector<5x64xbf16>, vector<5x64xbf16>, vector<5x5xf32> -> vector<5x5xf32>
    %cst_26 = arith.constant 1.250000e-01 : f32
    %66 = vector.broadcast %cst_26 : f32 to vector<5x5xf32>
    %67 = arith.mulf %65, %66 : vector<5x5xf32>
    %cst_27 = arith.constant dense<0xFF800000> : vector<5xf32>
    %68 = vector.multi_reduction <maximumf>, %67, %cst_27 [1] : vector<5x5xf32> to vector<5xf32>
    %69 = vector.shape_cast %68 : vector<5xf32> to vector<5x1xf32>
    %70 = vector.broadcast %69 : vector<5x1xf32> to vector<5x5xf32>
    %71 = arith.subf %67, %70 : vector<5x5xf32>
    %72 = math.exp %71 : vector<5x5xf32>
    %cst_28 = arith.constant dense<0.000000e+00> : vector<5xf32>
    %73 = vector.multi_reduction <add>, %72, %cst_28 [1] : vector<5x5xf32> to vector<5xf32>
    %74 = vector.shape_cast %73 : vector<5xf32> to vector<5x1xf32>
    %75 = tpu.reciprocal %74 {approx = true} : vector<5x1xf32> -> vector<5x1xf32>
    %76 = vector.broadcast %75 : vector<5x1xf32> to vector<5x5xf32>
    %77 = arith.mulf %72, %76 : vector<5x5xf32>
    %78 = arith.truncf %77 : vector<5x5xf32> to vector<5x5xbf16>
    %cst_29 = arith.constant dense<0.000000e+00> : vector<5x64xf32>
    %79 = tpu.matmul %78, %64, %cst_29 {dimension_numbers = #tpu.dot_dimension_numbers<[1], [0], [0], [1], [0, 0, 1, 1], [], []>} : vector<5x5xbf16>, vector<5x64xbf16>, vector<5x64xf32> -> vector<5x64xf32>
    %80 = arith.truncf %79 : vector<5x64xf32> to vector<5x64xbf16>
    %c64 = arith.constant 64 : index
    %c0_30 = arith.constant 0 : index
    %81 = vector.load %arg6[%c64, %c0_30] : memref<128x128xbf16, #tpu.memory_space<vmem>>, vector<64x128xbf16>
    %cst_31 = arith.constant dense<0.000000e+00> : vector<5x128xf32>
    %82 = tpu.matmul %80, %81, %cst_31 {dimension_numbers = #tpu.dot_dimension_numbers<[1], [0], [0], [1], [0, 0, 1, 1], [], []>} : vector<5x64xbf16>, vector<64x128xbf16>, vector<5x128xf32> -> vector<5x128xf32>
    %83 = arith.addf %61, %82 : vector<5x128xf32>
    %84 = arith.addf %2, %83 : vector<5x128xf32>
    %cst_32 = arith.constant dense<0.000000e+00> : vector<5xf32>
    %85 = vector.multi_reduction <add>, %84, %cst_32 [1] : vector<5x128xf32> to vector<5xf32>
    %86 = vector.shape_cast %85 : vector<5xf32> to vector<5x1xf32>
    %cst_33 = arith.constant 1.280000e+02 : f32
    %87 = vector.broadcast %cst_33 : f32 to vector<5x1xf32>
    %88 = arith.divf %86, %87 : vector<5x1xf32>
    %89 = vector.broadcast %88 : vector<5x1xf32> to vector<5x128xf32>
    %90 = arith.subf %84, %89 : vector<5x128xf32>
    %91 = arith.mulf %90, %90 : vector<5x128xf32>
    %cst_34 = arith.constant dense<0.000000e+00> : vector<5xf32>
    %92 = vector.multi_reduction <add>, %91, %cst_34 [1] : vector<5x128xf32> to vector<5xf32>
    %93 = vector.shape_cast %92 : vector<5xf32> to vector<5x1xf32>
    %cst_35 = arith.constant 1.280000e+02 : f32
    %94 = vector.broadcast %cst_35 : f32 to vector<5x1xf32>
    %95 = arith.divf %93, %94 : vector<5x1xf32>
    %96 = vector.broadcast %88 : vector<5x1xf32> to vector<5x128xf32>
    %97 = arith.subf %84, %96 : vector<5x128xf32>
    %cst_36 = arith.constant 9.99999997E-7 : f32
    %98 = vector.broadcast %cst_36 : f32 to vector<5x1xf32>
    %99 = arith.addf %95, %98 : vector<5x1xf32>
    %100 = math.rsqrt %99 : vector<5x1xf32>
    %101 = vector.broadcast %100 : vector<5x1xf32> to vector<5x128xf32>
    %102 = arith.mulf %97, %101 : vector<5x128xf32>
    %c0_37 = arith.constant 0 : index
    %c0_38 = arith.constant 0 : index
    %103 = vector.load %arg8[%c0_37, %c0_38] : memref<1x128xbf16, #tpu.memory_space<vmem>>, vector<1x128xbf16>
    %104 = arith.extf %103 : vector<1x128xbf16> to vector<1x128xf32>
    %105 = vector.broadcast %104 : vector<1x128xf32> to vector<5x128xf32>
    %106 = arith.mulf %102, %105 : vector<5x128xf32>
    %c0_39 = arith.constant 0 : index
    %c0_40 = arith.constant 0 : index
    %107 = vector.load %arg9[%c0_39, %c0_40] : memref<1x128xbf16, #tpu.memory_space<vmem>>, vector<1x128xbf16>
    %108 = arith.extf %107 : vector<1x128xbf16> to vector<1x128xf32>
    %109 = vector.broadcast %108 : vector<1x128xf32> to vector<5x128xf32>
    %110 = arith.addf %106, %109 : vector<5x128xf32>
    %111 = arith.truncf %110 : vector<5x128xf32> to vector<5x128xbf16>
    %c0_41 = arith.constant 0 : index
    %c0_42 = arith.constant 0 : index
    %112 = vector.load %arg10[%c0_41, %c0_42] : memref<128x512xbf16, #tpu.memory_space<vmem>>, vector<128x512xbf16>
    %cst_43 = arith.constant dense<0.000000e+00> : vector<5x512xf32>
    %113 = tpu.matmul %111, %112, %cst_43 {dimension_numbers = #tpu.dot_dimension_numbers<[1], [0], [0], [1], [0, 0, 1, 1], [], []>} : vector<5x128xbf16>, vector<128x512xbf16>, vector<5x512xf32> -> vector<5x512xf32>
    %c0_44 = arith.constant 0 : index
    %c0_45 = arith.constant 0 : index
    %114 = vector.load %arg11[%c0_44, %c0_45] : memref<1x512xbf16, #tpu.memory_space<vmem>>, vector<1x512xbf16>
    %115 = arith.extf %114 : vector<1x512xbf16> to vector<1x512xf32>
    %116 = vector.broadcast %115 : vector<1x512xf32> to vector<5x512xf32>
    %117 = arith.addf %113, %116 : vector<5x512xf32>
    %118 = arith.mulf %117, %117 : vector<5x512xf32>
    %119 = arith.mulf %117, %118 : vector<5x512xf32>
    %cst_46 = arith.constant 4.471500e-02 : f32
    %120 = vector.broadcast %cst_46 : f32 to vector<5x512xf32>
    %121 = arith.mulf %120, %119 : vector<5x512xf32>
    %122 = arith.addf %117, %121 : vector<5x512xf32>
    %cst_47 = arith.constant 0.797884583 : f32
    %123 = vector.broadcast %cst_47 : f32 to vector<5x512xf32>
    %124 = arith.mulf %123, %122 : vector<5x512xf32>
    %125 = math.tanh %124 : vector<5x512xf32>
    %cst_48 = arith.constant 1.000000e+00 : f32
    %126 = vector.broadcast %cst_48 : f32 to vector<5x512xf32>
    %127 = arith.addf %126, %125 : vector<5x512xf32>
    %cst_49 = arith.constant 5.000000e-01 : f32
    %128 = vector.broadcast %cst_49 : f32 to vector<5x512xf32>
    %129 = arith.mulf %128, %127 : vector<5x512xf32>
    %130 = arith.mulf %117, %129 : vector<5x512xf32>
    %131 = arith.truncf %130 : vector<5x512xf32> to vector<5x512xbf16>
    %c0_50 = arith.constant 0 : index
    %c0_51 = arith.constant 0 : index
    %132 = vector.load %arg12[%c0_50, %c0_51] : memref<512x128xbf16, #tpu.memory_space<vmem>>, vector<512x128xbf16>
    %cst_52 = arith.constant dense<0.000000e+00> : vector<5x128xf32>
    %133 = tpu.matmul %131, %132, %cst_52 {dimension_numbers = #tpu.dot_dimension_numbers<[1], [0], [0], [1], [0, 0, 1, 1], [], []>} : vector<5x512xbf16>, vector<512x128xbf16>, vector<5x128xf32> -> vector<5x128xf32>
    %c0_53 = arith.constant 0 : index
    %c0_54 = arith.constant 0 : index
    %134 = vector.load %arg13[%c0_53, %c0_54] : memref<1x128xbf16, #tpu.memory_space<vmem>>, vector<1x128xbf16>
    %135 = arith.extf %134 : vector<1x128xbf16> to vector<1x128xf32>
    %136 = vector.broadcast %135 : vector<1x128xf32> to vector<5x128xf32>
    %137 = arith.addf %133, %136 : vector<5x128xf32>
    %138 = arith.addf %84, %137 : vector<5x128xf32>
    %139 = arith.truncf %138 : vector<5x128xf32> to vector<5x128xbf16>
    %c0_55 = arith.constant 0 : index
    %c0_56 = arith.constant 0 : index
    %c0_57 = arith.constant 0 : index
    %140 = vector.load %arg14[%c0_55, %c0_56, %c0_57] : memref<1x5x128xbf16, #tpu.memory_space<vmem>>, vector<1x5x128xbf16>
    %141 = vector.shape_cast %140 : vector<1x5x128xbf16> to vector<5x128xbf16>
    %142 = vector.shape_cast %139 : vector<5x128xbf16> to vector<1x5x128xbf16>
    tpu.vector_store %arg14[%c0_55, %c0_56, %c0_57], %142 {strides = array<i32>} : memref<1x5x128xbf16, #tpu.memory_space<vmem>>, vector<1x5x128xbf16>,
    return
  }
  func.func @transform_0(%arg0: i32) -> (i32, i32, i32) {
    %c0_i32 = arith.constant 0 : i32
    %c0_i32_0 = arith.constant 0 : i32
    %c0_i32_1 = arith.constant 0 : i32
    return %arg0, %c0_i32, %c0_i32_0 : i32, i32, i32
  }
  func.func @transform_1(%arg0: i32) -> (i32, i32) {
    %c0_i32 = arith.constant 0 : i32
    %c0_i32_0 = arith.constant 0 : i32
    %c0_i32_1 = arith.constant 0 : i32
    return %c0_i32, %c0_i32_0 : i32, i32
  }
  func.func @transform_2(%arg0: i32) -> (i32, i32) {
    %c0_i32 = arith.constant 0 : i32
    %c0_i32_0 = arith.constant 0 : i32
    %c0_i32_1 = arith.constant 0 : i32
    return %c0_i32, %c0_i32_0 : i32, i32
  }
  func.func @transform_3(%arg0: i32) -> (i32, i32) {
    %c0_i32 = arith.constant 0 : i32
    %c0_i32_0 = arith.constant 0 : i32
    %c0_i32_1 = arith.constant 0 : i32
    return %c0_i32, %c0_i32_0 : i32, i32
  }
  func.func @transform_4(%arg0: i32) -> (i32, i32) {
    %c0_i32 = arith.constant 0 : i32
    %c0_i32_0 = arith.constant 0 : i32
    %c0_i32_1 = arith.constant 0 : i32
    return %c0_i32, %c0_i32_0 : i32, i32
  }
  func.func @transform_5(%arg0: i32) -> (i32, i32) {
    %c0_i32 = arith.constant 0 : i32
    %c0_i32_0 = arith.constant 0 : i32
    %c0_i32_1 = arith.constant 0 : i32
    return %c0_i32, %c0_i32_0 : i32, i32
  }
  func.func @transform_6(%arg0: i32) -> (i32, i32) {
    %c0_i32 = arith.constant 0 : i32
    %c0_i32_0 = arith.constant 0 : i32
    %c0_i32_1 = arith.constant 0 : i32
    return %c0_i32, %c0_i32_0 : i32, i32
  }
  func.func @transform_7(%arg0: i32) -> (i32, i32) {
    %c0_i32 = arith.constant 0 : i32
    %c0_i32_0 = arith.constant 0 : i32
    %c0_i32_1 = arith.constant 0 : i32
    return %c0_i32, %c0_i32_0 : i32, i32
  }
  func.func @transform_8(%arg0: i32) -> (i32, i32) {
    %c0_i32 = arith.constant 0 : i32
    %c0_i32_0 = arith.constant 0 : i32
    %c0_i32_1 = arith.constant 0 : i32
    return %c0_i32, %c0_i32_0 : i32, i32
  }
  func.func @transform_9(%arg0: i32) -> (i32, i32) {
    %c0_i32 = arith.constant 0 : i32
    %c0_i32_0 = arith.constant 0 : i32
    %c0_i32_1 = arith.constant 0 : i32
    return %c0_i32, %c0_i32_0 : i32, i32
  }
  func.func @transform_10(%arg0: i32) -> (i32, i32) {
    %c0_i32 = arith.constant 0 : i32
    %c0_i32_0 = arith.constant 0 : i32
    %c0_i32_1 = arith.constant 0 : i32
    return %c0_i32, %c0_i32_0 : i32, i32
  }
  func.func @transform_11(%arg0: i32) -> (i32, i32) {
    %c0_i32 = arith.constant 0 : i32
    %c0_i32_0 = arith.constant 0 : i32
    %c0_i32_1 = arith.constant 0 : i32
    return %c0_i32, %c0_i32_0 : i32, i32
  }
  func.func @transform_12(%arg0: i32) -> (i32, i32) {
    %c0_i32 = arith.constant 0 : i32
    %c0_i32_0 = arith.constant 0 : i32
    %c0_i32_1 = arith.constant 0 : i32
    return %c0_i32, %c0_i32_0 : i32, i32
  }
  func.func @transform_13(%arg0: i32) -> (i32, i32, i32) {
    %c0_i32 = arith.constant 0 : i32
    %c0_i32_0 = arith.constant 0 : i32
    %c0_i32_1 = arith.constant 0 : i32
    return %arg0, %c0_i32, %c0_i32_0 : i32, i32, i32
  }
}

module attributes {stable_mosaic.version = 11 : i64} {
  func.func @_ln_head_kernel(%arg0: memref<2x128xbf16, #tpu.memory_space<vmem>>, %arg1: memref<1x128xbf16, #tpu.memory_space<vmem>>, %arg2: memref<1x128xbf16, #tpu.memory_space<vmem>>, %arg3: memref<128x8xbf16, #tpu.memory_space<vmem>>, %arg4: memref<1x8xbf16, #tpu.memory_space<vmem>>, %arg5: memref<2x8xf32, #tpu.memory_space<vmem>>) attributes {dimension_semantics = [], scalar_prefetch = 0 : i64, scratch_operands = 0 : i64, tpu.core_type = #tpu.core_type<tc>} {
    %c0 = arith.constant 0 : index
    %c0_0 = arith.constant 0 : index
    %0 = vector.load %arg0[%c0, %c0_0] : memref<2x128xbf16, #tpu.memory_space<vmem>>, vector<2x128xbf16>
    %1 = arith.extf %0 : vector<2x128xbf16> to vector<2x128xf32>
    %cst = arith.constant dense<0.000000e+00> : vector<2xf32>
    %2 = vector.multi_reduction <add>, %1, %cst [1] : vector<2x128xf32> to vector<2xf32>
    %3 = vector.shape_cast %2 : vector<2xf32> to vector<2x1xf32>
    %cst_1 = arith.constant 1.280000e+02 : f32
    %4 = vector.broadcast %cst_1 : f32 to vector<2x1xf32>
    %5 = arith.divf %3, %4 : vector<2x1xf32>
    %6 = vector.broadcast %5 : vector<2x1xf32> to vector<2x128xf32>
    %7 = arith.subf %1, %6 : vector<2x128xf32>
    %8 = arith.mulf %7, %7 : vector<2x128xf32>
    %cst_2 = arith.constant dense<0.000000e+00> : vector<2xf32>
    %9 = vector.multi_reduction <add>, %8, %cst_2 [1] : vector<2x128xf32> to vector<2xf32>
    %10 = vector.shape_cast %9 : vector<2xf32> to vector<2x1xf32>
    %cst_3 = arith.constant 1.280000e+02 : f32
    %11 = vector.broadcast %cst_3 : f32 to vector<2x1xf32>
    %12 = arith.divf %10, %11 : vector<2x1xf32>
    %13 = vector.broadcast %5 : vector<2x1xf32> to vector<2x128xf32>
    %14 = arith.subf %1, %13 : vector<2x128xf32>
    %cst_4 = arith.constant 9.99999997E-7 : f32
    %15 = vector.broadcast %cst_4 : f32 to vector<2x1xf32>
    %16 = arith.addf %12, %15 : vector<2x1xf32>
    %17 = math.rsqrt %16 : vector<2x1xf32>
    %18 = vector.broadcast %17 : vector<2x1xf32> to vector<2x128xf32>
    %19 = arith.mulf %14, %18 : vector<2x128xf32>
    %c0_5 = arith.constant 0 : index
    %c0_6 = arith.constant 0 : index
    %20 = vector.load %arg1[%c0_5, %c0_6] : memref<1x128xbf16, #tpu.memory_space<vmem>>, vector<1x128xbf16>
    %21 = arith.extf %20 : vector<1x128xbf16> to vector<1x128xf32>
    %22 = vector.broadcast %21 : vector<1x128xf32> to vector<2x128xf32>
    %23 = arith.mulf %19, %22 : vector<2x128xf32>
    %c0_7 = arith.constant 0 : index
    %c0_8 = arith.constant 0 : index
    %24 = vector.load %arg2[%c0_7, %c0_8] : memref<1x128xbf16, #tpu.memory_space<vmem>>, vector<1x128xbf16>
    %25 = arith.extf %24 : vector<1x128xbf16> to vector<1x128xf32>
    %26 = vector.broadcast %25 : vector<1x128xf32> to vector<2x128xf32>
    %27 = arith.addf %23, %26 : vector<2x128xf32>
    %28 = arith.truncf %27 : vector<2x128xf32> to vector<2x128xbf16>
    %c0_9 = arith.constant 0 : index
    %c0_10 = arith.constant 0 : index
    %29 = vector.load %arg3[%c0_9, %c0_10] : memref<128x8xbf16, #tpu.memory_space<vmem>>, vector<128x8xbf16>
    %cst_11 = arith.constant dense<0.000000e+00> : vector<2x8xf32>
    %30 = tpu.matmul %28, %29, %cst_11 {dimension_numbers = #tpu.dot_dimension_numbers<[1], [0], [0], [1], [0, 0, 1, 1], [], []>} : vector<2x128xbf16>, vector<128x8xbf16>, vector<2x8xf32> -> vector<2x8xf32>
    %c0_12 = arith.constant 0 : index
    %c0_13 = arith.constant 0 : index
    %31 = vector.load %arg4[%c0_12, %c0_13] : memref<1x8xbf16, #tpu.memory_space<vmem>>, vector<1x8xbf16>
    %32 = arith.extf %31 : vector<1x8xbf16> to vector<1x8xf32>
    %33 = vector.broadcast %32 : vector<1x8xf32> to vector<2x8xf32>
    %34 = arith.addf %30, %33 : vector<2x8xf32>
    %c0_14 = arith.constant 0 : index
    %c0_15 = arith.constant 0 : index
    %35 = vector.load %arg5[%c0_14, %c0_15] : memref<2x8xf32, #tpu.memory_space<vmem>>, vector<2x8xf32>
    tpu.vector_store %arg5[%c0_14, %c0_15], %34 {strides = array<i32>} : memref<2x8xf32, #tpu.memory_space<vmem>>, vector<2x8xf32>,
    return
  }
}

</mosaic_0001>

<bundles_post_ra>
// kernel: vit_forward.6
= control target key start
LH: loop header
LB: loop body
LE: loop exit
PB: predicated region body
PF: predicated region fallthrough
CT: control target
= control target key end

     0   :  { %s921_s1 = inlined_call_operand.vmem [shape: bf16[768,128], index: 1, kind: input, shape index: {}]   ;;  %s922_s0 = inlined_call_operand.vmem [shape: bf16[8,768], index: 0, kind: input, shape index: {}]   ;;  %s923_s2 = inlined_call_operand.vmem [shape: bf16[1,128], index: 2, kind: input, shape index: {}]   ;;  %s924_s3 = inlined_call_operand.vmem [shape: bf16[8,128], index: 3, kind: output, shape index: {}]  }
   0x1   :  { %v688_v0 = vld [vmem:[%s921_s1 + $0x78] sm:$0xff]   ;;  %v692_v4 = vld [vmem:[%s921_s1 + $0x70] sm:$0xff]   ;;  %v696_v8 = vld [vmem:[%s921_s1 + $0x68] sm:$0xff]  }
   0x2   :  { %v689_v1 = vld [vmem:[%s921_s1 + $0xf8] sm:$0xff]   ;;  %622 = vmatprep.subr.bf16.mxu0 %v688_v0  ;;  %v693_v5 = vld [vmem:[%s921_s1 + $0xf0] sm:$0xff]   ;;  %v697_v9 = vld [vmem:[%s921_s1 + $0xe8] sm:$0xff]  }
   0x3   :  { %v690_v2 = vld [vmem:[%s921_s1 + $0x38] sm:$0xff]   ;;  %644 = vmatprep.subr.bf16.mxu1 %v689_v1  ;;  %v694_v6 = vld [vmem:[%s921_s1 + $0x30] sm:$0xff]   ;;  %v698_v10 = vld [vmem:[%s921_s1 + $0x28] sm:$0xff]   ;;  %v557_v1 = vlaneseq }
   0x4   :  { %v691_v3 = vld [vmem:[%s921_s1 + $0xb8] sm:$0xff]   ;;  %623 = vmatpush3.bf16.msra.mxu0 %v690_v2  ;;  %v695_v7 = vld [vmem:[%s921_s1 + $0xb0] sm:$0xff]   ;;  %v699_v11 = vld [vmem:[%s921_s1 + $0xa8] sm:$0xff]  }
   0x5   :  { %645 = vmatpush3.bf16.msra.mxu1 %v691_v3  ;;  %624 = vmatprep.subr.bf16.mxu0 %v692_v4  ;;  %v700_v12 = vld [vmem:[%s921_s1 + $0x60] sm:$0xff]   ;;  %v704_v16 = vld [vmem:[%s921_s1 + $0x58] sm:$0xff]   ;;  %v708_v20 = vld [vmem:[%s921_s1 + $0x50] sm:$0xff]   ;;  %v558_v2 = vshrl.u32 %v557_v1, 7 }
   0x6   :  { %646 = vmatprep.subr.bf16.mxu1 %v693_v5  ;;  %v701_v13 = vld [vmem:[%s921_s1 + $0xe0] sm:$0xff]   ;;  %v705_v17 = vld [vmem:[%s921_s1 + $0xd8] sm:$0xff]   ;;  %v709_v21 = vld [vmem:[%s921_s1 + $0xd0] sm:$0xff]  }
   0x7   :  { %v702_v14 = vld [vmem:[%s921_s1 + $0x20] sm:$0xff]   ;;  %v706_v18 = vld [vmem:[%s921_s1 + $0x18] sm:$0xff]   ;;  %v710_v22 = vld [vmem:[%s921_s1 + $0x10] sm:$0xff]  }
   0x8   :  { %625 = vmatpush3.bf16.msra.mxu0 %v694_v6  ;;  %v703_v15 = vld [vmem:[%s921_s1 + $0xa0] sm:$0xff]   ;;  %v707_v19 = vld [vmem:[%s921_s1 + $0x98] sm:$0xff]   ;;  %v711_v23 = vld [vmem:[%s921_s1 + $0x90] sm:$0xff]  }
   0x9   :  { %647 = vmatpush3.bf16.msra.mxu1 %v695_v7  ;;  %626 = vmatprep.subr.bf16.mxu0 %v696_v8  ;;  %v712_v24 = vld [vmem:[%s921_s1 + $0x48] sm:$0xff]   ;;  %v716_v28 = vld [vmem:[%s921_s1 + $0x40] sm:$0xff]   ;;  %v724_v38 = vld [vmem:[%s921_s1 + $0x178] sm:$0xff]   ;;  %v559_v7 = vsub.s32 0, %v558_v2 }
   0xa   :  { %648 = vmatprep.subr.bf16.mxu1 %v697_v9  ;;  %v713_v25 = vld [vmem:[%s921_s1 + $0xc8] sm:$0xff]   ;;  %v717_v29 = vld [vmem:[%s921_s1 + $0xc0] sm:$0xff]   ;;  %v725_v39 = vld [vmem:[%s921_s1 + $0x138] sm:$0xff]  }
   0xb   :  { %v714_v26 = vld [vmem:[%s921_s1 + $0x8] sm:$0xff]   ;;  %v718_v30 = vld [vmem:[%s921_s1] sm:$0xff]   ;;  %v726_v40 = vld [vmem:[%s921_s1 + $0x170] sm:$0xff]  }
   0xc   :  { %627 = vmatpush3.bf16.msra.mxu0 %v698_v10  ;;  %v715_v27 = vld [vmem:[%s921_s1 + $0x88] sm:$0xff]   ;;  %v719_v31 = vld [vmem:[%s921_s1 + $0x80] sm:$0xff]   ;;  %v727_v41 = vld [vmem:[%s921_s1 + $0x130] sm:$0xff]  }
   0xd   :  { %649 = vmatpush3.bf16.msra.mxu1 %v699_v11  ;;  %628 = vmatprep.subr.bf16.mxu0 %v700_v12  ;;  %v21_v32 = vld [vmem:[%s922_s0] sm:$0xff]  ;;  %v22_v33 = vld [vmem:[%s922_s0 + $0x8] sm:$0xff]  ;;  %v732_v46 = vld [vmem:[%s921_s1 + $0x158] sm:$0xff]  }
   0xe   :  { %650 = vmatprep.subr.bf16.mxu1 %v701_v13  ;;  %v568_v34 = vcombine.low %v21_v32, %v21_v32  ;;  %v569_v35 = vcombine.high %v21_v32, %v21_v32  ;;  %v570_v36 = vcombine.low %v22_v33, %v22_v33  ;;  %v571_v37 = vcombine.high %v22_v33, %v22_v33  ;;  %v728_v42 = vld [vmem:[%s921_s1 + $0x168] sm:$0xff]   ;;  %v730_v44 = vld [vmem:[%s921_s1 + $0x160] sm:$0xff]   ;;  %v23_v47 = vld [vmem:[%s922_s0 + $0x10] sm:$0xff] }
   0xf   :  { %v729_v43 = vld [vmem:[%s921_s1 + $0x128] sm:$0xff]   ;;  %v731_v45 = vld [vmem:[%s921_s1 + $0x120] sm:$0xff]   ;;  %v573_v48 = vcombine.high %v23_v47, %v23_v47  ;;  %v733_v49 = vld [vmem:[%s921_s1 + $0x118] sm:$0xff]   ;;  %v572_v56 = vcombine.low %v23_v47, %v23_v47 }
  0x10   :  { %629 = vmatpush3.bf16.msra.mxu0 %v702_v14  ;;  %461 = vmatprep.mubr.bf16.mxu0 %v569_v35  ;;  %v734_v50 = vld [vmem:[%s921_s1 + $0x150] sm:$0xff]   ;;  %v736_v52 = vld [vmem:[%s921_s1 + $0x148] sm:$0xff]   ;;  %v738_v54 = vld [vmem:[%s921_s1 + $0x140] sm:$0xff]  }
  0x11   :  { %651 = vmatpush3.bf16.msra.mxu1 %v703_v15  ;;  %630 = vmatprep.subr.bf16.mxu0 %v704_v16  ;;  %v735_v51 = vld [vmem:[%s921_s1 + $0x110] sm:$0xff]   ;;  %v737_v53 = vld [vmem:[%s921_s1 + $0x108] sm:$0xff]   ;;  %v739_v55 = vld [vmem:[%s921_s1 + $0x100] sm:$0xff]  }
  0x12   :  { %652 = vmatprep.subr.bf16.mxu1 %v705_v17  ;;  %501 = vmatprep.mubr.bf16.mxu1 %v571_v37  ;;  %v555_v3 = vld [vmem:[%s923_s2] sm:$0x1] }
  0x13   :  { %v556_v6 = vunpack.c.l.bf16 %v555_v3 }
  0x14   :  { %631 = vmatpush3.bf16.msra.mxu0 %v706_v18 }
  0x15   :  { %653 = vmatpush3.bf16.msra.mxu1 %v707_v19  ;;  %632 = vmatprep.subr.bf16.mxu0 %v708_v20  ;;  %v560_v12 = vrot.slane %v556_v6, %v559_v7 }
  0x16   :  { %654 = vmatprep.subr.bf16.mxu1 %v709_v21 }
  0x18   :  { %633 = vmatpush3.bf16.msra.mxu0 %v710_v22 }
  0x19   :  { %655 = vmatpush3.bf16.msra.mxu1 %v711_v23  ;;  %634 = vmatprep.subr.bf16.mxu0 %v712_v24 }
  0x1a   :  { %656 = vmatprep.subr.bf16.mxu1 %v713_v25 }
  0x1c   :  { %635 = vmatpush3.bf16.msra.mxu0 %v714_v26 }
  0x1d   :  { %657 = vmatpush3.bf16.msra.mxu1 %v715_v27  ;;  %636 = vmatprep.subr.bf16.mxu0 %v716_v28 }
  0x1e   :  { %658 = vmatprep.subr.bf16.mxu1 %v717_v29 }
  0x20   :  { %637 = vmatpush3.bf16.msra.mxu0 %v718_v30 }
  0x21   :  { %659 = vmatpush3.bf16.msra.mxu1 %v719_v31  ;;  %666 = vmatprep.subr.bf16.mxu0 %v724_v38 }
  0x23   :  { %462 = vmatmul.mubr.bf16.vlgmr.msra.gmra.mxu0 %v568_v34 }
  0x24   :  { %502 = vmatmul.mubr.bf16.vlgmr.msra.gmra.mxu1 %v570_v36  ;;  %667 = vmatpush3.bf16.msra.mxu0 %v725_v39 }
  0x25   :  { %668 = vmatprep.subr.bf16.mxu0 %v726_v40  ;;  %541 = vmatprep.mubr.bf16.mxu0 %v573_v48 }
  0x28   :  { %669 = vmatpush3.bf16.msra.mxu0 %v727_v41 }
  0x29   :  { %670 = vmatprep.subr.bf16.mxu0 %v728_v42 }
  0x2c   :  { %671 = vmatpush3.bf16.msra.mxu0 %v729_v43 }
  0x2d   :  { %672 = vmatprep.subr.bf16.mxu0 %v730_v44 }
  0x30   :  { %673 = vmatpush3.bf16.msra.mxu0 %v731_v45 }
  0x31   :  { %674 = vmatprep.subr.bf16.mxu0 %v732_v46 }
  0x34   :  { %675 = vmatpush3.bf16.msra.mxu0 %v733_v49 }
  0x35   :  { %676 = vmatprep.subr.bf16.mxu0 %v734_v50 }
  0x38   :  { %677 = vmatpush3.bf16.msra.mxu0 %v735_v51 }
  0x39   :  { %678 = vmatprep.subr.bf16.mxu0 %v736_v52 }
  0x3c   :  { %679 = vmatpush3.bf16.msra.mxu0 %v737_v53 }
  0x3d   :  { %680 = vmatprep.subr.bf16.mxu0 %v738_v54 }
  0x40   :  { %681 = vmatpush3.bf16.msra.mxu0 %v739_v55 }
  0x43   :  { %542 = vmatmul.mubr.bf16.vlgmr.msra.gmra.mxu0 %v572_v56 }
  0xe3   :  { %v638_v57 = vpop.f32.mrf.mxu0 }
  0xe4   :  { %v660_v58 = vpop.f32.mrf.mxu1 }
  0xe5   :  { %v639_v59 = vpop.f32.mrf.mxu0 }
  0xe6   :  { %v661_v60 = vpop.f32.mrf.mxu1  ;;  %v640_v4 = vadd.f32 %v639_v59, %v638_v57 }
  0xe7   :  { %v641_v61 = vpop.f32.mrf.mxu0  ;;  %v662_v5 = vadd.f32 %v661_v60, %v660_v58 }
  0xe8   :  { %v663_v62 = vpop.f32.mrf.mxu1 }
  0xe9   :  { %v642_v63 = vpop.f32.mrf.mxu0  ;;  %v504_v10 = vadd.f32 %v662_v5, %v640_v4 }
  0xea   :  { %v664_v0 = vpop.f32.mrf.mxu1 }
 0x103   :  { %v682_v8 = vpop.f32.mrf.mxu0 }
 0x105   :  { %v683_v9 = vpop.f32.mrf.mxu0 }
 0x106   :  { %v684_v11 = vadd.f32 %v683_v9, %v682_v8 }
 0x107   :  { %v685_v13 = vpop.f32.mrf.mxu0 }
 0x108   :  { %v544_v14 = vadd.f32 %v684_v11, %v504_v10 }
 0x109   :  { %v686_v15 = vpop.f32.mrf.mxu0 }
 0x10a   :  { %v561_v16 = vadd.f32 %v560_v12, %v544_v14 }
 0x10c   :  { %v562_v17 = vpack.c.bf16 %v561_v16, %v561_v16 }
 0x10e   :  { %563 = vst [vmem:[%s924_s3] sm:$0xf] %v562_v17 }

// kernel: vit_forward.11
= control target key start
LH: loop header
LB: loop body
LE: loop exit
PB: predicated region body
PF: predicated region fallthrough
CT: control target
= control target key end

     0   :  { %vm24_vm0 = vcmask 1041408   ;;  %s326_s0 = inlined_call_operand.vmem [shape: bf16[2,128], index: 0, kind: input, shape index: {}]   ;;  %s327_s1 = inlined_call_operand.vmem [shape: bf16[1,128], index: 1, kind: input, shape index: {}]   ;;  %s328_s2 = inlined_call_operand.vmem [shape: bf16[1,128], index: 2, kind: input, shape index: {}]   ;;  %s329_s3 = inlined_call_operand.vmem [shape: bf16[128,8], index: 3, kind: input, shape index: {}]   ;;  %s330_s4 = inlined_call_operand.vmem [shape: bf16[1,8], index: 4, kind: input, shape index: {}]   ;;  %s331_s5 = inlined_call_operand.hbm [shape: f32[2,8], index: 5, kind: output, shape index: {}]  }
   0x1   :  { %v22_v0 = vld [vmem:[%s326_s0] sm:$0x1] }
   0x2   :  { %v23_v1 = vunpack.c.l.bf16 %v22_v0 }
   0x4   :  { %v25_v2 = vsel %vm24_vm0, %v23_v1, 0.0 }
   0x5   :  { %26 = vadd.xlane.f32.xlu0 %v25_v2 }
   0x6   :  { %10 = vsyncpa [#allocation3], 0  ;;  %v220_v3 = vld [vmem:[%s329_s3 + $0x38] sm:$0xff]   ;;  %v252_v4 = vmov 0.0   ;;  %v221_v5 = vld [vmem:[%s329_s3 + $0x30] sm:$0xff]   ;;  %vm253_vm1 = vmmov 0   ;;  %v41_v20 = vlaneseq }
   0x7   :  { %197 = vmatprep.subr.bf16.mxu0 %v252_v4  ;;  %v222_v11 = vld [vmem:[%s329_s3 + $0x28] sm:$0xff]   ;;  %v223_v12 = vld [vmem:[%s329_s3 + $0x20] sm:$0xff]   ;;  %213 = vmatprep.mubr.msk.bf16.mxu0 %vm253_vm1, %v252_v4  ;;  %v224_v13 = vld [vmem:[%s329_s3 + $0x18] sm:$0xff]   ;;  %vm164_vm2 = vcmask 58368  }
   0x8   :  { %198 = vmatpush3.bf16.msra.mxu0 %v220_v3  ;;  %v225_v14 = vld [vmem:[%s329_s3 + $0x10] sm:$0xff]   ;;  %v226_v15 = vld [vmem:[%s329_s3 + $0x8] sm:$0xff]   ;;  %v227_v16 = vld [vmem:[%s329_s3] sm:$0xff]   ;;  %v42_v21 = vshrl.u32 %v41_v20, 7 }
   0x9   :  { %199 = vmatprep.subr.bf16.mxu0 %v252_v4  ;;  %v39_v22 = vld [vmem:[%s327_s1] sm:$0x1]  ;;  %s254_s1 = smov [#allocation2]  }
   0xa   :  { %v46_v23 = vld [vmem:[%s328_s2] sm:$0x1]  ;;  %v40_v24 = vunpack.c.l.bf16 %v39_v22  ;;  %v43_v25 = vsub.s32 0, %v42_v21  ;;  %s172_s15 = sshll.u32 %s254_s1, 4  ;;  %s173_s15 = int_to_ptr.vmem [resolvable:$true] %s172_s15 }
   0xb   :  { %v47_v26 = vunpack.c.l.bf16 %v46_v23  ;;  %v70_v34 = vld [vmem:[%s330_s4] sm:$0x1]  ;;  %s230_s2 = scalar_lea.vmem %s173_s15, 32  ;;  %p235_p1 = scmp.lt.s32.totalorder %s173_s15, %s173_s15 }
   0xc   :  { %200 = vmatpush3.bf16.msra.mxu0 %v221_v5  ;;  %v44_v27 = vrot.slane %v40_v24, %v43_v25  ;;  %v71_v35 = vunpack.c.l.bf16 %v70_v34  ;;  %p231_p0 = scmp.ne.s32.totalorder %s173_s15, %s230_s2  ;;  %p236_p2 = scmp.lt.s32.totalorder %s230_s2, %s230_s2 }
   0xd   :  { %201 = vmatprep.subr.bf16.mxu0 %v252_v4  ;;  %v51_v30 = vrot.slane %v47_v26, %v43_v25 }
   0xe   :  { %v75_v36 = vrot.slane %v71_v35, %v43_v25  ;;  %p237_p3 = por %p236_p2, %p235_p1 }
  0x10   :  { %202 = vmatpush3.bf16.msra.mxu0 %v222_v11  ;;  %p238_p4 = pnand %p237_p3, %p231_p0 }
  0x11   :  { %203 = vmatprep.subr.bf16.mxu0 %v252_v4 }
  0x14   :  { %204 = vmatpush3.bf16.msra.mxu0 %v223_v12 }
  0x15   :  { %205 = vmatprep.subr.bf16.mxu0 %v252_v4 }
  0x18   :  { %206 = vmatpush3.bf16.msra.mxu0 %v224_v13 }
  0x19   :  { %207 = vmatprep.subr.bf16.mxu0 %v252_v4 }
  0x1c   :  { %208 = vmatpush3.bf16.msra.mxu0 %v225_v14 }
  0x1d   :  { %209 = vmatprep.subr.bf16.mxu0 %v252_v4 }
  0x20   :  { %210 = vmatpush3.bf16.msra.mxu0 %v226_v15 }
  0x21   :  { %211 = vmatprep.subr.bf16.mxu0 %v252_v4 }
  0x24   :  { %212 = vmatpush3.bf16.msra.mxu0 %v227_v16 }
  0x8e   :  { %v27_v6 = vpop.xlane.xlu0 %26 }
  0x8f   :  { %v29_v7 = vmul.f32 0.0078125, %v27_v6 }
  0x91   :  { %v30_v8 = vsub.f32 %v23_v1, %v29_v7 }
  0x93   :  { %v31_v9 = vmul.f32 %v30_v8, %v30_v8 }
  0x95   :  { %v32_v10 = vsel %vm24_vm0, %v31_v9, 0.0 }
  0x96   :  { %33 = vadd.xlane.f32.xlu0 %v32_v10 }
 0x11f   :  { %v34_v17 = vpop.xlane.xlu0 %33 }
 0x120   :  { %v35_v18 = vmul.f32 0.0078125, %v34_v17 }
 0x122   :  { %v36_v19 = vadd.f32 1e-06, %v35_v18 }
 0x124   :  { %228 = vrsqrt.f32 %v36_v19 }
 0x131   :  { %v229_v28 = vpop.eup %228 }
 0x132   :  { %v38_v29 = vmul.f32 %v229_v28, %v30_v8 }
 0x134   :  { %v45_v31 = vmul.f32 %v44_v27, %v38_v29 }
 0x136   :  { %v52_v32 = vadd.f32 %v51_v30, %v45_v31 }
 0x138   :  { %v53_v33 = vpack.c.bf16 %v52_v32, %v52_v32 }
 0x13a   :  { %214 = vmatmul.mubr.bf16.vlgmr.msra.gmra.mxu0 %v53_v33 }
 0x1fa   :  { %v158_v37 = vpop.f32.mrf.mxu0 }
 0x1fb   :  { %v159_v38 = vadd.f32 %v158_v37, %v75_v36 }
 0x1fc   :  { %v215_v39 = vpop.f32.mrf.mxu0 }
 0x1fd   :  { %165 = vst.msk [vmem:[#allocation2] sm:$0x3] %vm164_vm2, %v159_v38 }
 0x1fe   :  { %v161_v40 = vpop.f32.mrf.mxu0 }
 0x1ff   :  { %241 = shalt.err (!%p238_p4)
}
 0x200   :  { %175 = dma.vmem_to_hbm [thread:$0]  %s173_s15, 32, %s331_s5, [#allocation3]   ;;  %v216_v41 = vpop.f32.mrf.mxu0 }
 0x201   :  { %250 = dma.done.wait [#allocation3], 32  }
 0x202   :  { %251 = vsyncadd [#allocation3], 4294967264 }
 0x203   :  { %179 = vsyncpa [#allocation3], 1 }

// kernel: vit_forward.9
= control target key start
LH: loop header
LB: loop body
LE: loop exit
PB: predicated region body
PF: predicated region fallthrough
CT: control target
= control target key end

     0   :  { %18 = vsyncpa [#allocation3], 0  ;;  %s3022_s0 = inlined_call_operand.vmem [shape: bf16[2,5,128], index: 0, kind: input, shape index: {}]   ;;  %s3023_s1 = inlined_call_operand.vmem [shape: bf16[1,128], index: 1, kind: input, shape index: {}]   ;;  %s3024_s2 = inlined_call_operand.vmem [shape: bf16[1,128], index: 2, kind: input, shape index: {}]   ;;  %s3025_s3 = inlined_call_operand.vmem [shape: bf16[128,384], index: 3, kind: input, shape index: {}]   ;;  %s3026_s4 = inlined_call_operand.vmem [shape: bf16[1,384], index: 4, kind: input, shape index: {}]   ;;  %s3027_s5 = inlined_call_operand.vmem [shape: bf16[128,128], index: 5, kind: input, shape index: {}]   ;;  %s3028_s6 = inlined_call_operand.vmem [shape: bf16[1,128], index: 6, kind: input, shape index: {}]   ;;  %s3029_s7 = inlined_call_operand.vmem [shape: bf16[1,128], index: 7, kind: input, shape index: {}]   ;;  %s3030_s8 = inlined_call_operand.hbm [shape: bf16[1,128], index: 8, kind: input, shape index: {}]   ;;  %s3031_s9 = inlined_call_operand.vmem [shape: bf16[128,512], index: 9, kind: input, shape index: {}]   ;;  %s3032_s10 = inlined_call_operand.vmem [shape: bf16[1,512], index: 10, kind: input, shape index: {}]   ;;  %s3033_s11 = inlined_call_operand.vmem [shape: bf16[512,128], index: 11, kind: input, shape index: {}]   ;;  %s3034_s12 = inlined_call_operand.hbm [shape: bf16[1,128], index: 12, kind: input, shape index: {}]   ;;  %s3035_s13 = inlined_call_operand.vmem [shape: bf16[2,5,128], index: 13, kind: output, shape index: {}]  }
   0x1   :  { %19 = vsyncpa [#allocation5], 0  ;;  %s2535_s25 = smov 0  }
   0x2 LB: > { %s2541_s26 = sadd.s32 4294967295, %s2456_s25   ;;  %p1964_p0 = scmp.ge.s32.totalorder %s2456_s25, 1  ;;  %s2456_s25 = sphi %s2535_s25, %s25_s25  }
   0x3   : > { %p334_p1 = scmp.lt.s32.totalorder %s2456_s25, 3  ;;  %p3036_p2 = scmp.eq.s32.totalorder %s2541_s26, 0 }
   0x4   : > { %s2458_s28 = smov [#allocation2]   ;;  %s2459_s30 = smov [#allocation4]  }
   0x5   : > { %p2546_p3 = pnand %p1964_p0, %p334_p1  ;;  %s368_s29 = sshll.u32 %s2458_s28, 4  ;;  %s369_s29 = int_to_ptr.vmem [resolvable:$true] %s368_s29 }
   0x6   : > { %s388_s14 = sshll.u32 %s2459_s30, 4  ;;  %s2401_s16 = scalar_lea.vmem %s369_s29, 16  ;;  %s389_s14 = int_to_ptr.vmem [resolvable:$true] %s388_s14 }
   0x7   : > { %p2224_p4 = pneg %p2546_p3  ;;  %p2402_p7 = scmp.ne.s32.totalorder %s369_s29, %s2401_s16 }
   0x8   : > { %s2408_s17 = scalar_lea.vmem %s369_s29, 32  ;;  %p2409_p10 = scmp.lt.s32.totalorder %s369_s29, %s369_s29 }
   0x9   : > { %p2554_p5 = pnand %p3036_p2, %p2224_p4  ;;  %p2410_p11 = scmp.lt.s32.totalorder %s2408_s17, %s2401_s16 }
   0xb   : > { %p2392_p6 = pneg %p2554_p5  ;;  %p2411_p12 = por %p2410_p11, %p2409_p10 }
   0xd   : > { %p2404_p8 = pnand %p2402_p7, %p2392_p6 }
   0xf   : > { %p2405_p9 = pneg %p2404_p8 }
  0x11   : > { %p2412_p13 = pnand %p2411_p12, %p2405_p9 }
  0x13   : > { %2415 = shalt.err (!%p2412_p13)
}
  0x14   : > { %2227 = dma.hbm_to_vmem [thread:$0]  (!%p2554_p5), %s3030_s8, 16, %s369_s29, [#allocation3]  }
  0x15   : > { %s2427_s20 = scalar_lea.vmem %s389_s14, 16  ;;  %s2434_s21 = scalar_lea.vmem %s389_s14, 32 }
  0x16   : > { %p2428_p0 = scmp.ne.s32.totalorder %s389_s14, %s2427_s20  ;;  %p2435_p7 = scmp.lt.s32.totalorder %s389_s14, %s389_s14 }
  0x17   : > { %p2436_p8 = scmp.lt.s32.totalorder %s2434_s21, %s2427_s20 }
  0x18   : > { %p2430_p1 = pnand %p2428_p0, %p2392_p6 }
  0x19   : > { %p2437_p2 = por %p2436_p8, %p2435_p7 }
  0x1a   : > { %p2431_p4 = pneg %p2430_p1 }
  0x1c   : > { %p2438_p10 = pnand %p2437_p2, %p2431_p4 }
  0x1e   : > { %2441 = shalt.err (!%p2438_p10)
}
  0x1f   : > { %2230 = dma.hbm_to_vmem [thread:$0]  (!%p2554_p5), %s3034_s12, 16, %s389_s14, [#allocation5]  }
  0x20   : > { %408 = sbr.rel (%p2546_p3) target bundleno = 2732 (0xaac), region = 72  ;;  %p3039_p9 = scmp.eq.s32.totalorder (!%p2546_p3), %s2541_s26, 0 }
  0x25   : > { %2447 = dma.done.wait (%p3039_p9), [#allocation3], 16   ;;  %p3040_p6 = pmov %p3039_p9 }
  0x27   : > { %2449 = vsyncadd (%p3040_p6), [#allocation3], 4294967280  ;;  %p3041_p11 = pmov %p3040_p6 }
  0x28   : > { %p3042_p2 = pmov %p3040_p6 }
  0x29   : > { %2451 = dma.done.wait (%p3041_p11), [#allocation5], 16  }
  0x2a   : > { %2453 = vsyncadd (%p3042_p2), [#allocation5], 4294967280  ;;  %p454_p12 = scmp.lt.s32.totalorder %s2541_s26, 1  ;;  %vm465_vm0 = vcmask 1044480   ;;  %v2250_v3 = vld [vmem:[%s3025_s3 + $0xac] ss:$12 sps:$4 sm:$0xff]   ;;  %v482_v37 = vlaneseq }
  0x2b   : > { %v2252_v4 = vld [vmem:[%s3025_s3 + $0xa8] ss:$12 sps:$4 sm:$0xff]   ;;  %v2460_v5 = vmov 0.0   ;;  %v2253_v6 = vld [vmem:[%s3025_s3 + $0xb0] ss:$12 sps:$4 sm:$0xff]   ;;  %685 = vmatprep.subr.bf16.mxu0 %v2250_v3  ;;  %v2461_v25 = vmov 0  }
  0x2c   : > { %s3044_s26 = smov (!%p454_p12, %s2541_s26), 1  ;;  %2148 = vmatprep.subr.bf16.mxu1 %v2460_v5  ;;  %v2254_v7 = vld [vmem:[%s3025_s3 + $0x94] ss:$12 sps:$4 sm:$0xff]   ;;  %v2256_v8 = vld [vmem:[%s3025_s3 + $0x90] ss:$12 sps:$4 sm:$0xff]   ;;  %686 = vmatpush1.bf16.msra.mxu0 %v2252_v4  ;;  %vm2462_vm1 = vmmov 0  }
  0x2d   : > { %s1971_s24 = sshll.u32 %s3044_s26, 2  ;;  %v2257_v9 = vld [vmem:[%s3025_s3 + $0x98] ss:$12 sps:$4 sm:$0xff]   ;;  %2149 = vmatpush3.bf16.msra.mxu1 %v2253_v6  ;;  %687 = vmatprep.subr.bf16.mxu0 %v2254_v7  ;;  %v2258_v15 = vld [vmem:[%s3025_s3 + $0x7c] ss:$12 sps:$4 sm:$0xff]   ;;  %v2691_v38 = vshrl.u32 %v482_v37, 7 }
  0x2e   : > { %s457_s29 = scalar_lea.vmem %s3022_s0, %s1971_s24  ;;  %2150 = vmatprep.subr.bf16.mxu1 %v2460_v5  ;;  %v2260_v16 = vld [vmem:[%s3025_s3 + $0x78] ss:$12 sps:$4 sm:$0xff]   ;;  %v2261_v17 = vld [vmem:[%s3025_s3 + $0x80] ss:$12 sps:$4 sm:$0xff]   ;;  %v2265_v20 = vld [vmem:[%s3025_s3 + $0x68] ss:$12 sps:$4 sm:$0xff]   ;;  %717 = vmatprep.mubr.bf16.mxu0 %v2461_v25  ;;  %s461_s27 = scalar_lea.vmem %s3035_s13, %s1971_s24 }
  0x2f   : > { %v463_v0 = vld [vmem:[%s457_s29] sm:$0x7]  ;;  %v2262_v18 = vld [vmem:[%s3025_s3 + $0x64] ss:$12 sps:$4 sm:$0xff]   ;;  %v2266_v21 = vld [vmem:[%s3025_s3 + $0x4c] ss:$12 sps:$4 sm:$0xff]   ;;  %2164 = vmatprep.mubr.msk.bf16.mxu1 %vm2462_vm1, %v2460_v5 }
  0x30   : > { %v2596_v1 = vunpack.c.l.bf16 %v463_v0  ;;  %688 = vmatpush1.bf16.msra.mxu0 %v2256_v8  ;;  %v2264_v19 = vld [vmem:[%s3025_s3 + $0x60] ss:$12 sps:$4 sm:$0xff]   ;;  %v2268_v22 = vld [vmem:[%s3025_s3 + $0x48] ss:$12 sps:$4 sm:$0xff]   ;;  %v2269_v23 = vld [vmem:[%s3025_s3 + $0x50] ss:$12 sps:$4 sm:$0xff]  }
  0x31   : > { %2151 = vmatpush3.bf16.msra.mxu1 %v2257_v9  ;;  %689 = vmatprep.subr.bf16.mxu0 %v2258_v15  ;;  %v2270_v24 = vld [vmem:[%s3025_s3 + $0x34] ss:$12 sps:$4 sm:$0xff]   ;;  %v2272_v26 = vld [vmem:[%s3025_s3 + $0x30] ss:$12 sps:$4 sm:$0xff]   ;;  %v2273_v27 = vld [vmem:[%s3025_s3 + $0x38] ss:$12 sps:$4 sm:$0xff]  }
  0x32   : > { %v466_v2 = vsel %vm465_vm0, %v2596_v1, 0.0  ;;  %2152 = vmatprep.subr.bf16.mxu1 %v2460_v5  ;;  %v2274_v28 = vld [vmem:[%s3025_s3 + $0x1c] ss:$12 sps:$4 sm:$0xff]   ;;  %v2276_v29 = vld [vmem:[%s3025_s3 + $0x18] ss:$12 sps:$4 sm:$0xff]   ;;  %v2700_v42 = vsub.s32 0, %v2691_v38 }
  0x33   : > { %467 = vadd.xlane.f32.xlu0 %v466_v2  ;;  %v2277_v30 = vld [vmem:[%s3025_s3 + $0x20] ss:$12 sps:$4 sm:$0xff]   ;;  %v2278_v31 = vld [vmem:[%s3025_s3 + $0x4] ss:$12 sps:$4 sm:$0xff]   ;;  %v2281_v33 = vld [vmem:[%s3025_s3 + $0x8] ss:$12 sps:$4 sm:$0xff]  }
  0x34   : > { %690 = vmatpush1.bf16.msra.mxu0 %v2260_v16  ;;  %v2280_v32 = vld [vmem:[%s3025_s3] ss:$12 sps:$4 sm:$0xff]   ;;  %v536_v52 = vsub.s32 2, %v2691_v38  ;;  %v540_v54 = vsub.s32 4, %v2691_v38  ;;  %vm771_vm2 = vcmask 523264   ;;  %vm836_vm3 = vcmask 1041408  }
  0x35   : > { %2153 = vmatpush3.bf16.msra.mxu1 %v2261_v17  ;;  %691 = vmatprep.subr.bf16.mxu0 %v2262_v18  ;;  %v480_v39 = vld [vmem:[%s3023_s1] sm:$0x1]  ;;  %s2463_s28 = smov 64   ;;  %vm837_vm4 = vcmask 1042432   ;;  %vm819_vm5 = vcmask 36864   ;;  %vm832_vm6 = vcmask 39936  }
  0x36   : > { %2154 = vmatprep.subr.bf16.mxu1 %v2460_v5  ;;  %v487_v40 = vld [vmem:[%s3024_s2] sm:$0x1]  ;;  %v481_v41 = vunpack.c.l.bf16 %v480_v39  ;;  %vm1882_vm7 = vsmask.f32 2304 }
  0x37   : > { %v488_v43 = vunpack.c.l.bf16 %v487_v40  ;;  %v527_v51 = vld [vmem:[%s3026_s4] sm:$0x7]  ;;  %vm1883_vm8 = vmand %vm837_vm4, %vm1882_vm7 }
  0x38   : > { %692 = vmatpush1.bf16.msra.mxu0 %v2264_v19  ;;  %v485_v44 = vrot.slane %v481_v41, %v2700_v42  ;;  %v528_v53 = vunpack.c.l.bf16 %v527_v51  ;;  %v2285_v41 = vld [vmem:[%s3027_s5] sm:$0xff]  }
  0x39   : > { %2155 = vmatpush3.bf16.msra.mxu1 %v2265_v20  ;;  %693 = vmatprep.subr.bf16.mxu0 %v2266_v21  ;;  %v492_v47 = vrot.slane %v488_v43, %v2700_v42 }
  0x3a   : > { %2156 = vmatprep.subr.bf16.mxu1 %v2460_v5  ;;  %v537_v55 = vrot.slane %v528_v53, %v536_v52  ;;  %v541_v56 = vrot.slane %v528_v53, %v540_v54  ;;  %v533_v60 = vrot.slane %v528_v53, %v2700_v42 }
  0x3c   : > { %694 = vmatpush1.bf16.msra.mxu0 %v2268_v22  ;;  %v552_v57 = vrot.slane %v537_v55, %v2700_v42  ;;  %v556_v61 = vrot.slane %v541_v56, %v2700_v42  ;;  %v548_v4 = vrot.slane %v533_v60, %v2700_v42 }
  0x3d   : > { %2157 = vmatpush3.bf16.msra.mxu1 %v2269_v23  ;;  %695 = vmatprep.subr.bf16.mxu0 %v2270_v24 }
  0x3e   : > { %2158 = vmatprep.subr.bf16.mxu1 %v2460_v5 }
  0x40   : > { %696 = vmatpush1.bf16.msra.mxu0 %v2272_v26 }
  0x41   : > { %2159 = vmatpush3.bf16.msra.mxu1 %v2273_v27  ;;  %697 = vmatprep.subr.bf16.mxu0 %v2274_v28 }
  0x42   : > { %2160 = vmatprep.subr.bf16.mxu1 %v2460_v5 }
  0x44   : > { %698 = vmatpush1.bf16.msra.mxu0 %v2276_v29 }
  0x45   : > { %2161 = vmatpush3.bf16.msra.mxu1 %v2277_v30  ;;  %699 = vmatprep.subr.bf16.mxu0 %v2278_v31  ;;  %v2282_v30 = vld [vmem:[%s3027_s5 + $0x18] sm:$0xff]   ;;  %v2283_v31 = vld [vmem:[%s3027_s5 + $0x10] sm:$0xff]  }
  0x46   : > { %2162 = vmatprep.subr.bf16.mxu1 %v2460_v5 }
  0x48   : > { %700 = vmatpush1.bf16.msra.mxu0 %v2280_v32  ;;  %v2284_v32 = vld [vmem:[%s3027_s5 + $0x8] sm:$0xff]  }
  0x49   : > { %2163 = vmatpush3.bf16.msra.mxu1 %v2281_v33  ;;  %2180 = vmatprep.subr.bf16.mxu0 %v2460_v5 }
  0x4a   : > { %2168 = vmatprep.subr.bf16.mxu1 %v2460_v5 }
  0xbc   : > { %v468_v10 = vpop.xlane.xlu0 %467 }
  0xbd   : > { %v470_v11 = vmul.f32 0.0078125, %v468_v10 }
  0xbf   : > { %v2622_v12 = vsub.f32 %v2596_v1, %v470_v11  ;;  %v2464_v11 = vmov 65535  }
  0xc1   : > { %v472_v13 = vmul.f32 %v2622_v12, %v2622_v12 }
  0xc3   : > { %v473_v14 = vsel %vm465_vm0, %v472_v13, 0.0 }
  0xc4   : > { %474 = vadd.xlane.f32.xlu0 %v473_v14 }
 0x14d   : > { %v475_v34 = vpop.xlane.xlu0 %474 }
 0x14e   : > { %v476_v35 = vmul.f32 0.0078125, %v475_v34 }
 0x150   : > { %v477_v36 = vadd.f32 1e-06, %v476_v35 }
 0x152   : > { %2370 = vrsqrt.f32 %v477_v36 }
 0x15f   : > { %v2371_v45 = vpop.eup %2370 }
 0x160   : > { %v479_v46 = vmul.f32 %v2371_v45, %v2622_v12  ;;  %v838_v12 = vsel %vm836_vm3, 4294967295, %v2464_v11 }
 0x161   : > { %v2728_v15 = vsel %vm837_vm4, %v838_v12, 0  ;;  %v2289_v12 = vld [vmem:[%s3027_s5 + $0x20] sm:$0xff]  }
 0x162   : > { %v486_v48 = vmul.f32 %v485_v44, %v479_v46 }
 0x164   : > { %v493_v49 = vadd.f32 %v492_v47, %v486_v48 }
 0x166   : > { %v494_v50 = vpack.c.bf16 %v493_v49, %v493_v49 }
 0x168   : > { %718 = vmatmul.mubr.bf16.vlgmr.msra.gmra.mxu0 %v494_v50  ;;  %2165 = vmatmul.mubr.bf16.vlgmr.msra.gmra.mxu1 %v494_v50 }
 0x169   : > { %2170 = vmatprep.mubr.msk.bf16.mxu1 %vm2462_vm1, %v2460_v5  ;;  %2188 = vmatprep.mubr.msk.bf16.mxu0 %vm2462_vm1, %v2460_v5 }
 0x16a   : > { %2181 = vmatpush3.bf16.msra.mxu0 %v2282_v30  ;;  %v2293_v30 = vld [vmem:[%s3031_s9 + $0xe8] ss:$16 sps:$4 sm:$0xff]  }
 0x16b   : > { %2182 = vmatprep.subr.bf16.mxu0 %v2460_v5 }
 0x16e   : > { %2183 = vmatpush3.bf16.msra.mxu0 %v2283_v31  ;;  %v2298_v31 = vld [vmem:[%s3031_s9 + $0xc4] ss:$16 sps:$4 sm:$0xff]  }
 0x16f   : > { %2184 = vmatprep.subr.bf16.mxu0 %v2460_v5 }
 0x172   : > { %2185 = vmatpush3.bf16.msra.mxu0 %v2284_v32  ;;  %v2301_v32 = vld [vmem:[%s3031_s9 + $0xcc] ss:$16 sps:$4 sm:$0xff]  }
 0x173   : > { %2186 = vmatprep.subr.bf16.mxu0 %v2460_v5 }
 0x176   : > { %2187 = vmatpush3.bf16.msra.mxu0 %v2285_v41  ;;  %v2304_v41 = vld [vmem:[%s3031_s9 + $0xa4] ss:$16 sps:$4 sm:$0xff]  }
 0x177   : > { %2204 = vmatprep.subr.bf16.mxu0 %v2460_v5 }
 0x228   : > { %v719_v58 = vpop.f32.mrf.mxu0  ;;  %v760_v59 = vpop.f32.mrf.mxu1 }
 0x229   : > { %v761_v7 = vadd.f32 %v760_v59, %v556_v61  ;;  %v720_v13 = vadd.f32 %v719_v58, %v548_v4  ;;  %v2288_v4 = vld [vmem:[%s3027_s5 + $0x28] sm:$0xff]  }
 0x22a   : > { %v721_v62 = vpop.f32.mrf.mxu0  ;;  %v2166_v63 = vpop.f32.mrf.mxu1 }
 0x22b   : > { %v722_v0 = vadd.f32 %v721_v62, %v552_v57  ;;  %v2725_v14 = vpack.c.bf16 %v761_v7, %v761_v7  ;;  %v766_v16 = vpack.c.bf16 %v720_v13, %v720_v13  ;;  %v2286_v63 = vld [vmem:[%s3027_s5 + $0x38] sm:$0xff]  }
 0x22c   : > { %v723_v2 = vpop.f32.mrf.mxu0  ;;  %v763_v3 = vpop.f32.mrf.mxu1 }
 0x22d   : > { %v767_v6 = vpack.c.bf16 %v722_v0, %v722_v0  ;;  %v841_v17 = vand.u32 %v2728_v15, %v2725_v14  ;;  %v2287_v2 = vld [vmem:[%s3027_s5 + $0x30] sm:$0xff]  }
 0x22e   : > { %v724_v8 = vpop.f32.mrf.mxu0  ;;  %v2167_v9 = vpop.f32.mrf.mxu1 }
 0x22f   : > { %v776_v10 = vsel %vm771_vm2, %v767_v6, 0  ;;  %968 = vrot.lane.b32.xlu0 %v767_v6, %s2463_s28 }
 0x230   : > { %2169 = vmatpush3.bf16.xpose.msra.mxu1 %v776_v10 }
 0x231   : > { %2174 = vmatprep.subr.bf16.mxu1 %v2460_v5 }
 0x237   : > { %2171 = vmatmul.mubr.msk.bf16.vlgmr.msra.gmra.mxu1 %vm771_vm2, %v766_v16 }
 0x238   : > { %2175 = vmatpush3.bf16.msra.mxu1 %v841_v17  ;;  %2176 = vmatprep.mubr.msk.bf16.mxu1 %vm2462_vm1, %v2460_v5  ;;  %v769_v17 = vld [vmem:[%s3028_s6] sm:$0x1] }
 0x239   : > { %2192 = vmatprep.subr.bf16.mxu1 %v2460_v5 }
 0x2a1   : > { %v969_v36 = vpop.permute.xlu0 %968 }
 0x2a2   : > { %v974_v39 = vsel %vm771_vm2, %v969_v36, 0 }
 0x2f7   : > { %v812_v18 = vpop.f32.mrf.mxu1 }
 0x2f8   : > { %v818_v19 = vmul.f32 0.125, %v812_v18  ;;  %v770_v18 = vunpack.c.l.bf16 %v769_v17 }
 0x2f9   : > { %v2172_v20 = vpop.f32.mrf.mxu1 }
 0x2fa   : > { %v820_v21 = vsel %vm819_vm5, %v818_v19, -inf }
 0x2fb   : > { %821 = vmax.xlane.f32.xlu1 %v820_v21  ;;  %v815_v22 = vpop.f32.mrf.mxu1 }
 0x2fd   : > { %v2173_v23 = vpop.f32.mrf.mxu1 }
 0x384   : > { %v822_v24 = vpop.xlane.xlu1 %821 }
 0x385   : > { %v823_v26 = vsub.f32 %v818_v19, %v822_v24  ;;  %v962_v19 = vrot.slane %v770_v18, %v2700_v42 }
 0x387   : > { %v824_v27 = vmul.f32 1.442695, %v823_v26 }
 0x389   : > { %2372 = vpow2.f32 %v824_v27 }
 0x396   : > { %v2373_v28 = vpop.eup %2372 }
 0x397   : > { %v826_v29 = vsel %vm819_vm5, %v2373_v28, 0.0 }
 0x398   : > { %827 = vadd.xlane.f32.xlu1 %v826_v29  ;;  %v2292_v29 = vld [vmem:[%s3031_s9 + $0xe4] ss:$16 sps:$4 sm:$0xff]  }
 0x3a9   : > { %965 = vrot.lane.b32.xlu1 %v766_v16, %s2463_s28 }
 0x421   : > { %v828_v33 = vpop.xlane.xlu1 %827 }
 0x422   : > { %2374 = vrcp.f32 %v828_v33  ;;  %v2296_v33 = vld [vmem:[%s3031_s9 + $0xc0] ss:$16 sps:$4 sm:$0xff]  }
 0x425   : > { %v966_v40 = vpop.permute.xlu1 %965 }
 0x42f   : > { %v2375_v34 = vpop.eup %2374 }
 0x430   : > { %v830_v35 = vmul.f32 %v2375_v34, %v2373_v28  ;;  %v2290_v28 = vld [vmem:[%s3031_s9 + $0xe0] ss:$16 sps:$4 sm:$0xff]   ;;  %v2299_v34 = vld [vmem:[%s3031_s9 + $0xc8] ss:$16 sps:$4 sm:$0xff]  }
 0x432   : > { %v831_v37 = vpack.c.bf16 %v830_v35, %v830_v35 }
 0x434   : > { %2177 = vmatmul.mubr.msk.bf16.vlgmr.msra.gmra.mxu1 %vm832_vm6, %v831_v37 }
 0x435   : > { %2193 = vmatpush3.bf16.xpose.msra.mxu1 %v974_v39  ;;  %2194 = vmatprep.mubr.msk.bf16.mxu1 %vm2462_vm1, %v2460_v5 }
 0x436   : > { %2198 = vmatprep.subr.bf16.mxu1 %v2460_v5 }
 0x43c   : > { %2195 = vmatmul.mubr.msk.bf16.vlgmr.msra.gmra.mxu1 %vm771_vm2, %v966_v40 }
 0x43d   : > { %2200 = vmatprep.mubr.msk.bf16.mxu1 %vm2462_vm1, %v2460_v5 }
 0x4f4   : > { %v877_v43 = vpop.f32.mrf.mxu1 }
 0x4f5   : > { %v883_v44 = vpack.c.bf16 %v877_v43, %v877_v43  ;;  %v2307_v43 = vld [vmem:[%s3031_s9 + $0xac] ss:$16 sps:$4 sm:$0xff]  }
 0x4f6   : > { %v2178_v45 = vpop.f32.mrf.mxu1 }
 0x4f7   : > { %2189 = vmatmul.mubr.msk.bf16.vlgmr.msra.gmra.mxu0 %vm771_vm2, %v883_v44  ;;  %v2302_v44 = vld [vmem:[%s3031_s9 + $0xa0] ss:$16 sps:$4 sm:$0xff]   ;;  %v2305_v45 = vld [vmem:[%s3031_s9 + $0xa8] ss:$16 sps:$4 sm:$0xff]  }
 0x4f8   : > { %v880_v46 = vpop.f32.mrf.mxu1  ;;  %2212 = vmatprep.mubr.msk.bf16.mxu0 %vm2462_vm1, %v2460_v5  ;;  %2205 = vmatpush3.bf16.msra.mxu0 %v2286_v63  ;;  %v2329_v63 = vld [vmem:[%s3031_s9 + $0x28] ss:$16 sps:$4 sm:$0xff]  }
 0x4f9   : > { %2206 = vmatprep.subr.bf16.mxu0 %v2460_v5  ;;  %v2308_v46 = vld [vmem:[%s3031_s9 + $0x80] ss:$16 sps:$4 sm:$0xff]  }
 0x4fa   : > { %v2179_v47 = vpop.f32.mrf.mxu1 }
 0x4fb   : > { %v2310_v47 = vld [vmem:[%s3031_s9 + $0x84] ss:$16 sps:$4 sm:$0xff]  }
 0x4fc   : > { %v1010_v48 = vpop.f32.mrf.mxu1  ;;  %2207 = vmatpush3.bf16.msra.mxu0 %v2287_v2  ;;  %v2337_v2 = vld [vmem:[%s3031_s9 + $0xc] ss:$16 sps:$4 sm:$0xff]  }
 0x4fd   : > { %v1016_v49 = vmul.f32 0.125, %v1010_v48  ;;  %2208 = vmatprep.subr.bf16.mxu0 %v2460_v5  ;;  %v2311_v48 = vld [vmem:[%s3031_s9 + $0x88] ss:$16 sps:$4 sm:$0xff]  }
 0x4fe   : > { %v2196_v50 = vpop.f32.mrf.mxu1 }
 0x4ff   : > { %v1017_v51 = vsel %vm819_vm5, %v1016_v49, -inf  ;;  %v2316_v50 = vld [vmem:[%s3031_s9 + $0x64] ss:$16 sps:$4 sm:$0xff]  }
 0x500   : > { %1018 = vmax.xlane.f32.xlu1 %v1017_v51  ;;  %v1013_v53 = vpop.f32.mrf.mxu1  ;;  %2209 = vmatpush3.bf16.msra.mxu0 %v2288_v4  ;;  %v2319_v51 = vld [vmem:[%s3031_s9 + $0x6c] ss:$16 sps:$4 sm:$0xff]   ;;  %v2335_v4 = vld [vmem:[%s3031_s9 + $0x8] ss:$16 sps:$4 sm:$0xff]  }
 0x501   : > { %2210 = vmatprep.subr.bf16.mxu0 %v2460_v5  ;;  %v2314_v53 = vld [vmem:[%s3031_s9 + $0x60] ss:$16 sps:$4 sm:$0xff]  }
 0x502   : > { %v2197_v55 = vpop.f32.mrf.mxu1 }
 0x503   : > { %v2317_v55 = vld [vmem:[%s3031_s9 + $0x68] ss:$16 sps:$4 sm:$0xff]  }
 0x504   : > { %2211 = vmatpush3.bf16.msra.mxu0 %v2289_v12 }
 0x589   : > { %v1019_v56 = vpop.xlane.xlu1 %1018 }
 0x58a   : > { %v1020_v57 = vsub.f32 %v1016_v49, %v1019_v56  ;;  %v2313_v49 = vld [vmem:[%s3031_s9 + $0x8c] ss:$16 sps:$4 sm:$0xff]   ;;  %v2322_v56 = vld [vmem:[%s3031_s9 + $0x44] ss:$16 sps:$4 sm:$0xff]  }
 0x58c   : > { %v1021_v58 = vmul.f32 1.442695, %v1020_v57  ;;  %v2325_v57 = vld [vmem:[%s3031_s9 + $0x4c] ss:$16 sps:$4 sm:$0xff]  }
 0x58e   : > { %2376 = vpow2.f32 %v1021_v58  ;;  %v2320_v58 = vld [vmem:[%s3031_s9 + $0x40] ss:$16 sps:$4 sm:$0xff]  }
 0x59b   : > { %v2377_v59 = vpop.eup %2376 }
 0x59c   : > { %v1023_v60 = vsel %vm819_vm5, %v2377_v59, 0.0 }
 0x59d   : > { %1024 = vadd.xlane.f32.xlu0 %v1023_v60  ;;  %v2328_v60 = vld [vmem:[%s3031_s9 + $0x24] ss:$16 sps:$4 sm:$0xff]  }
 0x5b3   : > { %1030 = vrot.lane.b32.xlu0 %v2725_v14, %s2463_s28 }
 0x5b7   : > { %v953_v61 = vpop.f32.mrf.mxu0 }
 0x5b8   : > { %v963_v20 = vadd.f32 %v962_v19, %v953_v61  ;;  %v2331_v61 = vld [vmem:[%s3031_s9 + $0x2c] ss:$16 sps:$4 sm:$0xff]  }
 0x5b9   : > { %v2190_v62 = vpop.f32.mrf.mxu0  ;;  %v2338_v19 = vld [vmem:[%s3033_s11 + $0x78] sm:$0xff]  }
 0x5ba   : > { %v2326_v62 = vld [vmem:[%s3031_s9 + $0x20] ss:$16 sps:$4 sm:$0xff]  }
 0x5bb   : > { %v956_v0 = vpop.f32.mrf.mxu0 }
 0x5bc   : > { %v2334_v0 = vld [vmem:[%s3031_s9 + $0x4] ss:$16 sps:$4 sm:$0xff]  }
 0x5bd   : > { %v2191_v3 = vpop.f32.mrf.mxu0 }
 0x5be   : > { %v2332_v3 = vld [vmem:[%s3031_s9] ss:$16 sps:$4 sm:$0xff]  }
 0x626   : > { %v1025_v6 = vpop.xlane.xlu0 %1024 }
 0x627   : > { %2378 = vrcp.f32 %v1025_v6 }
 0x62a   : > { %v1031_v7 = vpop.permute.xlu0 %1030 }
 0x62b   : > { %v1036_v8 = vand.u32 %v1031_v7, %v2728_v15 }
 0x62d   : > { %2199 = vmatpush3.bf16.msra.mxu1 %v1036_v8 }
 0x62e   : > { %1415 = vmatprep.subr.bf16.mxu1 %v2292_v29  ;;  %v2347_v29 = vld [vmem:[%s3033_s11 + $0xe8] sm:$0xff]  }
 0x634   : > { %v2379_v9 = vpop.eup %2378 }
 0x635   : > { %v1027_v10 = vmul.f32 %v2379_v9, %v2377_v59  ;;  %v2323_v59 = vld [vmem:[%s3031_s9 + $0x48] ss:$16 sps:$4 sm:$0xff]   ;;  %v1169_v9 = vld [vmem:[%s3029_s7] sm:$0x1] }
 0x637   : > { %v1028_v11 = vpack.c.bf16 %v1027_v10, %v1027_v10  ;;  %v1176_v10 = vld [vmem:[#allocation2] sm:$0x1] }
 0x638   : > { %v1177_v12 = vunpack.c.l.bf16 %v1176_v10 }
 0x639   : > { %2201 = vmatmul.mubr.msk.bf16.vlgmr.msra.gmra.mxu1 %vm832_vm6, %v1028_v11  ;;  %v1170_v11 = vunpack.c.l.bf16 %v1169_v9 }
 0x63a   : > { %1447 = vmatprep.mubr.bf16.mxu1 %v2461_v25  ;;  %1416 = vmatpush1.bf16.msra.mxu1 %v2290_v28  ;;  %v2346_v28 = vld [vmem:[%s3033_s11 + $0x68] sm:$0xff]  }
 0x63b   : > { %1417 = vmatprep.subr.bf16.mxu1 %v2298_v31  ;;  %v2350_v31 = vld [vmem:[%s3033_s11 + $0x60] sm:$0xff]  }
 0x63e   : > { %1418 = vmatpush1.bf16.msra.mxu1 %v2296_v33  ;;  %v2352_v33 = vld [vmem:[%s3033_s11 + $0x20] sm:$0xff]  }
 0x63f   : > { %1419 = vmatprep.subr.bf16.mxu1 %v2304_v41  ;;  %v2359_v41 = vld [vmem:[%s3033_s11 + $0xd0] sm:$0xff]  }
 0x642   : > { %1420 = vmatpush1.bf16.msra.mxu1 %v2302_v44  ;;  %v2361_v44 = vld [vmem:[%s3033_s11 + $0x90] sm:$0xff]  }
 0x643   : > { %1421 = vmatprep.subr.bf16.mxu1 %v2310_v47  ;;  %v2364_v47 = vld [vmem:[%s3033_s11 + $0x8] sm:$0xff]  }
 0x646   : > { %1422 = vmatpush1.bf16.msra.mxu1 %v2308_v46  ;;  %v2363_v46 = vld [vmem:[%s3033_s11 + $0xc8] sm:$0xff]  }
 0x647   : > { %1423 = vmatprep.subr.bf16.mxu1 %v2316_v50  ;;  %v2367_v50 = vld [vmem:[%s3033_s11 + $0xc0] sm:$0xff]  }
 0x64a   : > { %1424 = vmatpush1.bf16.msra.mxu1 %v2314_v53  ;;  %v2369_v53 = vld [vmem:[%s3033_s11 + $0x80] sm:$0xff]  }
 0x64b   : > { %1425 = vmatprep.subr.bf16.mxu1 %v2322_v56 }
 0x64e   : > { %1426 = vmatpush1.bf16.msra.mxu1 %v2320_v58 }
 0x64f   : > { %1427 = vmatprep.subr.bf16.mxu1 %v2328_v60 }
 0x652   : > { %1428 = vmatpush1.bf16.msra.mxu1 %v2326_v62 }
 0x653   : > { %1429 = vmatprep.subr.bf16.mxu1 %v2334_v0 }
 0x656   : > { %1430 = vmatpush1.bf16.msra.mxu1 %v2332_v3 }
 0x657   : > { %2104 = vmatprep.subr.bf16.mxu1 %v2338_v19 }
 0x6f9   : > { %v1072_v13 = vpop.f32.mrf.mxu1 }
 0x6fa   : > { %v1078_v5 = vpack.c.bf16 %v1072_v13, %v1072_v13  ;;  %v1174_v13 = vrot.slane %v1170_v11, %v2700_v42 }
 0x6fb   : > { %v2202_v14 = vpop.f32.mrf.mxu1 }
 0x6fc   : > { %2213 = vmatmul.mubr.msk.bf16.vlgmr.msra.gmra.mxu0 %vm771_vm2, %v1078_v5 }
 0x6fd   : > { %v1075_v16 = vpop.f32.mrf.mxu1  ;;  %1488 = vmatprep.mubr.bf16.mxu0 %v2461_v25 }
 0x6fe   : > { %v1181_v16 = vrot.slane %v1177_v12, %v2700_v42 }
 0x6ff   : > { %v2203_v15 = vpop.f32.mrf.mxu1 }
 0x7bc   : > { %v1148_v21 = vpop.f32.mrf.mxu0 }
 0x7bd   : > { %v1154_v22 = vadd.f32 %v1148_v21, %v963_v20  ;;  %v2339_v20 = vld [vmem:[%s3033_s11 + $0xf8] sm:$0xff]  }
 0x7be   : > { %v2214_v23 = vpop.f32.mrf.mxu0  ;;  %v2340_v21 = vld [vmem:[%s3033_s11 + $0x38] sm:$0xff]  }
 0x7bf   : > { %v2795_v24 = vadd.f32 %v1154_v22, %v2596_v1  ;;  %v2295_v1 = vld [vmem:[%s3031_s9 + $0xec] ss:$16 sps:$4 sm:$0xff]   ;;  %v2342_v23 = vld [vmem:[%s3033_s11 + $0x70] sm:$0xff]  }
 0x7c0   : > { %v1151_v26 = vpop.f32.mrf.mxu0  ;;  %1456 = vmatprep.subr.bf16.mxu0 %v2295_v1  ;;  %v2341_v22 = vld [vmem:[%s3033_s11 + $0xb8] sm:$0xff]   ;;  %v2349_v1 = vld [vmem:[%s3033_s11 + $0xa8] sm:$0xff]  }
 0x7c1   : > { %v1156_v27 = vsel %vm465_vm0, %v2795_v24, 0.0  ;;  %1457 = vmatpush1.bf16.msra.mxu0 %v2293_v30  ;;  %v2343_v26 = vld [vmem:[%s3033_s11 + $0xf0] sm:$0xff]   ;;  %v2348_v30 = vld [vmem:[%s3033_s11 + $0x28] sm:$0xff]  }
 0x7c2   : > { %1157 = vadd.xlane.f32.xlu1 %v1156_v27  ;;  %v2215_v25 = vpop.f32.mrf.mxu0  ;;  %1458 = vmatprep.subr.bf16.mxu0 %v2301_v32  ;;  %v2344_v27 = vld [vmem:[%s3033_s11 + $0x30] sm:$0xff]   ;;  %v2351_v32 = vld [vmem:[%s3033_s11 + $0xe0] sm:$0xff]  }
 0x7c3   : > { %v2345_v25 = vld [vmem:[%s3033_s11 + $0xb0] sm:$0xff]  }
 0x7c5   : > { %1459 = vmatpush1.bf16.msra.mxu0 %v2299_v34  ;;  %v2353_v34 = vld [vmem:[%s3033_s11 + $0xa0] sm:$0xff]  }
 0x7c6   : > { %1460 = vmatprep.subr.bf16.mxu0 %v2307_v43  ;;  %v2360_v43 = vld [vmem:[%s3033_s11 + $0x10] sm:$0xff]  }
 0x7c9   : > { %1461 = vmatpush1.bf16.msra.mxu0 %v2305_v45  ;;  %v2362_v45 = vld [vmem:[%s3033_s11 + $0x48] sm:$0xff]  }
 0x7ca   : > { %1462 = vmatprep.subr.bf16.mxu0 %v2313_v49  ;;  %v2366_v49 = vld [vmem:[%s3033_s11 + $0x40] sm:$0xff]  }
 0x7cd   : > { %1463 = vmatpush1.bf16.msra.mxu0 %v2311_v48  ;;  %v2365_v48 = vld [vmem:[%s3033_s11 + $0x88] sm:$0xff]  }
 0x7ce   : > { %1464 = vmatprep.subr.bf16.mxu0 %v2319_v51  ;;  %v2368_v51 = vld [vmem:[%s3033_s11] sm:$0xff]  }
 0x7d1   : > { %1465 = vmatpush1.bf16.msra.mxu0 %v2317_v55  ;;  %v1216_v55 = vld [vmem:[%s3032_s10] sm:$0xf] }
 0x7d2   : > { %1466 = vmatprep.subr.bf16.mxu0 %v2325_v57  ;;  %v1217_v56 = vunpack.c.l.bf16 %v1216_v55  ;;  %v1233_v57 = vsub.s32 6, %v2691_v38 }
 0x7d4   : > { %v1222_v58 = vrot.slane %v1217_v56, %v2700_v42  ;;  %v1226_v60 = vrot.slane %v1217_v56, %v536_v52 }
 0x7d5   : > { %1467 = vmatpush1.bf16.msra.mxu0 %v2323_v59  ;;  %v1230_v59 = vrot.slane %v1217_v56, %v540_v54 }
 0x7d6   : > { %1468 = vmatprep.subr.bf16.mxu0 %v2331_v61  ;;  %v1234_v61 = vrot.slane %v1217_v56, %v1233_v57  ;;  %v1242_v62 = vrot.slane %v1222_v58, %v2700_v42  ;;  %v1246_v0 = vrot.slane %v1226_v60, %v2700_v42  ;;  %v1601_v56 = vld [vmem:[#allocation4] sm:$0x1] }
 0x7d7   : > { %v1602_v57 = vunpack.c.l.bf16 %v1601_v56 }
 0x7d9   : > { %1469 = vmatpush1.bf16.msra.mxu0 %v2329_v63  ;;  %v1250_v63 = vrot.slane %v1230_v59, %v2700_v42  ;;  %v1606_v60 = vrot.slane %v1602_v57, %v2700_v42 }
 0x7da   : > { %1470 = vmatprep.subr.bf16.mxu0 %v2337_v2  ;;  %v1254_v2 = vrot.slane %v1234_v61, %v2700_v42 }
 0x7dd   : > { %1471 = vmatpush1.bf16.msra.mxu0 %v2335_v4 }
 0x7de   : > { %2126 = vmatprep.subr.bf16.mxu0 %v2339_v20 }
 0x84b   : > { %v1158_v35 = vpop.xlane.xlu1 %1157 }
 0x84c   : > { %v1159_v36 = vmul.f32 0.0078125, %v1158_v35  ;;  %v2354_v35 = vld [vmem:[%s3033_s11 + $0x58] sm:$0xff]  }
 0x84e   : > { %v1160_v37 = vsub.f32 %v2795_v24, %v1159_v36  ;;  %v2355_v36 = vld [vmem:[%s3033_s11 + $0xd8] sm:$0xff]  }
 0x850   : > { %v1161_v39 = vmul.f32 %v1160_v37, %v1160_v37 }
 0x852   : > { %v1162_v40 = vsel %vm465_vm0, %v1161_v39, 0.0  ;;  %v2357_v39 = vld [vmem:[%s3033_s11 + $0x98] sm:$0xff]  }
 0x853   : > { %1163 = vadd.xlane.f32.xlu1 %v1162_v40  ;;  %v2358_v40 = vld [vmem:[%s3033_s11 + $0x50] sm:$0xff]  }
 0x8dc   : > { %v1164_v6 = vpop.xlane.xlu1 %1163 }
 0x8dd   : > { %v1165_v7 = vmul.f32 0.0078125, %v1164_v6 }
 0x8df   : > { %v1166_v8 = vadd.f32 1e-06, %v1165_v7 }
 0x8e1   : > { %2380 = vrsqrt.f32 %v1166_v8 }
 0x8ee   : > { %v2381_v5 = vpop.eup %2380 }
 0x8ef   : > { %v1168_v14 = vmul.f32 %v2381_v5, %v1160_v37  ;;  %v2356_v37 = vld [vmem:[%s3033_s11 + $0x18] sm:$0xff]  }
 0x8f1   : > { %v1175_v15 = vmul.f32 %v1174_v13, %v1168_v14 }
 0x8f3   : > { %v1182_v17 = vadd.f32 %v1181_v16, %v1175_v15 }
 0x8f5   : > { %v1183_v18 = vpack.c.bf16 %v1182_v17, %v1182_v17 }
 0x8f7   : > { %1448 = vmatmul.mubr.bf16.vlgmr.msra.gmra.mxu1 %v1183_v18  ;;  %1489 = vmatmul.mubr.bf16.vlgmr.msra.gmra.mxu0 %v1183_v18 }
 0x8f8   : > { %2105 = vmatpush3.bf16.msra.mxu1 %v2340_v21  ;;  %2127 = vmatpush3.bf16.msra.mxu0 %v2341_v22 }
 0x8f9   : > { %2106 = vmatprep.subr.bf16.mxu1 %v2342_v23  ;;  %2128 = vmatprep.subr.bf16.mxu0 %v2343_v26 }
 0x8fc   : > { %2107 = vmatpush3.bf16.msra.mxu1 %v2344_v27  ;;  %2129 = vmatpush3.bf16.msra.mxu0 %v2345_v25 }
 0x8fd   : > { %2108 = vmatprep.subr.bf16.mxu1 %v2346_v28  ;;  %2130 = vmatprep.subr.bf16.mxu0 %v2347_v29 }
 0x900   : > { %2109 = vmatpush3.bf16.msra.mxu1 %v2348_v30  ;;  %2131 = vmatpush3.bf16.msra.mxu0 %v2349_v1 }
 0x901   : > { %2110 = vmatprep.subr.bf16.mxu1 %v2350_v31  ;;  %2132 = vmatprep.subr.bf16.mxu0 %v2351_v32 }
 0x904   : > { %2111 = vmatpush3.bf16.msra.mxu1 %v2352_v33  ;;  %2133 = vmatpush3.bf16.msra.mxu0 %v2353_v34 }
 0x905   : > { %2112 = vmatprep.subr.bf16.mxu1 %v2354_v35  ;;  %2134 = vmatprep.subr.bf16.mxu0 %v2355_v36 }
 0x908   : > { %2113 = vmatpush3.bf16.msra.mxu1 %v2356_v37  ;;  %2135 = vmatpush3.bf16.msra.mxu0 %v2357_v39 }
 0x909   : > { %2114 = vmatprep.subr.bf16.mxu1 %v2358_v40  ;;  %2136 = vmatprep.subr.bf16.mxu0 %v2359_v41 }
 0x90c   : > { %2115 = vmatpush3.bf16.msra.mxu1 %v2360_v43  ;;  %2137 = vmatpush3.bf16.msra.mxu0 %v2361_v44 }
 0x90d   : > { %2116 = vmatprep.subr.bf16.mxu1 %v2362_v45  ;;  %2138 = vmatprep.subr.bf16.mxu0 %v2363_v46 }
 0x910   : > { %2117 = vmatpush3.bf16.msra.mxu1 %v2364_v47  ;;  %2139 = vmatpush3.bf16.msra.mxu0 %v2365_v48 }
 0x911   : > { %2118 = vmatprep.subr.bf16.mxu1 %v2366_v49  ;;  %2140 = vmatprep.subr.bf16.mxu0 %v2367_v50 }
 0x914   : > { %2119 = vmatpush3.bf16.msra.mxu1 %v2368_v51  ;;  %2141 = vmatpush3.bf16.msra.mxu0 %v2369_v53 }
 0x9b7   : > { %v1449_v3 = vpop.f32.mrf.mxu1  ;;  %v1490_v4 = vpop.f32.mrf.mxu0 }
 0x9b8   : > { %v1450_v6 = vadd.f32 %v1449_v3, %v1242_v62  ;;  %v1491_v7 = vadd.f32 %v1490_v4, %v1250_v63 }
 0x9b9   : > { %v1451_v8 = vpop.f32.mrf.mxu1  ;;  %v1492_v9 = vpop.f32.mrf.mxu0 }
 0x9ba   : > { %v1497_v10 = vmul.f32 %v1450_v6, %v1450_v6  ;;  %v1499_v54 = vmul.f32 %v1491_v7, %v1491_v7  ;;  %v1452_v11 = vadd.f32 %v1451_v8, %v1246_v0  ;;  %v1493_v38 = vadd.f32 %v1492_v9, %v1254_v2 }
 0x9bb   : > { %v1453_v52 = vpop.f32.mrf.mxu1  ;;  %v1494_v12 = vpop.f32.mrf.mxu0 }
 0x9bc   : > { %v1501_v13 = vmul.f32 %v1497_v10, %v1450_v6  ;;  %v1503_v5 = vmul.f32 %v1499_v54, %v1491_v7  ;;  %v1498_v14 = vmul.f32 %v1452_v11, %v1452_v11  ;;  %v1500_v16 = vmul.f32 %v1493_v38, %v1493_v38  ;;  %v1884_v10 = vld [vmem:[%s461_s27] sm:$0x7] }
 0x9bd   : > { %v1454_v15 = vpop.f32.mrf.mxu1  ;;  %v1495_v17 = vpop.f32.mrf.mxu0 }
 0x9be   : > { %v1505_v18 = vmul.f32 0.044715, %v1501_v13  ;;  %v1507_v19 = vmul.f32 0.044715, %v1503_v5  ;;  %v1502_v20 = vmul.f32 %v1498_v14, %v1452_v11  ;;  %v1504_v21 = vmul.f32 %v1500_v16, %v1493_v38 }
 0x9c0   : > { %v1509_v22 = vadd.f32 %v1505_v18, %v1450_v6  ;;  %v1511_v23 = vadd.f32 %v1507_v19, %v1491_v7  ;;  %v1506_v26 = vmul.f32 0.044715, %v1502_v20  ;;  %v1508_v27 = vmul.f32 0.044715, %v1504_v21 }
 0x9c2   : > { %v1513_v25 = vmul.f32 0.7978846, %v1509_v22  ;;  %v1515_v28 = vmul.f32 0.7978846, %v1511_v23  ;;  %v1510_v29 = vadd.f32 %v1506_v26, %v1452_v11  ;;  %v1512_v30 = vadd.f32 %v1508_v27, %v1493_v38 }
 0x9c4   : > { %2382 = vtanh.f32 %v1513_v25  ;;  %v1514_v1 = vmul.f32 0.7978846, %v1510_v29  ;;  %v1516_v31 = vmul.f32 0.7978846, %v1512_v30 }
 0x9c5   : > { %2384 = vtanh.f32 %v1515_v28 }
 0x9c6   : > { %2386 = vtanh.f32 %v1514_v1 }
 0x9c7   : > { %2388 = vtanh.f32 %v1516_v31 }
 0x9d1   : > { %v2383_v32 = vpop.eup %2382 }
 0x9d2   : > { %v2385_v33 = vpop.eup %2384  ;;  %v1521_v34 = vadd.f32 1.0, %v2383_v32 }
 0x9d3   : > { %v2387_v35 = vpop.eup %2386  ;;  %v1523_v36 = vadd.f32 1.0, %v2385_v33 }
 0x9d4   : > { %v2389_v37 = vpop.eup %2388  ;;  %v1522_v39 = vadd.f32 1.0, %v2387_v35  ;;  %v1525_v40 = vmul.f32 0.5, %v1521_v34 }
 0x9d5   : > { %v1524_v41 = vadd.f32 1.0, %v2389_v37  ;;  %v1527_v43 = vmul.f32 0.5, %v1523_v36 }
 0x9d6   : > { %v1526_v44 = vmul.f32 0.5, %v1522_v39  ;;  %v1529_v46 = vmul.f32 %v1525_v40, %v1450_v6 }
 0x9d7   : > { %v1528_v45 = vmul.f32 0.5, %v1524_v41  ;;  %v1531_v48 = vmul.f32 %v1527_v43, %v1491_v7 }
 0x9d8   : > { %v1530_v47 = vmul.f32 %v1526_v44, %v1452_v11  ;;  %v1533_v53 = vpack.c.bf16 %v1529_v46, %v1529_v46 }
 0x9d9   : > { %v1532_v49 = vmul.f32 %v1528_v45, %v1493_v38  ;;  %v1535_v55 = vpack.c.bf16 %v1531_v48, %v1531_v48 }
 0x9da   : > { %v1534_v50 = vpack.c.bf16 %v1530_v47, %v1530_v47 }
 0x9db   : > { %v1536_v51 = vpack.c.bf16 %v1532_v49, %v1532_v49 }
 0x9dc   : > { %1831 = vmatprep.mubr.bf16.mxu1 %v1534_v50 }
 0x9dd   : > { %1871 = vmatprep.mubr.bf16.mxu0 %v1536_v51  ;;  %1832 = vmatmul.mubr.bf16.vlgmr.msra.gmra.mxu1 %v1533_v53 }
 0x9de   : > { %1872 = vmatmul.mubr.bf16.vlgmr.msra.gmra.mxu0 %v1535_v55 }
 0xa9d   : > { %v2120_v58 = vpop.f32.mrf.mxu1 }
 0xa9e   : > { %v2142_v59 = vpop.f32.mrf.mxu0 }
 0xa9f   : > { %v2121_v61 = vpop.f32.mrf.mxu1 }
 0xaa0   : > { %v2122_v62 = vadd.f32 %v2121_v61, %v2120_v58  ;;  %v2143_v63 = vpop.f32.mrf.mxu0 }
 0xaa1   : > { %v2123_v0 = vpop.f32.mrf.mxu1  ;;  %v2144_v3 = vadd.f32 %v2143_v63, %v2142_v59 }
 0xaa2   : > { %v1834_v2 = vadd.f32 %v2122_v62, %v1606_v60  ;;  %v2145_v4 = vpop.f32.mrf.mxu0 }
 0xaa3   : > { %v2124_v6 = vpop.f32.mrf.mxu1 }
 0xaa4   : > { %v1874_v7 = vadd.f32 %v2144_v3, %v1834_v2  ;;  %v2146_v8 = vpop.f32.mrf.mxu0 }
 0xaa6   : > { %v1879_v9 = vadd.f32 %v1874_v7, %v2795_v24 }
 0xaa8   : > { %v1880_v42 = vpack.c.bf16 %v1879_v9, %v1879_v9 }
 0xaaa   : > { %v1885_v54 = vsel %vm1883_vm8, %v1880_v42, %v1884_v10 }
 0xaab   : > { %1886 = vst [vmem:[%s461_s27] sm:$0x7] %v1885_v54 }
 0xaac PF: > { %s25_s25 = sadd.s32 1, %s2456_s25  }
 0xaad   : > { %p22_p3 = scmp.ge.s32.totalorder %s25_s25, 4  }
 0xaaf   :  { %24 = sbr.rel (!%p22_p3) target bundleno = 2 (0x2), region = 111 }
 0xab4   :  { %1906 = vsyncpa [#allocation3], 1 }
 0xab5   :  { %1908 = vsyncpa [#allocation3 + $0x1], 1 }
 0xab6   :  { %1909 = vsyncpa [#allocation5], 1 }

// kernel: vit_forward.7
= control target key start
LH: loop header
LB: loop body
LE: loop exit
PB: predicated region body
PF: predicated region fallthrough
CT: control target
= control target key end

     0   :  { %s2400_s25 = smov 0   ;;  %s2848_s0 = inlined_call_operand.vmem [shape: bf16[2,5,128], index: 0, kind: input, shape index: {}]   ;;  %s2849_s1 = inlined_call_operand.vmem [shape: bf16[1,128], index: 1, kind: input, shape index: {}]   ;;  %s2850_s2 = inlined_call_operand.vmem [shape: bf16[1,128], index: 2, kind: input, shape index: {}]   ;;  %s2851_s3 = inlined_call_operand.vmem [shape: bf16[128,384], index: 3, kind: input, shape index: {}]   ;;  %s2852_s4 = inlined_call_operand.vmem [shape: bf16[1,384], index: 4, kind: input, shape index: {}]   ;;  %s2853_s5 = inlined_call_operand.vmem [shape: bf16[128,128], index: 5, kind: input, shape index: {}]   ;;  %s2854_s6 = inlined_call_operand.vmem [shape: bf16[1,128], index: 6, kind: input, shape index: {}]   ;;  %s2855_s7 = inlined_call_operand.vmem [shape: bf16[1,128], index: 7, kind: input, shape index: {}]   ;;  %s2856_s8 = inlined_call_operand.vmem [shape: bf16[1,128], index: 8, kind: input, shape index: {}]   ;;  %s2857_s9 = inlined_call_operand.vmem [shape: bf16[128,512], index: 9, kind: input, shape index: {}]   ;;  %s2858_s10 = inlined_call_operand.vmem [shape: bf16[1,512], index: 10, kind: input, shape index: {}]   ;;  %s2859_s11 = inlined_call_operand.vmem [shape: bf16[512,128], index: 11, kind: input, shape index: {}]   ;;  %s2860_s12 = inlined_call_operand.vmem [shape: bf16[1,128], index: 12, kind: input, shape index: {}]   ;;  %s2861_s13 = inlined_call_operand.vmem [shape: bf16[2,5,128], index: 13, kind: output, shape index: {}]  }
   0x1 LB: > { %s1914_s26 = sadd.s32 4294967295, %s2323_s25   ;;  %p1918_p0 = scmp.ge.s32.totalorder %s2323_s25, 1  ;;  %s2323_s25 = sphi %s2400_s25, %s23_s25  }
   0x2   : > { %p386_p1 = scmp.lt.s32.totalorder %s2323_s25, 3 }
   0x4   : > { %p387_p2 = pnand %p1918_p0, %p386_p1 }
   0x5   : > { %p428_p3 = scmp.lt.s32.totalorder (!%p387_p2), %s1914_s26, 1  ;;  %s2328_s29 = smov (!%p387_p2), 64  }
   0x6   : > { %390 = sbr.rel (%p387_p2) target bundleno = 2699 (0xa8b), region = 72 }
   0xb   : > { %s2863_s26 = smov (!%p428_p3, %s1914_s26), 1  ;;  %vm439_vm0 = vcmask 1044480   ;;  %v2177_v3 = vld [vmem:[%s2851_s3 + $0xac] ss:$12 sps:$4 sm:$0xff]   ;;  %v2179_v4 = vld [vmem:[%s2851_s3 + $0xa8] ss:$12 sps:$4 sm:$0xff]   ;;  %v456_v37 = vlaneseq }
   0xc   : > { %s1919_s27 = sshll.u32 %s2863_s26, 2  ;;  %v2325_v5 = vmov 0.0   ;;  %v2180_v6 = vld [vmem:[%s2851_s3 + $0xb0] ss:$12 sps:$4 sm:$0xff]   ;;  %v2181_v7 = vld [vmem:[%s2851_s3 + $0x94] ss:$12 sps:$4 sm:$0xff]   ;;  %659 = vmatprep.subr.bf16.mxu0 %v2177_v3 }
   0xd   : > { %s431_s30 = scalar_lea.vmem %s2848_s0, %s1919_s27  ;;  %2096 = vmatprep.subr.bf16.mxu1 %v2325_v5  ;;  %v2183_v8 = vld [vmem:[%s2851_s3 + $0x90] ss:$12 sps:$4 sm:$0xff]   ;;  %v2184_v9 = vld [vmem:[%s2851_s3 + $0x98] ss:$12 sps:$4 sm:$0xff]   ;;  %660 = vmatpush1.bf16.msra.mxu0 %v2179_v4  ;;  %v2188_v17 = vld [vmem:[%s2851_s3 + $0x80] ss:$12 sps:$4 sm:$0xff]   ;;  %s435_s15 = scalar_lea.vmem %s2861_s13, %s1919_s27 }
   0xe   : > { %v437_v0 = vld [vmem:[%s431_s30] sm:$0x7]  ;;  %2097 = vmatpush3.bf16.msra.mxu1 %v2180_v6  ;;  %661 = vmatprep.subr.bf16.mxu0 %v2181_v7  ;;  %v2185_v15 = vld [vmem:[%s2851_s3 + $0x7c] ss:$12 sps:$4 sm:$0xff]   ;;  %v2187_v16 = vld [vmem:[%s2851_s3 + $0x78] ss:$12 sps:$4 sm:$0xff]  }
   0xf   : > { %v2416_v1 = vunpack.c.l.bf16 %v437_v0  ;;  %2098 = vmatprep.subr.bf16.mxu1 %v2325_v5  ;;  %v2189_v18 = vld [vmem:[%s2851_s3 + $0x64] ss:$12 sps:$4 sm:$0xff]   ;;  %v2191_v19 = vld [vmem:[%s2851_s3 + $0x60] ss:$12 sps:$4 sm:$0xff]   ;;  %v2192_v20 = vld [vmem:[%s2851_s3 + $0x68] ss:$12 sps:$4 sm:$0xff]  }
  0x10   : > { %v2193_v21 = vld [vmem:[%s2851_s3 + $0x4c] ss:$12 sps:$4 sm:$0xff]   ;;  %v2195_v22 = vld [vmem:[%s2851_s3 + $0x48] ss:$12 sps:$4 sm:$0xff]   ;;  %v2196_v23 = vld [vmem:[%s2851_s3 + $0x50] ss:$12 sps:$4 sm:$0xff]  }
  0x11   : > { %v440_v2 = vsel %vm439_vm0, %v2416_v1, 0.0  ;;  %662 = vmatpush1.bf16.msra.mxu0 %v2183_v8  ;;  %v2197_v24 = vld [vmem:[%s2851_s3 + $0x34] ss:$12 sps:$4 sm:$0xff]   ;;  %v2326_v25 = vmov 0   ;;  %vm2327_vm1 = vmmov 0   ;;  %v2511_v38 = vshrl.u32 %v456_v37, 7 }
  0x12   : > { %441 = vadd.xlane.f32.xlu0 %v440_v2  ;;  %2099 = vmatpush3.bf16.msra.mxu1 %v2184_v9  ;;  %v2199_v26 = vld [vmem:[%s2851_s3 + $0x30] ss:$12 sps:$4 sm:$0xff]   ;;  %v2200_v27 = vld [vmem:[%s2851_s3 + $0x38] ss:$12 sps:$4 sm:$0xff]   ;;  %v2204_v30 = vld [vmem:[%s2851_s3 + $0x20] ss:$12 sps:$4 sm:$0xff]  }
  0x13   : > { %2100 = vmatprep.subr.bf16.mxu1 %v2325_v5  ;;  %663 = vmatprep.subr.bf16.mxu0 %v2185_v15  ;;  %v2201_v28 = vld [vmem:[%s2851_s3 + $0x1c] ss:$12 sps:$4 sm:$0xff]   ;;  %v2203_v29 = vld [vmem:[%s2851_s3 + $0x18] ss:$12 sps:$4 sm:$0xff]   ;;  %v2207_v32 = vld [vmem:[%s2851_s3] ss:$12 sps:$4 sm:$0xff]  }
  0x14   : > { %691 = vmatprep.mubr.bf16.mxu0 %v2326_v25  ;;  %2112 = vmatprep.mubr.msk.bf16.mxu1 %vm2327_vm1, %v2325_v5  ;;  %v2205_v31 = vld [vmem:[%s2851_s3 + $0x4] ss:$12 sps:$4 sm:$0xff]   ;;  %v2208_v33 = vld [vmem:[%s2851_s3 + $0x8] ss:$12 sps:$4 sm:$0xff]   ;;  %v454_v39 = vld [vmem:[%s2849_s1] sm:$0x1] }
  0x15   : > { %664 = vmatpush1.bf16.msra.mxu0 %v2187_v16  ;;  %v461_v40 = vld [vmem:[%s2850_s2] sm:$0x1]  ;;  %v455_v41 = vunpack.c.l.bf16 %v454_v39  ;;  %v2520_v42 = vsub.s32 0, %v2511_v38  ;;  %v510_v52 = vsub.s32 2, %v2511_v38  ;;  %v514_v54 = vsub.s32 4, %v2511_v38 }
  0x16   : > { %2101 = vmatpush3.bf16.msra.mxu1 %v2188_v17  ;;  %665 = vmatprep.subr.bf16.mxu0 %v2189_v18  ;;  %v462_v43 = vunpack.c.l.bf16 %v461_v40  ;;  %v501_v51 = vld [vmem:[%s2852_s4] sm:$0x7]  ;;  %vm745_vm2 = vcmask 523264   ;;  %vm810_vm3 = vcmask 1041408   ;;  %vm811_vm4 = vcmask 1042432  }
  0x17   : > { %2102 = vmatprep.subr.bf16.mxu1 %v2325_v5  ;;  %v459_v44 = vrot.slane %v455_v41, %v2520_v42  ;;  %v502_v53 = vunpack.c.l.bf16 %v501_v51  ;;  %vm793_vm5 = vcmask 36864   ;;  %vm806_vm6 = vcmask 39936   ;;  %v2212_v41 = vld [vmem:[%s2853_s5] sm:$0xff]  }
  0x18   : > { %v466_v47 = vrot.slane %v462_v43, %v2520_v42  ;;  %vm1856_vm7 = vsmask.f32 2304 }
  0x19   : > { %666 = vmatpush1.bf16.msra.mxu0 %v2191_v19  ;;  %v511_v55 = vrot.slane %v502_v53, %v510_v52  ;;  %v515_v56 = vrot.slane %v502_v53, %v514_v54  ;;  %v507_v60 = vrot.slane %v502_v53, %v2520_v42  ;;  %vm1857_vm8 = vmand %vm811_vm4, %vm1856_vm7 }
  0x1a   : > { %2103 = vmatpush3.bf16.msra.mxu1 %v2192_v20  ;;  %667 = vmatprep.subr.bf16.mxu0 %v2193_v21 }
  0x1b   : > { %2104 = vmatprep.subr.bf16.mxu1 %v2325_v5  ;;  %v526_v57 = vrot.slane %v511_v55, %v2520_v42  ;;  %v530_v61 = vrot.slane %v515_v56, %v2520_v42  ;;  %v522_v4 = vrot.slane %v507_v60, %v2520_v42 }
  0x1d   : > { %668 = vmatpush1.bf16.msra.mxu0 %v2195_v22 }
  0x1e   : > { %2105 = vmatpush3.bf16.msra.mxu1 %v2196_v23  ;;  %669 = vmatprep.subr.bf16.mxu0 %v2197_v24 }
  0x1f   : > { %2106 = vmatprep.subr.bf16.mxu1 %v2325_v5 }
  0x21   : > { %670 = vmatpush1.bf16.msra.mxu0 %v2199_v26 }
  0x22   : > { %2107 = vmatpush3.bf16.msra.mxu1 %v2200_v27  ;;  %671 = vmatprep.subr.bf16.mxu0 %v2201_v28 }
  0x23   : > { %2108 = vmatprep.subr.bf16.mxu1 %v2325_v5 }
  0x25   : > { %672 = vmatpush1.bf16.msra.mxu0 %v2203_v29 }
  0x26   : > { %2109 = vmatpush3.bf16.msra.mxu1 %v2204_v30  ;;  %673 = vmatprep.subr.bf16.mxu0 %v2205_v31  ;;  %v2209_v30 = vld [vmem:[%s2853_s5 + $0x18] sm:$0xff]   ;;  %v2210_v31 = vld [vmem:[%s2853_s5 + $0x10] sm:$0xff]  }
  0x27   : > { %2110 = vmatprep.subr.bf16.mxu1 %v2325_v5 }
  0x29   : > { %674 = vmatpush1.bf16.msra.mxu0 %v2207_v32  ;;  %v2211_v32 = vld [vmem:[%s2853_s5 + $0x8] sm:$0xff]  }
  0x2a   : > { %2111 = vmatpush3.bf16.msra.mxu1 %v2208_v33  ;;  %2128 = vmatprep.subr.bf16.mxu0 %v2325_v5 }
  0x2b   : > { %2116 = vmatprep.subr.bf16.mxu1 %v2325_v5 }
  0x9b   : > { %v442_v10 = vpop.xlane.xlu0 %441 }
  0x9c   : > { %v444_v11 = vmul.f32 0.0078125, %v442_v10 }
  0x9e   : > { %v2442_v12 = vsub.f32 %v2416_v1, %v444_v11  ;;  %v2329_v11 = vmov 65535  }
  0xa0   : > { %v446_v13 = vmul.f32 %v2442_v12, %v2442_v12 }
  0xa2   : > { %v447_v14 = vsel %vm439_vm0, %v446_v13, 0.0 }
  0xa3   : > { %448 = vadd.xlane.f32.xlu0 %v447_v14 }
 0x12c   : > { %v449_v34 = vpop.xlane.xlu0 %448 }
 0x12d   : > { %v450_v35 = vmul.f32 0.0078125, %v449_v34 }
 0x12f   : > { %v451_v36 = vadd.f32 1e-06, %v450_v35 }
 0x131   : > { %2297 = vrsqrt.f32 %v451_v36 }
 0x13e   : > { %v2298_v45 = vpop.eup %2297 }
 0x13f   : > { %v453_v46 = vmul.f32 %v2298_v45, %v2442_v12  ;;  %v812_v12 = vsel %vm810_vm3, 4294967295, %v2329_v11 }
 0x140   : > { %v2548_v15 = vsel %vm811_vm4, %v812_v12, 0  ;;  %v2216_v12 = vld [vmem:[%s2853_s5 + $0x20] sm:$0xff]  }
 0x141   : > { %v460_v48 = vmul.f32 %v459_v44, %v453_v46 }
 0x143   : > { %v467_v49 = vadd.f32 %v466_v47, %v460_v48 }
 0x145   : > { %v468_v50 = vpack.c.bf16 %v467_v49, %v467_v49 }
 0x147   : > { %692 = vmatmul.mubr.bf16.vlgmr.msra.gmra.mxu0 %v468_v50  ;;  %2113 = vmatmul.mubr.bf16.vlgmr.msra.gmra.mxu1 %v468_v50 }
 0x148   : > { %2118 = vmatprep.mubr.msk.bf16.mxu1 %vm2327_vm1, %v2325_v5  ;;  %2136 = vmatprep.mubr.msk.bf16.mxu0 %vm2327_vm1, %v2325_v5 }
 0x149   : > { %2129 = vmatpush3.bf16.msra.mxu0 %v2209_v30  ;;  %v2220_v30 = vld [vmem:[%s2857_s9 + $0xe8] ss:$16 sps:$4 sm:$0xff]  }
 0x14a   : > { %2130 = vmatprep.subr.bf16.mxu0 %v2325_v5 }
 0x14d   : > { %2131 = vmatpush3.bf16.msra.mxu0 %v2210_v31  ;;  %v2225_v31 = vld [vmem:[%s2857_s9 + $0xc4] ss:$16 sps:$4 sm:$0xff]  }
 0x14e   : > { %2132 = vmatprep.subr.bf16.mxu0 %v2325_v5 }
 0x151   : > { %2133 = vmatpush3.bf16.msra.mxu0 %v2211_v32  ;;  %v2228_v32 = vld [vmem:[%s2857_s9 + $0xcc] ss:$16 sps:$4 sm:$0xff]  }
 0x152   : > { %2134 = vmatprep.subr.bf16.mxu0 %v2325_v5 }
 0x155   : > { %2135 = vmatpush3.bf16.msra.mxu0 %v2212_v41  ;;  %v2231_v41 = vld [vmem:[%s2857_s9 + $0xa4] ss:$16 sps:$4 sm:$0xff]  }
 0x156   : > { %2152 = vmatprep.subr.bf16.mxu0 %v2325_v5 }
 0x207   : > { %v693_v58 = vpop.f32.mrf.mxu0  ;;  %v734_v59 = vpop.f32.mrf.mxu1 }
 0x208   : > { %v735_v7 = vadd.f32 %v734_v59, %v530_v61  ;;  %v694_v13 = vadd.f32 %v693_v58, %v522_v4  ;;  %v2215_v4 = vld [vmem:[%s2853_s5 + $0x28] sm:$0xff]  }
 0x209   : > { %v695_v62 = vpop.f32.mrf.mxu0  ;;  %v2114_v63 = vpop.f32.mrf.mxu1 }
 0x20a   : > { %v696_v0 = vadd.f32 %v695_v62, %v526_v57  ;;  %v2545_v14 = vpack.c.bf16 %v735_v7, %v735_v7  ;;  %v740_v16 = vpack.c.bf16 %v694_v13, %v694_v13  ;;  %v2213_v63 = vld [vmem:[%s2853_s5 + $0x38] sm:$0xff]  }
 0x20b   : > { %v697_v2 = vpop.f32.mrf.mxu0  ;;  %v737_v3 = vpop.f32.mrf.mxu1 }
 0x20c   : > { %v741_v6 = vpack.c.bf16 %v696_v0, %v696_v0  ;;  %v815_v17 = vand.u32 %v2548_v15, %v2545_v14  ;;  %v2214_v2 = vld [vmem:[%s2853_s5 + $0x30] sm:$0xff]  }
 0x20d   : > { %v698_v8 = vpop.f32.mrf.mxu0  ;;  %v2115_v9 = vpop.f32.mrf.mxu1 }
 0x20e   : > { %v750_v10 = vsel %vm745_vm2, %v741_v6, 0  ;;  %942 = vrot.lane.b32.xlu0 %v741_v6, %s2328_s29 }
 0x20f   : > { %2117 = vmatpush3.bf16.xpose.msra.mxu1 %v750_v10 }
 0x210   : > { %2122 = vmatprep.subr.bf16.mxu1 %v2325_v5 }
 0x216   : > { %2119 = vmatmul.mubr.msk.bf16.vlgmr.msra.gmra.mxu1 %vm745_vm2, %v740_v16 }
 0x217   : > { %2123 = vmatpush3.bf16.msra.mxu1 %v815_v17  ;;  %2124 = vmatprep.mubr.msk.bf16.mxu1 %vm2327_vm1, %v2325_v5  ;;  %v743_v17 = vld [vmem:[%s2854_s6] sm:$0x1] }
 0x218   : > { %2140 = vmatprep.subr.bf16.mxu1 %v2325_v5 }
 0x280   : > { %v943_v36 = vpop.permute.xlu0 %942 }
 0x281   : > { %v948_v39 = vsel %vm745_vm2, %v943_v36, 0 }
 0x2d6   : > { %v786_v18 = vpop.f32.mrf.mxu1 }
 0x2d7   : > { %v792_v19 = vmul.f32 0.125, %v786_v18  ;;  %v744_v18 = vunpack.c.l.bf16 %v743_v17 }
 0x2d8   : > { %v2120_v20 = vpop.f32.mrf.mxu1 }
 0x2d9   : > { %v794_v21 = vsel %vm793_vm5, %v792_v19, -inf }
 0x2da   : > { %795 = vmax.xlane.f32.xlu1 %v794_v21  ;;  %v789_v22 = vpop.f32.mrf.mxu1 }
 0x2dc   : > { %v2121_v23 = vpop.f32.mrf.mxu1 }
 0x363   : > { %v796_v24 = vpop.xlane.xlu1 %795 }
 0x364   : > { %v797_v26 = vsub.f32 %v792_v19, %v796_v24  ;;  %v936_v19 = vrot.slane %v744_v18, %v2520_v42 }
 0x366   : > { %v798_v27 = vmul.f32 1.442695, %v797_v26 }
 0x368   : > { %2299 = vpow2.f32 %v798_v27 }
 0x375   : > { %v2300_v28 = vpop.eup %2299 }
 0x376   : > { %v800_v29 = vsel %vm793_vm5, %v2300_v28, 0.0 }
 0x377   : > { %801 = vadd.xlane.f32.xlu1 %v800_v29  ;;  %v2219_v29 = vld [vmem:[%s2857_s9 + $0xe4] ss:$16 sps:$4 sm:$0xff]  }
 0x388   : > { %939 = vrot.lane.b32.xlu1 %v740_v16, %s2328_s29 }
 0x400   : > { %v802_v33 = vpop.xlane.xlu1 %801 }
 0x401   : > { %2301 = vrcp.f32 %v802_v33  ;;  %v2223_v33 = vld [vmem:[%s2857_s9 + $0xc0] ss:$16 sps:$4 sm:$0xff]  }
 0x404   : > { %v940_v40 = vpop.permute.xlu1 %939 }
 0x40e   : > { %v2302_v34 = vpop.eup %2301 }
 0x40f   : > { %v804_v35 = vmul.f32 %v2302_v34, %v2300_v28  ;;  %v2217_v28 = vld [vmem:[%s2857_s9 + $0xe0] ss:$16 sps:$4 sm:$0xff]   ;;  %v2226_v34 = vld [vmem:[%s2857_s9 + $0xc8] ss:$16 sps:$4 sm:$0xff]  }
 0x411   : > { %v805_v37 = vpack.c.bf16 %v804_v35, %v804_v35 }
 0x413   : > { %2125 = vmatmul.mubr.msk.bf16.vlgmr.msra.gmra.mxu1 %vm806_vm6, %v805_v37 }
 0x414   : > { %2141 = vmatpush3.bf16.xpose.msra.mxu1 %v948_v39  ;;  %2142 = vmatprep.mubr.msk.bf16.mxu1 %vm2327_vm1, %v2325_v5 }
 0x415   : > { %2146 = vmatprep.subr.bf16.mxu1 %v2325_v5 }
 0x41b   : > { %2143 = vmatmul.mubr.msk.bf16.vlgmr.msra.gmra.mxu1 %vm745_vm2, %v940_v40 }
 0x41c   : > { %2148 = vmatprep.mubr.msk.bf16.mxu1 %vm2327_vm1, %v2325_v5 }
 0x4d3   : > { %v851_v43 = vpop.f32.mrf.mxu1 }
 0x4d4   : > { %v857_v44 = vpack.c.bf16 %v851_v43, %v851_v43  ;;  %v2234_v43 = vld [vmem:[%s2857_s9 + $0xac] ss:$16 sps:$4 sm:$0xff]  }
 0x4d5   : > { %v2126_v45 = vpop.f32.mrf.mxu1 }
 0x4d6   : > { %2137 = vmatmul.mubr.msk.bf16.vlgmr.msra.gmra.mxu0 %vm745_vm2, %v857_v44  ;;  %v2229_v44 = vld [vmem:[%s2857_s9 + $0xa0] ss:$16 sps:$4 sm:$0xff]   ;;  %v2232_v45 = vld [vmem:[%s2857_s9 + $0xa8] ss:$16 sps:$4 sm:$0xff]  }
 0x4d7   : > { %v854_v46 = vpop.f32.mrf.mxu1  ;;  %2160 = vmatprep.mubr.msk.bf16.mxu0 %vm2327_vm1, %v2325_v5  ;;  %2153 = vmatpush3.bf16.msra.mxu0 %v2213_v63  ;;  %v2256_v63 = vld [vmem:[%s2857_s9 + $0x28] ss:$16 sps:$4 sm:$0xff]  }
 0x4d8   : > { %2154 = vmatprep.subr.bf16.mxu0 %v2325_v5  ;;  %v2235_v46 = vld [vmem:[%s2857_s9 + $0x80] ss:$16 sps:$4 sm:$0xff]  }
 0x4d9   : > { %v2127_v47 = vpop.f32.mrf.mxu1 }
 0x4da   : > { %v2237_v47 = vld [vmem:[%s2857_s9 + $0x84] ss:$16 sps:$4 sm:$0xff]  }
 0x4db   : > { %v984_v48 = vpop.f32.mrf.mxu1  ;;  %2155 = vmatpush3.bf16.msra.mxu0 %v2214_v2  ;;  %v2264_v2 = vld [vmem:[%s2857_s9 + $0xc] ss:$16 sps:$4 sm:$0xff]  }
 0x4dc   : > { %v990_v49 = vmul.f32 0.125, %v984_v48  ;;  %2156 = vmatprep.subr.bf16.mxu0 %v2325_v5  ;;  %v2238_v48 = vld [vmem:[%s2857_s9 + $0x88] ss:$16 sps:$4 sm:$0xff]  }
 0x4dd   : > { %v2144_v50 = vpop.f32.mrf.mxu1 }
 0x4de   : > { %v991_v51 = vsel %vm793_vm5, %v990_v49, -inf  ;;  %v2243_v50 = vld [vmem:[%s2857_s9 + $0x64] ss:$16 sps:$4 sm:$0xff]  }
 0x4df   : > { %992 = vmax.xlane.f32.xlu1 %v991_v51  ;;  %v987_v53 = vpop.f32.mrf.mxu1  ;;  %2157 = vmatpush3.bf16.msra.mxu0 %v2215_v4  ;;  %v2246_v51 = vld [vmem:[%s2857_s9 + $0x6c] ss:$16 sps:$4 sm:$0xff]   ;;  %v2262_v4 = vld [vmem:[%s2857_s9 + $0x8] ss:$16 sps:$4 sm:$0xff]  }
 0x4e0   : > { %2158 = vmatprep.subr.bf16.mxu0 %v2325_v5  ;;  %v2241_v53 = vld [vmem:[%s2857_s9 + $0x60] ss:$16 sps:$4 sm:$0xff]  }
 0x4e1   : > { %v2145_v55 = vpop.f32.mrf.mxu1 }
 0x4e2   : > { %v2244_v55 = vld [vmem:[%s2857_s9 + $0x68] ss:$16 sps:$4 sm:$0xff]  }
 0x4e3   : > { %2159 = vmatpush3.bf16.msra.mxu0 %v2216_v12 }
 0x568   : > { %v993_v56 = vpop.xlane.xlu1 %992 }
 0x569   : > { %v994_v57 = vsub.f32 %v990_v49, %v993_v56  ;;  %v2240_v49 = vld [vmem:[%s2857_s9 + $0x8c] ss:$16 sps:$4 sm:$0xff]   ;;  %v2249_v56 = vld [vmem:[%s2857_s9 + $0x44] ss:$16 sps:$4 sm:$0xff]  }
 0x56b   : > { %v995_v58 = vmul.f32 1.442695, %v994_v57  ;;  %v2252_v57 = vld [vmem:[%s2857_s9 + $0x4c] ss:$16 sps:$4 sm:$0xff]  }
 0x56d   : > { %2303 = vpow2.f32 %v995_v58  ;;  %v2247_v58 = vld [vmem:[%s2857_s9 + $0x40] ss:$16 sps:$4 sm:$0xff]  }
 0x57a   : > { %v2304_v59 = vpop.eup %2303 }
 0x57b   : > { %v997_v60 = vsel %vm793_vm5, %v2304_v59, 0.0 }
 0x57c   : > { %998 = vadd.xlane.f32.xlu0 %v997_v60  ;;  %v2255_v60 = vld [vmem:[%s2857_s9 + $0x24] ss:$16 sps:$4 sm:$0xff]  }
 0x592   : > { %1004 = vrot.lane.b32.xlu0 %v2545_v14, %s2328_s29 }
 0x596   : > { %v927_v61 = vpop.f32.mrf.mxu0 }
 0x597   : > { %v937_v20 = vadd.f32 %v936_v19, %v927_v61  ;;  %v2258_v61 = vld [vmem:[%s2857_s9 + $0x2c] ss:$16 sps:$4 sm:$0xff]  }
 0x598   : > { %v2138_v62 = vpop.f32.mrf.mxu0  ;;  %v2265_v19 = vld [vmem:[%s2859_s11 + $0x78] sm:$0xff]  }
 0x599   : > { %v2253_v62 = vld [vmem:[%s2857_s9 + $0x20] ss:$16 sps:$4 sm:$0xff]  }
 0x59a   : > { %v930_v0 = vpop.f32.mrf.mxu0 }
 0x59b   : > { %v2261_v0 = vld [vmem:[%s2857_s9 + $0x4] ss:$16 sps:$4 sm:$0xff]  }
 0x59c   : > { %v2139_v3 = vpop.f32.mrf.mxu0 }
 0x59d   : > { %v2259_v3 = vld [vmem:[%s2857_s9] ss:$16 sps:$4 sm:$0xff]  }
 0x605   : > { %v999_v6 = vpop.xlane.xlu0 %998 }
 0x606   : > { %2305 = vrcp.f32 %v999_v6 }
 0x609   : > { %v1005_v7 = vpop.permute.xlu0 %1004 }
 0x60a   : > { %v1010_v8 = vand.u32 %v1005_v7, %v2548_v15 }
 0x60c   : > { %2147 = vmatpush3.bf16.msra.mxu1 %v1010_v8 }
 0x60d   : > { %1389 = vmatprep.subr.bf16.mxu1 %v2219_v29  ;;  %v2274_v29 = vld [vmem:[%s2859_s11 + $0xe8] sm:$0xff]  }
 0x613   : > { %v2306_v9 = vpop.eup %2305 }
 0x614   : > { %v1001_v10 = vmul.f32 %v2306_v9, %v2304_v59  ;;  %v2250_v59 = vld [vmem:[%s2857_s9 + $0x48] ss:$16 sps:$4 sm:$0xff]   ;;  %v1143_v9 = vld [vmem:[%s2855_s7] sm:$0x1] }
 0x616   : > { %v1002_v11 = vpack.c.bf16 %v1001_v10, %v1001_v10  ;;  %v1150_v10 = vld [vmem:[%s2856_s8] sm:$0x1] }
 0x617   : > { %v1151_v12 = vunpack.c.l.bf16 %v1150_v10 }
 0x618   : > { %2149 = vmatmul.mubr.msk.bf16.vlgmr.msra.gmra.mxu1 %vm806_vm6, %v1002_v11  ;;  %v1144_v11 = vunpack.c.l.bf16 %v1143_v9 }
 0x619   : > { %1421 = vmatprep.mubr.bf16.mxu1 %v2326_v25  ;;  %1390 = vmatpush1.bf16.msra.mxu1 %v2217_v28  ;;  %v2273_v28 = vld [vmem:[%s2859_s11 + $0x68] sm:$0xff]  }
 0x61a   : > { %1391 = vmatprep.subr.bf16.mxu1 %v2225_v31  ;;  %v2277_v31 = vld [vmem:[%s2859_s11 + $0x60] sm:$0xff]  }
 0x61d   : > { %1392 = vmatpush1.bf16.msra.mxu1 %v2223_v33  ;;  %v2279_v33 = vld [vmem:[%s2859_s11 + $0x20] sm:$0xff]  }
 0x61e   : > { %1393 = vmatprep.subr.bf16.mxu1 %v2231_v41  ;;  %v2286_v41 = vld [vmem:[%s2859_s11 + $0xd0] sm:$0xff]  }
 0x621   : > { %1394 = vmatpush1.bf16.msra.mxu1 %v2229_v44  ;;  %v2288_v44 = vld [vmem:[%s2859_s11 + $0x90] sm:$0xff]  }
 0x622   : > { %1395 = vmatprep.subr.bf16.mxu1 %v2237_v47  ;;  %v2291_v47 = vld [vmem:[%s2859_s11 + $0x8] sm:$0xff]  }
 0x625   : > { %1396 = vmatpush1.bf16.msra.mxu1 %v2235_v46  ;;  %v2290_v46 = vld [vmem:[%s2859_s11 + $0xc8] sm:$0xff]  }
 0x626   : > { %1397 = vmatprep.subr.bf16.mxu1 %v2243_v50  ;;  %v2294_v50 = vld [vmem:[%s2859_s11 + $0xc0] sm:$0xff]  }
 0x629   : > { %1398 = vmatpush1.bf16.msra.mxu1 %v2241_v53  ;;  %v2296_v53 = vld [vmem:[%s2859_s11 + $0x80] sm:$0xff]  }
 0x62a   : > { %1399 = vmatprep.subr.bf16.mxu1 %v2249_v56 }
 0x62d   : > { %1400 = vmatpush1.bf16.msra.mxu1 %v2247_v58 }
 0x62e   : > { %1401 = vmatprep.subr.bf16.mxu1 %v2255_v60 }
 0x631   : > { %1402 = vmatpush1.bf16.msra.mxu1 %v2253_v62 }
 0x632   : > { %1403 = vmatprep.subr.bf16.mxu1 %v2261_v0 }
 0x635   : > { %1404 = vmatpush1.bf16.msra.mxu1 %v2259_v3 }
 0x636   : > { %2052 = vmatprep.subr.bf16.mxu1 %v2265_v19 }
 0x6d8   : > { %v1046_v13 = vpop.f32.mrf.mxu1 }
 0x6d9   : > { %v1052_v5 = vpack.c.bf16 %v1046_v13, %v1046_v13  ;;  %v1148_v13 = vrot.slane %v1144_v11, %v2520_v42 }
 0x6da   : > { %v2150_v14 = vpop.f32.mrf.mxu1 }
 0x6db   : > { %2161 = vmatmul.mubr.msk.bf16.vlgmr.msra.gmra.mxu0 %vm745_vm2, %v1052_v5 }
 0x6dc   : > { %v1049_v16 = vpop.f32.mrf.mxu1  ;;  %1462 = vmatprep.mubr.bf16.mxu0 %v2326_v25 }
 0x6dd   : > { %v1155_v16 = vrot.slane %v1151_v12, %v2520_v42 }
 0x6de   : > { %v2151_v15 = vpop.f32.mrf.mxu1 }
 0x79b   : > { %v1122_v21 = vpop.f32.mrf.mxu0 }
 0x79c   : > { %v1128_v22 = vadd.f32 %v1122_v21, %v937_v20  ;;  %v2266_v20 = vld [vmem:[%s2859_s11 + $0xf8] sm:$0xff]  }
 0x79d   : > { %v2162_v23 = vpop.f32.mrf.mxu0  ;;  %v2267_v21 = vld [vmem:[%s2859_s11 + $0x38] sm:$0xff]  }
 0x79e   : > { %v2615_v24 = vadd.f32 %v1128_v22, %v2416_v1  ;;  %v2222_v1 = vld [vmem:[%s2857_s9 + $0xec] ss:$16 sps:$4 sm:$0xff]   ;;  %v2269_v23 = vld [vmem:[%s2859_s11 + $0x70] sm:$0xff]  }
 0x79f   : > { %v1125_v26 = vpop.f32.mrf.mxu0  ;;  %1430 = vmatprep.subr.bf16.mxu0 %v2222_v1  ;;  %v2268_v22 = vld [vmem:[%s2859_s11 + $0xb8] sm:$0xff]   ;;  %v2276_v1 = vld [vmem:[%s2859_s11 + $0xa8] sm:$0xff]  }
 0x7a0   : > { %v1130_v27 = vsel %vm439_vm0, %v2615_v24, 0.0  ;;  %1431 = vmatpush1.bf16.msra.mxu0 %v2220_v30  ;;  %v2270_v26 = vld [vmem:[%s2859_s11 + $0xf0] sm:$0xff]   ;;  %v2275_v30 = vld [vmem:[%s2859_s11 + $0x28] sm:$0xff]  }
 0x7a1   : > { %1131 = vadd.xlane.f32.xlu1 %v1130_v27  ;;  %v2163_v25 = vpop.f32.mrf.mxu0  ;;  %1432 = vmatprep.subr.bf16.mxu0 %v2228_v32  ;;  %v2271_v27 = vld [vmem:[%s2859_s11 + $0x30] sm:$0xff]   ;;  %v2278_v32 = vld [vmem:[%s2859_s11 + $0xe0] sm:$0xff]  }
 0x7a2   : > { %v2272_v25 = vld [vmem:[%s2859_s11 + $0xb0] sm:$0xff]  }
 0x7a4   : > { %1433 = vmatpush1.bf16.msra.mxu0 %v2226_v34  ;;  %v2280_v34 = vld [vmem:[%s2859_s11 + $0xa0] sm:$0xff]  }
 0x7a5   : > { %1434 = vmatprep.subr.bf16.mxu0 %v2234_v43  ;;  %v2287_v43 = vld [vmem:[%s2859_s11 + $0x10] sm:$0xff]  }
 0x7a8   : > { %1435 = vmatpush1.bf16.msra.mxu0 %v2232_v45  ;;  %v2289_v45 = vld [vmem:[%s2859_s11 + $0x48] sm:$0xff]  }
 0x7a9   : > { %1436 = vmatprep.subr.bf16.mxu0 %v2240_v49  ;;  %v2293_v49 = vld [vmem:[%s2859_s11 + $0x40] sm:$0xff]  }
 0x7ac   : > { %1437 = vmatpush1.bf16.msra.mxu0 %v2238_v48  ;;  %v2292_v48 = vld [vmem:[%s2859_s11 + $0x88] sm:$0xff]  }
 0x7ad   : > { %1438 = vmatprep.subr.bf16.mxu0 %v2246_v51  ;;  %v2295_v51 = vld [vmem:[%s2859_s11] sm:$0xff]  }
 0x7b0   : > { %1439 = vmatpush1.bf16.msra.mxu0 %v2244_v55  ;;  %v1190_v55 = vld [vmem:[%s2858_s10] sm:$0xf] }
 0x7b1   : > { %1440 = vmatprep.subr.bf16.mxu0 %v2252_v57  ;;  %v1191_v56 = vunpack.c.l.bf16 %v1190_v55  ;;  %v1207_v57 = vsub.s32 6, %v2511_v38 }
 0x7b3   : > { %v1196_v58 = vrot.slane %v1191_v56, %v2520_v42  ;;  %v1200_v60 = vrot.slane %v1191_v56, %v510_v52 }
 0x7b4   : > { %1441 = vmatpush1.bf16.msra.mxu0 %v2250_v59  ;;  %v1204_v59 = vrot.slane %v1191_v56, %v514_v54 }
 0x7b5   : > { %1442 = vmatprep.subr.bf16.mxu0 %v2258_v61  ;;  %v1208_v61 = vrot.slane %v1191_v56, %v1207_v57  ;;  %v1216_v62 = vrot.slane %v1196_v58, %v2520_v42  ;;  %v1220_v0 = vrot.slane %v1200_v60, %v2520_v42  ;;  %v1575_v56 = vld [vmem:[%s2860_s12] sm:$0x1] }
 0x7b6   : > { %v1576_v57 = vunpack.c.l.bf16 %v1575_v56 }
 0x7b8   : > { %1443 = vmatpush1.bf16.msra.mxu0 %v2256_v63  ;;  %v1224_v63 = vrot.slane %v1204_v59, %v2520_v42  ;;  %v1580_v60 = vrot.slane %v1576_v57, %v2520_v42 }
 0x7b9   : > { %1444 = vmatprep.subr.bf16.mxu0 %v2264_v2  ;;  %v1228_v2 = vrot.slane %v1208_v61, %v2520_v42 }
 0x7bc   : > { %1445 = vmatpush1.bf16.msra.mxu0 %v2262_v4 }
 0x7bd   : > { %2074 = vmatprep.subr.bf16.mxu0 %v2266_v20 }
 0x82a   : > { %v1132_v35 = vpop.xlane.xlu1 %1131 }
 0x82b   : > { %v1133_v36 = vmul.f32 0.0078125, %v1132_v35  ;;  %v2281_v35 = vld [vmem:[%s2859_s11 + $0x58] sm:$0xff]  }
 0x82d   : > { %v1134_v37 = vsub.f32 %v2615_v24, %v1133_v36  ;;  %v2282_v36 = vld [vmem:[%s2859_s11 + $0xd8] sm:$0xff]  }
 0x82f   : > { %v1135_v39 = vmul.f32 %v1134_v37, %v1134_v37 }
 0x831   : > { %v1136_v40 = vsel %vm439_vm0, %v1135_v39, 0.0  ;;  %v2284_v39 = vld [vmem:[%s2859_s11 + $0x98] sm:$0xff]  }
 0x832   : > { %1137 = vadd.xlane.f32.xlu1 %v1136_v40  ;;  %v2285_v40 = vld [vmem:[%s2859_s11 + $0x50] sm:$0xff]  }
 0x8bb   : > { %v1138_v6 = vpop.xlane.xlu1 %1137 }
 0x8bc   : > { %v1139_v7 = vmul.f32 0.0078125, %v1138_v6 }
 0x8be   : > { %v1140_v8 = vadd.f32 1e-06, %v1139_v7 }
 0x8c0   : > { %2307 = vrsqrt.f32 %v1140_v8 }
 0x8cd   : > { %v2308_v5 = vpop.eup %2307 }
 0x8ce   : > { %v1142_v14 = vmul.f32 %v2308_v5, %v1134_v37  ;;  %v2283_v37 = vld [vmem:[%s2859_s11 + $0x18] sm:$0xff]  }
 0x8d0   : > { %v1149_v15 = vmul.f32 %v1148_v13, %v1142_v14 }
 0x8d2   : > { %v1156_v17 = vadd.f32 %v1155_v16, %v1149_v15 }
 0x8d4   : > { %v1157_v18 = vpack.c.bf16 %v1156_v17, %v1156_v17 }
 0x8d6   : > { %1422 = vmatmul.mubr.bf16.vlgmr.msra.gmra.mxu1 %v1157_v18  ;;  %1463 = vmatmul.mubr.bf16.vlgmr.msra.gmra.mxu0 %v1157_v18 }
 0x8d7   : > { %2053 = vmatpush3.bf16.msra.mxu1 %v2267_v21  ;;  %2075 = vmatpush3.bf16.msra.mxu0 %v2268_v22 }
 0x8d8   : > { %2054 = vmatprep.subr.bf16.mxu1 %v2269_v23  ;;  %2076 = vmatprep.subr.bf16.mxu0 %v2270_v26 }
 0x8db   : > { %2055 = vmatpush3.bf16.msra.mxu1 %v2271_v27  ;;  %2077 = vmatpush3.bf16.msra.mxu0 %v2272_v25 }
 0x8dc   : > { %2056 = vmatprep.subr.bf16.mxu1 %v2273_v28  ;;  %2078 = vmatprep.subr.bf16.mxu0 %v2274_v29 }
 0x8df   : > { %2057 = vmatpush3.bf16.msra.mxu1 %v2275_v30  ;;  %2079 = vmatpush3.bf16.msra.mxu0 %v2276_v1 }
 0x8e0   : > { %2058 = vmatprep.subr.bf16.mxu1 %v2277_v31  ;;  %2080 = vmatprep.subr.bf16.mxu0 %v2278_v32 }
 0x8e3   : > { %2059 = vmatpush3.bf16.msra.mxu1 %v2279_v33  ;;  %2081 = vmatpush3.bf16.msra.mxu0 %v2280_v34 }
 0x8e4   : > { %2060 = vmatprep.subr.bf16.mxu1 %v2281_v35  ;;  %2082 = vmatprep.subr.bf16.mxu0 %v2282_v36 }
 0x8e7   : > { %2061 = vmatpush3.bf16.msra.mxu1 %v2283_v37  ;;  %2083 = vmatpush3.bf16.msra.mxu0 %v2284_v39 }
 0x8e8   : > { %2062 = vmatprep.subr.bf16.mxu1 %v2285_v40  ;;  %2084 = vmatprep.subr.bf16.mxu0 %v2286_v41 }
 0x8eb   : > { %2063 = vmatpush3.bf16.msra.mxu1 %v2287_v43  ;;  %2085 = vmatpush3.bf16.msra.mxu0 %v2288_v44 }
 0x8ec   : > { %2064 = vmatprep.subr.bf16.mxu1 %v2289_v45  ;;  %2086 = vmatprep.subr.bf16.mxu0 %v2290_v46 }
 0x8ef   : > { %2065 = vmatpush3.bf16.msra.mxu1 %v2291_v47  ;;  %2087 = vmatpush3.bf16.msra.mxu0 %v2292_v48 }
 0x8f0   : > { %2066 = vmatprep.subr.bf16.mxu1 %v2293_v49  ;;  %2088 = vmatprep.subr.bf16.mxu0 %v2294_v50 }
 0x8f3   : > { %2067 = vmatpush3.bf16.msra.mxu1 %v2295_v51  ;;  %2089 = vmatpush3.bf16.msra.mxu0 %v2296_v53 }
 0x996   : > { %v1423_v3 = vpop.f32.mrf.mxu1  ;;  %v1464_v4 = vpop.f32.mrf.mxu0 }
 0x997   : > { %v1424_v6 = vadd.f32 %v1423_v3, %v1216_v62  ;;  %v1465_v7 = vadd.f32 %v1464_v4, %v1224_v63 }
 0x998   : > { %v1425_v8 = vpop.f32.mrf.mxu1  ;;  %v1466_v9 = vpop.f32.mrf.mxu0 }
 0x999   : > { %v1471_v10 = vmul.f32 %v1424_v6, %v1424_v6  ;;  %v1473_v54 = vmul.f32 %v1465_v7, %v1465_v7  ;;  %v1426_v11 = vadd.f32 %v1425_v8, %v1220_v0  ;;  %v1467_v38 = vadd.f32 %v1466_v9, %v1228_v2 }
 0x99a   : > { %v1427_v52 = vpop.f32.mrf.mxu1  ;;  %v1468_v12 = vpop.f32.mrf.mxu0 }
 0x99b   : > { %v1475_v13 = vmul.f32 %v1471_v10, %v1424_v6  ;;  %v1477_v5 = vmul.f32 %v1473_v54, %v1465_v7  ;;  %v1472_v14 = vmul.f32 %v1426_v11, %v1426_v11  ;;  %v1474_v16 = vmul.f32 %v1467_v38, %v1467_v38  ;;  %v1858_v10 = vld [vmem:[%s435_s15] sm:$0x7] }
 0x99c   : > { %v1428_v15 = vpop.f32.mrf.mxu1  ;;  %v1469_v17 = vpop.f32.mrf.mxu0 }
 0x99d   : > { %v1479_v18 = vmul.f32 0.044715, %v1475_v13  ;;  %v1481_v19 = vmul.f32 0.044715, %v1477_v5  ;;  %v1476_v20 = vmul.f32 %v1472_v14, %v1426_v11  ;;  %v1478_v21 = vmul.f32 %v1474_v16, %v1467_v38 }
 0x99f   : > { %v1483_v22 = vadd.f32 %v1479_v18, %v1424_v6  ;;  %v1485_v23 = vadd.f32 %v1481_v19, %v1465_v7  ;;  %v1480_v26 = vmul.f32 0.044715, %v1476_v20  ;;  %v1482_v27 = vmul.f32 0.044715, %v1478_v21 }
 0x9a1   : > { %v1487_v25 = vmul.f32 0.7978846, %v1483_v22  ;;  %v1489_v28 = vmul.f32 0.7978846, %v1485_v23  ;;  %v1484_v29 = vadd.f32 %v1480_v26, %v1426_v11  ;;  %v1486_v30 = vadd.f32 %v1482_v27, %v1467_v38 }
 0x9a3   : > { %2309 = vtanh.f32 %v1487_v25  ;;  %v1488_v1 = vmul.f32 0.7978846, %v1484_v29  ;;  %v1490_v31 = vmul.f32 0.7978846, %v1486_v30 }
 0x9a4   : > { %2311 = vtanh.f32 %v1489_v28 }
 0x9a5   : > { %2313 = vtanh.f32 %v1488_v1 }
 0x9a6   : > { %2315 = vtanh.f32 %v1490_v31 }
 0x9b0   : > { %v2310_v32 = vpop.eup %2309 }
 0x9b1   : > { %v2312_v33 = vpop.eup %2311  ;;  %v1495_v34 = vadd.f32 1.0, %v2310_v32 }
 0x9b2   : > { %v2314_v35 = vpop.eup %2313  ;;  %v1497_v36 = vadd.f32 1.0, %v2312_v33 }
 0x9b3   : > { %v2316_v37 = vpop.eup %2315  ;;  %v1496_v39 = vadd.f32 1.0, %v2314_v35  ;;  %v1499_v40 = vmul.f32 0.5, %v1495_v34 }
 0x9b4   : > { %v1498_v41 = vadd.f32 1.0, %v2316_v37  ;;  %v1501_v43 = vmul.f32 0.5, %v1497_v36 }
 0x9b5   : > { %v1500_v44 = vmul.f32 0.5, %v1496_v39  ;;  %v1503_v46 = vmul.f32 %v1499_v40, %v1424_v6 }
 0x9b6   : > { %v1502_v45 = vmul.f32 0.5, %v1498_v41  ;;  %v1505_v48 = vmul.f32 %v1501_v43, %v1465_v7 }
 0x9b7   : > { %v1504_v47 = vmul.f32 %v1500_v44, %v1426_v11  ;;  %v1507_v53 = vpack.c.bf16 %v1503_v46, %v1503_v46 }
 0x9b8   : > { %v1506_v49 = vmul.f32 %v1502_v45, %v1467_v38  ;;  %v1509_v55 = vpack.c.bf16 %v1505_v48, %v1505_v48 }
 0x9b9   : > { %v1508_v50 = vpack.c.bf16 %v1504_v47, %v1504_v47 }
 0x9ba   : > { %v1510_v51 = vpack.c.bf16 %v1506_v49, %v1506_v49 }
 0x9bb   : > { %1805 = vmatprep.mubr.bf16.mxu1 %v1508_v50 }
 0x9bc   : > { %1845 = vmatprep.mubr.bf16.mxu0 %v1510_v51  ;;  %1806 = vmatmul.mubr.bf16.vlgmr.msra.gmra.mxu1 %v1507_v53 }
 0x9bd   : > { %1846 = vmatmul.mubr.bf16.vlgmr.msra.gmra.mxu0 %v1509_v55 }
 0xa7c   : > { %v2068_v58 = vpop.f32.mrf.mxu1 }
 0xa7d   : > { %v2090_v59 = vpop.f32.mrf.mxu0 }
 0xa7e   : > { %v2069_v61 = vpop.f32.mrf.mxu1 }
 0xa7f   : > { %v2070_v62 = vadd.f32 %v2069_v61, %v2068_v58  ;;  %v2091_v63 = vpop.f32.mrf.mxu0 }
 0xa80   : > { %v2071_v0 = vpop.f32.mrf.mxu1  ;;  %v2092_v3 = vadd.f32 %v2091_v63, %v2090_v59 }
 0xa81   : > { %v1808_v2 = vadd.f32 %v2070_v62, %v1580_v60  ;;  %v2093_v4 = vpop.f32.mrf.mxu0 }
 0xa82   : > { %v2072_v6 = vpop.f32.mrf.mxu1 }
 0xa83   : > { %v1848_v7 = vadd.f32 %v2092_v3, %v1808_v2  ;;  %v2094_v8 = vpop.f32.mrf.mxu0 }
 0xa85   : > { %v1853_v9 = vadd.f32 %v1848_v7, %v2615_v24 }
 0xa87   : > { %v1854_v42 = vpack.c.bf16 %v1853_v9, %v1853_v9 }
 0xa89   : > { %v1859_v54 = vsel %vm1857_vm8, %v1854_v42, %v1858_v10 }
 0xa8a   : > { %1860 = vst [vmem:[%s435_s15] sm:$0x7] %v1859_v54 }
 0xa8b PF: > { %s23_s25 = sadd.s32 1, %s2323_s25  }
 0xa8c   : > { %p20_p4 = scmp.ge.s32.totalorder %s23_s25, 4  }
 0xa8e   :  { %22 = sbr.rel (!%p20_p4) target bundleno = 1 (0x1), region = 102 }

</bundles_post_ra>
